<compile_context>
chip_gen: v7x
topology: tpu7x:2x2x1
jax: 0.10.0
libtpu: 0.0.40
codegen_flags: <defaults>
</compile_context>

<pallas_src>
import jax
import jax.numpy as jnp
from jax import lax
from jax.experimental import pallas as pl
from jax.experimental.pallas import tpu as pltpu


def _round_up(x, m):
    return (x + m - 1) // m * m


def _make_fused_kernel(oh, ow, cin, c1p, c2p):
    """Fused conv1(3x3,s1,p1)+ReLU -> conv2(3x3,s2,p1)+ReLU -> pool -> FC.

    One grid program == one image.
      xps_ref: [4, oh+1, ow+1, cin]  parity-split zero-padded input; slab 2a+b
               holds xpad[a::2, b::2, :].
      f1_ref : [4, oh+1, ow+1, c1p]  parity-split zero-padded relu(conv1) output
               (VMEM scratch).
    """
    m = oh * ow

    def kernel(xps_ref, w1_ref, b1_ref, w2_ref, b2_ref, wfc_ref, bfc_ref,
               o_ref, f1_ref):
        # Border of the conv1-output buffer must be zero (it is conv2's padding).
        f1_ref[...] = jnp.zeros_like(f1_ref)

        # ---- conv1: shift-and-accumulate matmuls, one output-parity class at a
        # time.  Output pixel (2j+ay, 2k+ax) needs padded-input pixel
        # (2j+ay+dy, 2k+ax+dx) -> parity slab ((ay+dy)%2, (ax+dx)%2) at block
        # offset ((ay+dy)//2 + j, (ax+dx)//2 + k): a contiguous static slice.
        for ay in range(2):
            for ax in range(2):
                acc = jnp.zeros((m, c1p), jnp.float32)
                for dy in range(3):
                    for dx in range(3):
                        ry, qy = (ay + dy) % 2, (ay + dy) // 2
                        rx, qx = (ax + dx) % 2, (ax + dx) // 2
                        win = xps_ref[2 * ry + rx, qy:qy + oh, qx:qx + ow, :]
                        acc = acc + jnp.dot(
                            win.reshape(m, cin), w1_ref[3 * dy + dx],
                            preferred_element_type=jnp.float32)
                c1 = jnp.maximum(acc + b1_ref[...], 0.0)
                # Output pixel (2j+ay, 2k+ax) lives at padded coordinate
                # (2j+ay+1, 2k+ax+1) of the conv2 input.
                ty, sy = (ay + 1) % 2, (ay + 1) // 2
                tx, sx = (ax + 1) % 2, (ax + 1) // 2
                f1_ref[2 * ty + tx, sy:sy + oh, sx:sx + ow, :] = (
                    c1.reshape(oh, ow, c1p))

        # ---- conv2 (stride 2): output (oy, ox) needs padded conv1 pixel
        # (2*oy+dy, 2*ox+dx) -> parity slab (dy%2, dx%2), block (dy//2 + oy, ...).
        acc2 = jnp.zeros((m, c2p), jnp.float32)
        for dy in range(3):
            for dx in range(3):
                vy, uy = dy % 2, dy // 2
                vx, ux = dx % 2, dx // 2
                win = f1_ref[2 * vy + vx, uy:uy + oh, ux:ux + ow, :]
                acc2 = acc2 + jnp.dot(
                    win.reshape(m, c1p), w2_ref[3 * dy + dx],
                    preferred_element_type=jnp.float32)
        feat = jnp.maximum(acc2 + b2_ref[...], 0.0)      # [m, c2p], already >= 0

        # ---- head: F.relu(features) is a no-op here (feat already ReLU'd);
        # global average pool + Linear(C, 1) done as VPU multiply + lane-reduce
        # (a [m,c2p]x[c2p,1] matmul would waste the MXU and emit width-1 stores).
        pooled = jnp.mean(feat, axis=0, keepdims=True)   # [1, c2p]
        res = jnp.sum(pooled * wfc_ref[...], axis=1, keepdims=True) + bfc_ref[...]
        o_ref[...] = res.reshape(1, 1, 1)

    return kernel


def convnet_model_forward(x_nchw, params):
    n, cin, h, w = x_nchw.shape
    assert h % 2 == 0 and w % 2 == 0, "toy trunk assumes even spatial dims"
    oh, ow = h // 2, w // 2
    c1 = params["w1"].shape[-1]
    c2 = params["w2"].shape[-1]
    c1p = _round_up(c1, 128)                 # lane-dense padded channel counts
    c2p = _round_up(c2, 128)

    # ---- plain-JAX glue (one-time layout/param prep, no hot-path compute) ----
    x = jnp.transpose(x_nchw, (0, 2, 3, 1)).astype(jnp.float32)       # NHWC
    xpad = jnp.pad(x, ((0, 0), (1, 1), (1, 1), (0, 0)))               # conv pad=1
    # Parity-split so the in-kernel stride-2 conv needs only contiguous slices.
    xps = jnp.stack(
        [xpad[:, a::2, b::2, :] for a in range(2) for b in range(2)], axis=1)
    xps = xps.reshape(n * 4, oh + 1, ow + 1, cin)

    # Zero-pad channel dims to 128 (exact: padded weights/biases are zero).
    w1p = jnp.pad(params["w1"], ((0, 0), (0, 0), (0, 0), (0, c1p - c1)))
    w1p = w1p.reshape(9, cin, c1p)
    b1p = jnp.pad(params["b1"], (0, c1p - c1)).reshape(1, c1p)
    w2p = jnp.pad(params["w2"], ((0, 0), (0, 0), (0, c1p - c1), (0, c2p - c2)))
    w2p = w2p.reshape(9, c1p, c2p)
    b2p = jnp.pad(params["b2"], (0, c2p - c2)).reshape(1, c2p)
    wfcp = jnp.pad(params["w_fc"].reshape(-1), (0, c2p - c2)).reshape(1, c2p)
    bfcp = params["b_fc"].reshape(1, 1)

    kernel = _make_fused_kernel(oh, ow, cin, c1p, c2p)
    out = pl.pallas_call(
        kernel,
        out_shape=jax.ShapeDtypeStruct((n, 1, 1), jnp.float32),
        grid=(n,),
        in_specs=[
            pl.BlockSpec((4, oh + 1, ow + 1, cin), lambda i: (i, 0, 0, 0)),
            pl.BlockSpec((9, cin, c1p), lambda i: (0, 0, 0)),
            pl.BlockSpec((1, c1p), lambda i: (0, 0)),
            pl.BlockSpec((9, c1p, c2p), lambda i: (0, 0, 0)),
            pl.BlockSpec((1, c2p), lambda i: (0, 0)),
            pl.BlockSpec((1, c2p), lambda i: (0, 0)),
            pl.BlockSpec((1, 1), lambda i: (0, 0)),
        ],
        out_specs=pl.BlockSpec((1, 1, 1), lambda i: (i, 0, 0)),
        scratch_shapes=[pltpu.VMEM((4, oh + 1, ow + 1, c1p), jnp.float32)],
        compiler_params=pltpu.CompilerParams(
            dimension_semantics=("parallel",)),   # batch across TCs (v7x megacore)
    )(xps, w1p, b1p, w2p, b2p, wfcp, bfcp)
    return out.reshape(n, 1)


# ---------------------------------------------------------------------------
# Pure-JAX reference (same forward semantics) for a correctness check.
# ---------------------------------------------------------------------------
def _reference_forward(x_nchw, params):
    dn = ("NHWC", "HWIO", "NHWC")
    hp = lax.Precision.HIGHEST
    x = jnp.transpose(x_nchw, (0, 2, 3, 1)).astype(jnp.float32)
    y = lax.conv_general_dilated(x, params["w1"], (1, 1), ((1, 1), (1, 1)),
                                 dimension_numbers=dn, precision=hp)
    y = jnp.maximum(y + params["b1"], 0.0)
    y = lax.conv_general_dilated(y, params["w2"], (2, 2), ((1, 1), (1, 1)),
                                 dimension_numbers=dn, precision=hp)
    y = jnp.maximum(y + params["b2"], 0.0)
    pooled = jnp.mean(jnp.maximum(y, 0.0), axis=(1, 2))
    return jnp.dot(pooled, params["w_fc"], precision=hp) + params["b_fc"]


def init_params(key):
    k1, k2, k3 = jax.random.split(key, 3)
    c_in, c1, c2 = 4, 32, 64
    return {
        "w1": 0.1 * jax.random.normal(k1, (3, 3, c_in, c1), jnp.float32),
        "b1": jnp.zeros((c1,), jnp.float32),
        "w2": 0.1 * jax.random.normal(k2, (3, 3, c1, c2), jnp.float32),
        "b2": jnp.zeros((c2,), jnp.float32),
        "w_fc": 0.1 * jax.random.normal(k3, (c2, 1), jnp.float32),
        "b_fc": jnp.zeros((1,), jnp.float32),
    }


if __name__ == "__main__":
    key = jax.random.PRNGKey(0)
    pkey, xkey = jax.random.split(key)
    params = init_params(pkey)
    x = jax.random.normal(xkey, (2, 4, 16, 16), jnp.float32)   # NCHW input

    out = jax.jit(convnet_model_forward)(x, params)
    out = jax.block_until_ready(out)
    assert out.shape == (2, 1), out.shape

    ref = _reference_forward(x, params)
    err = float(jnp.max(jnp.abs(out - ref)))
    assert err < 5e-3, f"mismatch vs reference: {err}"
    print("KERNEL_OK")
</pallas_src>

<mosaic_0001>
module attributes {stable_mosaic.version = 11 : i64} {
  func.func @kernel(%arg0: i32, %arg1: memref<4x9x9x4xf32, #tpu.memory_space<vmem>>, %arg2: memref<9x4x128xf32, #tpu.memory_space<vmem>>, %arg3: memref<1x128xf32, #tpu.memory_space<vmem>>, %arg4: memref<9x128x128xf32, #tpu.memory_space<vmem>>, %arg5: memref<1x128xf32, #tpu.memory_space<vmem>>, %arg6: memref<1x128xf32, #tpu.memory_space<vmem>>, %arg7: memref<1x1xf32, #tpu.memory_space<vmem>>, %arg8: memref<1x1x1xf32, #tpu.memory_space<vmem>>, %arg9: memref<4x9x9x128xf32, #tpu.memory_space<vmem>>) attributes {dimension_semantics = [#tpu.dimension_semantics<parallel>], iteration_bounds = array<i64: 2>, scalar_prefetch = 0 : i64, scratch_operands = 1 : i64, tpu.core_type = #tpu.core_type<tc>, window_params = [{transform_indices = @transform_0, window_bounds = array<i64: 4, 9, 9, 4>}, {pipeline_mode = #tpu.pipeline_mode<synchronous>, transform_indices = @transform_1, window_bounds = array<i64: 9, 4, 128>}, {pipeline_mode = #tpu.pipeline_mode<synchronous>, transform_indices = @transform_2, window_bounds = array<i64: 1, 128>}, {pipeline_mode = #tpu.pipeline_mode<synchronous>, transform_indices = @transform_3, window_bounds = array<i64: 9, 128, 128>}, {pipeline_mode = #tpu.pipeline_mode<synchronous>, transform_indices = @transform_4, window_bounds = array<i64: 1, 128>}, {pipeline_mode = #tpu.pipeline_mode<synchronous>, transform_indices = @transform_5, window_bounds = array<i64: 1, 128>}, {pipeline_mode = #tpu.pipeline_mode<synchronous>, transform_indices = @transform_6, window_bounds = array<i64: 1, 1>}, {transform_indices = @transform_7, window_bounds = array<i64: 1, 1, 1>}]} {
    %cst = arith.constant 0.000000e+00 : f32
    %0 = vector.broadcast %cst : f32 to vector<4x9x9x128xf32>
    %c0 = arith.constant 0 : index
    %c0_0 = arith.constant 0 : index
    %c0_1 = arith.constant 0 : index
    %c0_2 = arith.constant 0 : index
    %1 = vector.load %arg9[%c0, %c0_0, %c0_1, %c0_2] : memref<4x9x9x128xf32, #tpu.memory_space<vmem>>, vector<4x9x9x128xf32>
    tpu.vector_store %arg9[%c0, %c0_0, %c0_1, %c0_2], %0 {strides = array<i32>} : memref<4x9x9x128xf32, #tpu.memory_space<vmem>>, vector<4x9x9x128xf32>,
    %cst_3 = arith.constant 0.000000e+00 : f32
    %2 = vector.broadcast %cst_3 : f32 to vector<64x128xf32>
    %c0_4 = arith.constant 0 : index
    %c0_5 = arith.constant 0 : index
    %c0_6 = arith.constant 0 : index
    %c0_7 = arith.constant 0 : index
    %3 = vector.load %arg1[%c0_4, %c0_5, %c0_6, %c0_7] : memref<4x9x9x4xf32, #tpu.memory_space<vmem>>, vector<1x8x8x4xf32>
    %4 = vector.shape_cast %3 : vector<1x8x8x4xf32> to vector<8x8x4xf32>
    %5 = vector.shape_cast %4 : vector<8x8x4xf32> to vector<64x4xf32>
    %c0_8 = arith.constant 0 : index
    %c0_9 = arith.constant 0 : index
    %c0_10 = arith.constant 0 : index
    %6 = vector.load %arg2[%c0_8, %c0_9, %c0_10] : memref<9x4x128xf32, #tpu.memory_space<vmem>>, vector<1x4x128xf32>
    %7 = vector.shape_cast %6 : vector<1x4x128xf32> to vector<4x128xf32>
    %cst_11 = arith.constant dense<0.000000e+00> : vector<64x128xf32>
    %8 = tpu.matmul %5, %7, %cst_11 {dimension_numbers = #tpu.dot_dimension_numbers<[1], [0], [0], [1], [0, 0, 1, 1], [], []>} : vector<64x4xf32>, vector<4x128xf32>, vector<64x128xf32> -> vector<64x128xf32>
    %9 = arith.addf %2, %8 : vector<64x128xf32>
    %c1 = arith.constant 1 : index
    %c0_12 = arith.constant 0 : index
    %c0_13 = arith.constant 0 : index
    %c0_14 = arith.constant 0 : index
    %10 = vector.load %arg1[%c1, %c0_12, %c0_13, %c0_14] : memref<4x9x9x4xf32, #tpu.memory_space<vmem>>, vector<1x8x8x4xf32>
    %11 = vector.shape_cast %10 : vector<1x8x8x4xf32> to vector<8x8x4xf32>
    %12 = vector.shape_cast %11 : vector<8x8x4xf32> to vector<64x4xf32>
    %c1_15 = arith.constant 1 : index
    %c0_16 = arith.constant 0 : index
    %c0_17 = arith.constant 0 : index
    %13 = vector.load %arg2[%c1_15, %c0_16, %c0_17] : memref<9x4x128xf32, #tpu.memory_space<vmem>>, vector<1x4x128xf32>
    %14 = vector.shape_cast %13 : vector<1x4x128xf32> to vector<4x128xf32>
    %cst_18 = arith.constant dense<0.000000e+00> : vector<64x128xf32>
    %15 = tpu.matmul %12, %14, %cst_18 {dimension_numbers = #tpu.dot_dimension_numbers<[1], [0], [0], [1], [0, 0, 1, 1], [], []>} : vector<64x4xf32>, vector<4x128xf32>, vector<64x128xf32> -> vector<64x128xf32>
    %16 = arith.addf %9, %15 : vector<64x128xf32>
    %c0_19 = arith.constant 0 : index
    %c0_20 = arith.constant 0 : index
    %c1_21 = arith.constant 1 : index
    %c0_22 = arith.constant 0 : index
    %17 = vector.load %arg1[%c0_19, %c0_20, %c1_21, %c0_22] : memref<4x9x9x4xf32, #tpu.memory_space<vmem>>, vector<1x8x8x4xf32>
    %18 = vector.shape_cast %17 : vector<1x8x8x4xf32> to vector<8x8x4xf32>
    %19 = vector.shape_cast %18 : vector<8x8x4xf32> to vector<64x4xf32>
    %c2 = arith.constant 2 : index
    %c0_23 = arith.constant 0 : index
    %c0_24 = arith.constant 0 : index
    %20 = vector.load %arg2[%c2, %c0_23, %c0_24] : memref<9x4x128xf32, #tpu.memory_space<vmem>>, vector<1x4x128xf32>
    %21 = vector.shape_cast %20 : vector<1x4x128xf32> to vector<4x128xf32>
    %cst_25 = arith.constant dense<0.000000e+00> : vector<64x128xf32>
    %22 = tpu.matmul %19, %21, %cst_25 {dimension_numbers = #tpu.dot_dimension_numbers<[1], [0], [0], [1], [0, 0, 1, 1], [], []>} : vector<64x4xf32>, vector<4x128xf32>, vector<64x128xf32> -> vector<64x128xf32>
    %23 = arith.addf %16, %22 : vector<64x128xf32>
    %c2_26 = arith.constant 2 : index
    %c0_27 = arith.constant 0 : index
    %c0_28 = arith.constant 0 : index
    %c0_29 = arith.constant 0 : index
    %24 = vector.load %arg1[%c2_26, %c0_27, %c0_28, %c0_29] : memref<4x9x9x4xf32, #tpu.memory_space<vmem>>, vector<1x8x8x4xf32>
    %25 = vector.shape_cast %24 : vector<1x8x8x4xf32> to vector<8x8x4xf32>
    %26 = vector.shape_cast %25 : vector<8x8x4xf32> to vector<64x4xf32>
    %c3 = arith.constant 3 : index
    %c0_30 = arith.constant 0 : index
    %c0_31 = arith.constant 0 : index
    %27 = vector.load %arg2[%c3, %c0_30, %c0_31] : memref<9x4x128xf32, #tpu.memory_space<vmem>>, vector<1x4x128xf32>
    %28 = vector.shape_cast %27 : vector<1x4x128xf32> to vector<4x128xf32>
    %cst_32 = arith.constant dense<0.000000e+00> : vector<64x128xf32>
    %29 = tpu.matmul %26, %28, %cst_32 {dimension_numbers = #tpu.dot_dimension_numbers<[1], [0], [0], [1], [0, 0, 1, 1], [], []>} : vector<64x4xf32>, vector<4x128xf32>, vector<64x128xf32> -> vector<64x128xf32>
    %30 = arith.addf %23, %29 : vector<64x128xf32>
    %c3_33 = arith.constant 3 : index
    %c0_34 = arith.constant 0 : index
    %c0_35 = arith.constant 0 : index
    %c0_36 = arith.constant 0 : index
    %31 = vector.load %arg1[%c3_33, %c0_34, %c0_35, %c0_36] : memref<4x9x9x4xf32, #tpu.memory_space<vmem>>, vector<1x8x8x4xf32>
    %32 = vector.shape_cast %31 : vector<1x8x8x4xf32> to vector<8x8x4xf32>
    %33 = vector.shape_cast %32 : vector<8x8x4xf32> to vector<64x4xf32>
    %c4 = arith.constant 4 : index
    %c0_37 = arith.constant 0 : index
    %c0_38 = arith.constant 0 : index
    %34 = vector.load %arg2[%c4, %c0_37, %c0_38] : memref<9x4x128xf32, #tpu.memory_space<vmem>>, vector<1x4x128xf32>
    %35 = vector.shape_cast %34 : vector<1x4x128xf32> to vector<4x128xf32>
    %cst_39 = arith.constant dense<0.000000e+00> : vector<64x128xf32>
    %36 = tpu.matmul %33, %35, %cst_39 {dimension_numbers = #tpu.dot_dimension_numbers<[1], [0], [0], [1], [0, 0, 1, 1], [], []>} : vector<64x4xf32>, vector<4x128xf32>, vector<64x128xf32> -> vector<64x128xf32>
    %37 = arith.addf %30, %36 : vector<64x128xf32>
    %c2_40 = arith.constant 2 : index
    %c0_41 = arith.constant 0 : index
    %c1_42 = arith.constant 1 : index
    %c0_43 = arith.constant 0 : index
    %38 = vector.load %arg1[%c2_40, %c0_41, %c1_42, %c0_43] : memref<4x9x9x4xf32, #tpu.memory_space<vmem>>, vector<1x8x8x4xf32>
    %39 = vector.shape_cast %38 : vector<1x8x8x4xf32> to vector<8x8x4xf32>
    %40 = vector.shape_cast %39 : vector<8x8x4xf32> to vector<64x4xf32>
    %c5 = arith.constant 5 : index
    %c0_44 = arith.constant 0 : index
    %c0_45 = arith.constant 0 : index
    %41 = vector.load %arg2[%c5, %c0_44, %c0_45] : memref<9x4x128xf32, #tpu.memory_space<vmem>>, vector<1x4x128xf32>
    %42 = vector.shape_cast %41 : vector<1x4x128xf32> to vector<4x128xf32>
    %cst_46 = arith.constant dense<0.000000e+00> : vector<64x128xf32>
    %43 = tpu.matmul %40, %42, %cst_46 {dimension_numbers = #tpu.dot_dimension_numbers<[1], [0], [0], [1], [0, 0, 1, 1], [], []>} : vector<64x4xf32>, vector<4x128xf32>, vector<64x128xf32> -> vector<64x128xf32>
    %44 = arith.addf %37, %43 : vector<64x128xf32>
    %c0_47 = arith.constant 0 : index
    %c1_48 = arith.constant 1 : index
    %c0_49 = arith.constant 0 : index
    %c0_50 = arith.constant 0 : index
    %45 = vector.load %arg1[%c0_47, %c1_48, %c0_49, %c0_50] : memref<4x9x9x4xf32, #tpu.memory_space<vmem>>, vector<1x8x8x4xf32>
    %46 = vector.shape_cast %45 : vector<1x8x8x4xf32> to vector<8x8x4xf32>
    %47 = vector.shape_cast %46 : vector<8x8x4xf32> to vector<64x4xf32>
    %c6 = arith.constant 6 : index
    %c0_51 = arith.constant 0 : index
    %c0_52 = arith.constant 0 : index
    %48 = vector.load %arg2[%c6, %c0_51, %c0_52] : memref<9x4x128xf32, #tpu.memory_space<vmem>>, vector<1x4x128xf32>
    %49 = vector.shape_cast %48 : vector<1x4x128xf32> to vector<4x128xf32>
    %cst_53 = arith.constant dense<0.000000e+00> : vector<64x128xf32>
    %50 = tpu.matmul %47, %49, %cst_53 {dimension_numbers = #tpu.dot_dimension_numbers<[1], [0], [0], [1], [0, 0, 1, 1], [], []>} : vector<64x4xf32>, vector<4x128xf32>, vector<64x128xf32> -> vector<64x128xf32>
    %51 = arith.addf %44, %50 : vector<64x128xf32>
    %c1_54 = arith.constant 1 : index
    %c1_55 = arith.constant 1 : index
    %c0_56 = arith.constant 0 : index
    %c0_57 = arith.constant 0 : index
    %52 = vector.load %arg1[%c1_54, %c1_55, %c0_56, %c0_57] : memref<4x9x9x4xf32, #tpu.memory_space<vmem>>, vector<1x8x8x4xf32>
    %53 = vector.shape_cast %52 : vector<1x8x8x4xf32> to vector<8x8x4xf32>
    %54 = vector.shape_cast %53 : vector<8x8x4xf32> to vector<64x4xf32>
    %c7 = arith.constant 7 : index
    %c0_58 = arith.constant 0 : index
    %c0_59 = arith.constant 0 : index
    %55 = vector.load %arg2[%c7, %c0_58, %c0_59] : memref<9x4x128xf32, #tpu.memory_space<vmem>>, vector<1x4x128xf32>
    %56 = vector.shape_cast %55 : vector<1x4x128xf32> to vector<4x128xf32>
    %cst_60 = arith.constant dense<0.000000e+00> : vector<64x128xf32>
    %57 = tpu.matmul %54, %56, %cst_60 {dimension_numbers = #tpu.dot_dimension_numbers<[1], [0], [0], [1], [0, 0, 1, 1], [], []>} : vector<64x4xf32>, vector<4x128xf32>, vector<64x128xf32> -> vector<64x128xf32>
    %58 = arith.addf %51, %57 : vector<64x128xf32>
    %c0_61 = arith.constant 0 : index
    %c1_62 = arith.constant 1 : index
    %c1_63 = arith.constant 1 : index
    %c0_64 = arith.constant 0 : index
    %59 = vector.load %arg1[%c0_61, %c1_62, %c1_63, %c0_64] : memref<4x9x9x4xf32, #tpu.memory_space<vmem>>, vector<1x8x8x4xf32>
    %60 = vector.shape_cast %59 : vector<1x8x8x4xf32> to vector<8x8x4xf32>
    %61 = vector.shape_cast %60 : vector<8x8x4xf32> to vector<64x4xf32>
    %c8 = arith.constant 8 : index
    %c0_65 = arith.constant 0 : index
    %c0_66 = arith.constant 0 : index
    %62 = vector.load %arg2[%c8, %c0_65, %c0_66] : memref<9x4x128xf32, #tpu.memory_space<vmem>>, vector<1x4x128xf32>
    %63 = vector.shape_cast %62 : vector<1x4x128xf32> to vector<4x128xf32>
    %cst_67 = arith.constant dense<0.000000e+00> : vector<64x128xf32>
    %64 = tpu.matmul %61, %63, %cst_67 {dimension_numbers = #tpu.dot_dimension_numbers<[1], [0], [0], [1], [0, 0, 1, 1], [], []>} : vector<64x4xf32>, vector<4x128xf32>, vector<64x128xf32> -> vector<64x128xf32>
    %65 = arith.addf %58, %64 : vector<64x128xf32>
    %c0_68 = arith.constant 0 : index
    %c0_69 = arith.constant 0 : index
    %66 = vector.load %arg3[%c0_68, %c0_69] : memref<1x128xf32, #tpu.memory_space<vmem>>, vector<1x128xf32>
    %67 = vector.broadcast %66 : vector<1x128xf32> to vector<64x128xf32>
    %68 = arith.addf %65, %67 : vector<64x128xf32>
    %cst_70 = arith.constant 0.000000e+00 : f32
    %69 = vector.broadcast %cst_70 : f32 to vector<64x128xf32>
    %70 = arith.maximumf %68, %69 : vector<64x128xf32>
    %71 = vector.shape_cast %70 : vector<64x128xf32> to vector<8x8x128xf32>
    %c3_71 = arith.constant 3 : index
    %c0_72 = arith.constant 0 : index
    %c0_73 = arith.constant 0 : index
    %c0_74 = arith.constant 0 : index
    %72 = vector.load %arg9[%c3_71, %c0_72, %c0_73, %c0_74] : memref<4x9x9x128xf32, #tpu.memory_space<vmem>>, vector<1x8x8x128xf32>
    %73 = vector.shape_cast %72 : vector<1x8x8x128xf32> to vector<8x8x128xf32>
    %74 = vector.shape_cast %71 : vector<8x8x128xf32> to vector<1x8x8x128xf32>
    tpu.vector_store %arg9[%c3_71, %c0_72, %c0_73, %c0_74], %74 {strides = array<i32>} : memref<4x9x9x128xf32, #tpu.memory_space<vmem>>, vector<1x8x8x128xf32>,
    %cst_75 = arith.constant 0.000000e+00 : f32
    %75 = vector.broadcast %cst_75 : f32 to vector<64x128xf32>
    %c1_76 = arith.constant 1 : index
    %c0_77 = arith.constant 0 : index
    %c0_78 = arith.constant 0 : index
    %c0_79 = arith.constant 0 : index
    %76 = vector.load %arg1[%c1_76, %c0_77, %c0_78, %c0_79] : memref<4x9x9x4xf32, #tpu.memory_space<vmem>>, vector<1x8x8x4xf32>
    %77 = vector.shape_cast %76 : vector<1x8x8x4xf32> to vector<8x8x4xf32>
    %78 = vector.shape_cast %77 : vector<8x8x4xf32> to vector<64x4xf32>
    %c0_80 = arith.constant 0 : index
    %c0_81 = arith.constant 0 : index
    %c0_82 = arith.constant 0 : index
    %79 = vector.load %arg2[%c0_80, %c0_81, %c0_82] : memref<9x4x128xf32, #tpu.memory_space<vmem>>, vector<1x4x128xf32>
    %80 = vector.shape_cast %79 : vector<1x4x128xf32> to vector<4x128xf32>
    %cst_83 = arith.constant dense<0.000000e+00> : vector<64x128xf32>
    %81 = tpu.matmul %78, %80, %cst_83 {dimension_numbers = #tpu.dot_dimension_numbers<[1], [0], [0], [1], [0, 0, 1, 1], [], []>} : vector<64x4xf32>, vector<4x128xf32>, vector<64x128xf32> -> vector<64x128xf32>
    %82 = arith.addf %75, %81 : vector<64x128xf32>
    %c0_84 = arith.constant 0 : index
    %c0_85 = arith.constant 0 : index
    %c1_86 = arith.constant 1 : index
    %c0_87 = arith.constant 0 : index
    %83 = vector.load %arg1[%c0_84, %c0_85, %c1_86, %c0_87] : memref<4x9x9x4xf32, #tpu.memory_space<vmem>>, vector<1x8x8x4xf32>
    %84 = vector.shape_cast %83 : vector<1x8x8x4xf32> to vector<8x8x4xf32>
    %85 = vector.shape_cast %84 : vector<8x8x4xf32> to vector<64x4xf32>
    %c1_88 = arith.constant 1 : index
    %c0_89 = arith.constant 0 : index
    %c0_90 = arith.constant 0 : index
    %86 = vector.load %arg2[%c1_88, %c0_89, %c0_90] : memref<9x4x128xf32, #tpu.memory_space<vmem>>, vector<1x4x128xf32>
    %87 = vector.shape_cast %86 : vector<1x4x128xf32> to vector<4x128xf32>
    %cst_91 = arith.constant dense<0.000000e+00> : vector<64x128xf32>
    %88 = tpu.matmul %85, %87, %cst_91 {dimension_numbers = #tpu.dot_dimension_numbers<[1], [0], [0], [1], [0, 0, 1, 1], [], []>} : vector<64x4xf32>, vector<4x128xf32>, vector<64x128xf32> -> vector<64x128xf32>
    %89 = arith.addf %82, %88 : vector<64x128xf32>
    %c1_92 = arith.constant 1 : index
    %c0_93 = arith.constant 0 : index
    %c1_94 = arith.constant 1 : index
    %c0_95 = arith.constant 0 : index
    %90 = vector.load %arg1[%c1_92, %c0_93, %c1_94, %c0_95] : memref<4x9x9x4xf32, #tpu.memory_space<vmem>>, vector<1x8x8x4xf32>
    %91 = vector.shape_cast %90 : vector<1x8x8x4xf32> to vector<8x8x4xf32>
    %92 = vector.shape_cast %91 : vector<8x8x4xf32> to vector<64x4xf32>
    %c2_96 = arith.constant 2 : index
    %c0_97 = arith.constant 0 : index
    %c0_98 = arith.constant 0 : index
    %93 = vector.load %arg2[%c2_96, %c0_97, %c0_98] : memref<9x4x128xf32, #tpu.memory_space<vmem>>, vector<1x4x128xf32>
    %94 = vector.shape_cast %93 : vector<1x4x128xf32> to vector<4x128xf32>
    %cst_99 = arith.constant dense<0.000000e+00> : vector<64x128xf32>
    %95 = tpu.matmul %92, %94, %cst_99 {dimension_numbers = #tpu.dot_dimension_numbers<[1], [0], [0], [1], [0, 0, 1, 1], [], []>} : vector<64x4xf32>, vector<4x128xf32>, vector<64x128xf32> -> vector<64x128xf32>
    %96 = arith.addf %89, %95 : vector<64x128xf32>
    %c3_100 = arith.constant 3 : index
    %c0_101 = arith.constant 0 : index
    %c0_102 = arith.constant 0 : index
    %c0_103 = arith.constant 0 : index
    %97 = vector.load %arg1[%c3_100, %c0_101, %c0_102, %c0_103] : memref<4x9x9x4xf32, #tpu.memory_space<vmem>>, vector<1x8x8x4xf32>
    %98 = vector.shape_cast %97 : vector<1x8x8x4xf32> to vector<8x8x4xf32>
    %99 = vector.shape_cast %98 : vector<8x8x4xf32> to vector<64x4xf32>
    %c3_104 = arith.constant 3 : index
    %c0_105 = arith.constant 0 : index
    %c0_106 = arith.constant 0 : index
    %100 = vector.load %arg2[%c3_104, %c0_105, %c0_106] : memref<9x4x128xf32, #tpu.memory_space<vmem>>, vector<1x4x128xf32>
    %101 = vector.shape_cast %100 : vector<1x4x128xf32> to vector<4x128xf32>
    %cst_107 = arith.constant dense<0.000000e+00> : vector<64x128xf32>
    %102 = tpu.matmul %99, %101, %cst_107 {dimension_numbers = #tpu.dot_dimension_numbers<[1], [0], [0], [1], [0, 0, 1, 1], [], []>} : vector<64x4xf32>, vector<4x128xf32>, vector<64x128xf32> -> vector<64x128xf32>
    %103 = arith.addf %96, %102 : vector<64x128xf32>
    %c2_108 = arith.constant 2 : index
    %c0_109 = arith.constant 0 : index
    %c1_110 = arith.constant 1 : index
    %c0_111 = arith.constant 0 : index
    %104 = vector.load %arg1[%c2_108, %c0_109, %c1_110, %c0_111] : memref<4x9x9x4xf32, #tpu.memory_space<vmem>>, vector<1x8x8x4xf32>
    %105 = vector.shape_cast %104 : vector<1x8x8x4xf32> to vector<8x8x4xf32>
    %106 = vector.shape_cast %105 : vector<8x8x4xf32> to vector<64x4xf32>
    %c4_112 = arith.constant 4 : index
    %c0_113 = arith.constant 0 : index
    %c0_114 = arith.constant 0 : index
    %107 = vector.load %arg2[%c4_112, %c0_113, %c0_114] : memref<9x4x128xf32, #tpu.memory_space<vmem>>, vector<1x4x128xf32>
    %108 = vector.shape_cast %107 : vector<1x4x128xf32> to vector<4x128xf32>
    %cst_115 = arith.constant dense<0.000000e+00> : vector<64x128xf32>
    %109 = tpu.matmul %106, %108, %cst_115 {dimension_numbers = #tpu.dot_dimension_numbers<[1], [0], [0], [1], [0, 0, 1, 1], [], []>} : vector<64x4xf32>, vector<4x128xf32>, vector<64x128xf32> -> vector<64x128xf32>
    %110 = arith.addf %103, %109 : vector<64x128xf32>
    %c3_116 = arith.constant 3 : index
    %c0_117 = arith.constant 0 : index
    %c1_118 = arith.constant 1 : index
    %c0_119 = arith.constant 0 : index
    %111 = vector.load %arg1[%c3_116, %c0_117, %c1_118, %c0_119] : memref<4x9x9x4xf32, #tpu.memory_space<vmem>>, vector<1x8x8x4xf32>
    %112 = vector.shape_cast %111 : vector<1x8x8x4xf32> to vector<8x8x4xf32>
    %113 = vector.shape_cast %112 : vector<8x8x4xf32> to vector<64x4xf32>
    %c5_120 = arith.constant 5 : index
    %c0_121 = arith.constant 0 : index
    %c0_122 = arith.constant 0 : index
    %114 = vector.load %arg2[%c5_120, %c0_121, %c0_122] : memref<9x4x128xf32, #tpu.memory_space<vmem>>, vector<1x4x128xf32>
    %115 = vector.shape_cast %114 : vector<1x4x128xf32> to vector<4x128xf32>
    %cst_123 = arith.constant dense<0.000000e+00> : vector<64x128xf32>
    %116 = tpu.matmul %113, %115, %cst_123 {dimension_numbers = #tpu.dot_dimension_numbers<[1], [0], [0], [1], [0, 0, 1, 1], [], []>} : vector<64x4xf32>, vector<4x128xf32>, vector<64x128xf32> -> vector<64x128xf32>
    %117 = arith.addf %110, %116 : vector<64x128xf32>
    %c1_124 = arith.constant 1 : index
    %c1_125 = arith.constant 1 : index
    %c0_126 = arith.constant 0 : index
    %c0_127 = arith.constant 0 : index
    %118 = vector.load %arg1[%c1_124, %c1_125, %c0_126, %c0_127] : memref<4x9x9x4xf32, #tpu.memory_space<vmem>>, vector<1x8x8x4xf32>
    %119 = vector.shape_cast %118 : vector<1x8x8x4xf32> to vector<8x8x4xf32>
    %120 = vector.shape_cast %119 : vector<8x8x4xf32> to vector<64x4xf32>
    %c6_128 = arith.constant 6 : index
    %c0_129 = arith.constant 0 : index
    %c0_130 = arith.constant 0 : index
    %121 = vector.load %arg2[%c6_128, %c0_129, %c0_130] : memref<9x4x128xf32, #tpu.memory_space<vmem>>, vector<1x4x128xf32>
    %122 = vector.shape_cast %121 : vector<1x4x128xf32> to vector<4x128xf32>
    %cst_131 = arith.constant dense<0.000000e+00> : vector<64x128xf32>
    %123 = tpu.matmul %120, %122, %cst_131 {dimension_numbers = #tpu.dot_dimension_numbers<[1], [0], [0], [1], [0, 0, 1, 1], [], []>} : vector<64x4xf32>, vector<4x128xf32>, vector<64x128xf32> -> vector<64x128xf32>
    %124 = arith.addf %117, %123 : vector<64x128xf32>
    %c0_132 = arith.constant 0 : index
    %c1_133 = arith.constant 1 : index
    %c1_134 = arith.constant 1 : index
    %c0_135 = arith.constant 0 : index
    %125 = vector.load %arg1[%c0_132, %c1_133, %c1_134, %c0_135] : memref<4x9x9x4xf32, #tpu.memory_space<vmem>>, vector<1x8x8x4xf32>
    %126 = vector.shape_cast %125 : vector<1x8x8x4xf32> to vector<8x8x4xf32>
    %127 = vector.shape_cast %126 : vector<8x8x4xf32> to vector<64x4xf32>
    %c7_136 = arith.constant 7 : index
    %c0_137 = arith.constant 0 : index
    %c0_138 = arith.constant 0 : index
    %128 = vector.load %arg2[%c7_136, %c0_137, %c0_138] : memref<9x4x128xf32, #tpu.memory_space<vmem>>, vector<1x4x128xf32>
    %129 = vector.shape_cast %128 : vector<1x4x128xf32> to vector<4x128xf32>
    %cst_139 = arith.constant dense<0.000000e+00> : vector<64x128xf32>
    %130 = tpu.matmul %127, %129, %cst_139 {dimension_numbers = #tpu.dot_dimension_numbers<[1], [0], [0], [1], [0, 0, 1, 1], [], []>} : vector<64x4xf32>, vector<4x128xf32>, vector<64x128xf32> -> vector<64x128xf32>
    %131 = arith.addf %124, %130 : vector<64x128xf32>
    %c1_140 = arith.constant 1 : index
    %c1_141 = arith.constant 1 : index
    %c1_142 = arith.constant 1 : index
    %c0_143 = arith.constant 0 : index
    %132 = vector.load %arg1[%c1_140, %c1_141, %c1_142, %c0_143] : memref<4x9x9x4xf32, #tpu.memory_space<vmem>>, vector<1x8x8x4xf32>
    %133 = vector.shape_cast %132 : vector<1x8x8x4xf32> to vector<8x8x4xf32>
    %134 = vector.shape_cast %133 : vector<8x8x4xf32> to vector<64x4xf32>
    %c8_144 = arith.constant 8 : index
    %c0_145 = arith.constant 0 : index
    %c0_146 = arith.constant 0 : index
    %135 = vector.load %arg2[%c8_144, %c0_145, %c0_146] : memref<9x4x128xf32, #tpu.memory_space<vmem>>, vector<1x4x128xf32>
    %136 = vector.shape_cast %135 : vector<1x4x128xf32> to vector<4x128xf32>
    %cst_147 = arith.constant dense<0.000000e+00> : vector<64x128xf32>
    %137 = tpu.matmul %134, %136, %cst_147 {dimension_numbers = #tpu.dot_dimension_numbers<[1], [0], [0], [1], [0, 0, 1, 1], [], []>} : vector<64x4xf32>, vector<4x128xf32>, vector<64x128xf32> -> vector<64x128xf32>
    %138 = arith.addf %131, %137 : vector<64x128xf32>
    %c0_148 = arith.constant 0 : index
    %c0_149 = arith.constant 0 : index
    %139 = vector.load %arg3[%c0_148, %c0_149] : memref<1x128xf32, #tpu.memory_space<vmem>>, vector<1x128xf32>
    %140 = vector.broadcast %139 : vector<1x128xf32> to vector<64x128xf32>
    %141 = arith.addf %138, %140 : vector<64x128xf32>
    %cst_150 = arith.constant 0.000000e+00 : f32
    %142 = vector.broadcast %cst_150 : f32 to vector<64x128xf32>
    %143 = arith.maximumf %141, %142 : vector<64x128xf32>
    %144 = vector.shape_cast %143 : vector<64x128xf32> to vector<8x8x128xf32>
    %c2_151 = arith.constant 2 : index
    %c0_152 = arith.constant 0 : index
    %c1_153 = arith.constant 1 : index
    %c0_154 = arith.constant 0 : index
    %145 = vector.load %arg9[%c2_151, %c0_152, %c1_153, %c0_154] : memref<4x9x9x128xf32, #tpu.memory_space<vmem>>, vector<1x8x8x128xf32>
    %146 = vector.shape_cast %145 : vector<1x8x8x128xf32> to vector<8x8x128xf32>
    %147 = vector.shape_cast %144 : vector<8x8x128xf32> to vector<1x8x8x128xf32>
    tpu.vector_store %arg9[%c2_151, %c0_152, %c1_153, %c0_154], %147 {strides = array<i32>} : memref<4x9x9x128xf32, #tpu.memory_space<vmem>>, vector<1x8x8x128xf32>,
    %cst_155 = arith.constant 0.000000e+00 : f32
    %148 = vector.broadcast %cst_155 : f32 to vector<64x128xf32>
    %c2_156 = arith.constant 2 : index
    %c0_157 = arith.constant 0 : index
    %c0_158 = arith.constant 0 : index
    %c0_159 = arith.constant 0 : index
    %149 = vector.load %arg1[%c2_156, %c0_157, %c0_158, %c0_159] : memref<4x9x9x4xf32, #tpu.memory_space<vmem>>, vector<1x8x8x4xf32>
    %150 = vector.shape_cast %149 : vector<1x8x8x4xf32> to vector<8x8x4xf32>
    %151 = vector.shape_cast %150 : vector<8x8x4xf32> to vector<64x4xf32>
    %c0_160 = arith.constant 0 : index
    %c0_161 = arith.constant 0 : index
    %c0_162 = arith.constant 0 : index
    %152 = vector.load %arg2[%c0_160, %c0_161, %c0_162] : memref<9x4x128xf32, #tpu.memory_space<vmem>>, vector<1x4x128xf32>
    %153 = vector.shape_cast %152 : vector<1x4x128xf32> to vector<4x128xf32>
    %cst_163 = arith.constant dense<0.000000e+00> : vector<64x128xf32>
    %154 = tpu.matmul %151, %153, %cst_163 {dimension_numbers = #tpu.dot_dimension_numbers<[1], [0], [0], [1], [0, 0, 1, 1], [], []>} : vector<64x4xf32>, vector<4x128xf32>, vector<64x128xf32> -> vector<64x128xf32>
    %155 = arith.addf %148, %154 : vector<64x128xf32>
    %c3_164 = arith.constant 3 : index
    %c0_165 = arith.constant 0 : index
    %c0_166 = arith.constant 0 : index
    %c0_167 = arith.constant 0 : index
    %156 = vector.load %arg1[%c3_164, %c0_165, %c0_166, %c0_167] : memref<4x9x9x4xf32, #tpu.memory_space<vmem>>, vector<1x8x8x4xf32>
    %157 = vector.shape_cast %156 : vector<1x8x8x4xf32> to vector<8x8x4xf32>
    %158 = vector.shape_cast %157 : vector<8x8x4xf32> to vector<64x4xf32>
    %c1_168 = arith.constant 1 : index
    %c0_169 = arith.constant 0 : index
    %c0_170 = arith.constant 0 : index
    %159 = vector.load %arg2[%c1_168, %c0_169, %c0_170] : memref<9x4x128xf32, #tpu.memory_space<vmem>>, vector<1x4x128xf32>
    %160 = vector.shape_cast %159 : vector<1x4x128xf32> to vector<4x128xf32>
    %cst_171 = arith.constant dense<0.000000e+00> : vector<64x128xf32>
    %161 = tpu.matmul %158, %160, %cst_171 {dimension_numbers = #tpu.dot_dimension_numbers<[1], [0], [0], [1], [0, 0, 1, 1], [], []>} : vector<64x4xf32>, vector<4x128xf32>, vector<64x128xf32> -> vector<64x128xf32>
    %162 = arith.addf %155, %161 : vector<64x128xf32>
    %c2_172 = arith.constant 2 : index
    %c0_173 = arith.constant 0 : index
    %c1_174 = arith.constant 1 : index
    %c0_175 = arith.constant 0 : index
    %163 = vector.load %arg1[%c2_172, %c0_173, %c1_174, %c0_175] : memref<4x9x9x4xf32, #tpu.memory_space<vmem>>, vector<1x8x8x4xf32>
    %164 = vector.shape_cast %163 : vector<1x8x8x4xf32> to vector<8x8x4xf32>
    %165 = vector.shape_cast %164 : vector<8x8x4xf32> to vector<64x4xf32>
    %c2_176 = arith.constant 2 : index
    %c0_177 = arith.constant 0 : index
    %c0_178 = arith.constant 0 : index
    %166 = vector.load %arg2[%c2_176, %c0_177, %c0_178] : memref<9x4x128xf32, #tpu.memory_space<vmem>>, vector<1x4x128xf32>
    %167 = vector.shape_cast %166 : vector<1x4x128xf32> to vector<4x128xf32>
    %cst_179 = arith.constant dense<0.000000e+00> : vector<64x128xf32>
    %168 = tpu.matmul %165, %167, %cst_179 {dimension_numbers = #tpu.dot_dimension_numbers<[1], [0], [0], [1], [0, 0, 1, 1], [], []>} : vector<64x4xf32>, vector<4x128xf32>, vector<64x128xf32> -> vector<64x128xf32>
    %169 = arith.addf %162, %168 : vector<64x128xf32>
    %c0_180 = arith.constant 0 : index
    %c1_181 = arith.constant 1 : index
    %c0_182 = arith.constant 0 : index
    %c0_183 = arith.constant 0 : index
    %170 = vector.load %arg1[%c0_180, %c1_181, %c0_182, %c0_183] : memref<4x9x9x4xf32, #tpu.memory_space<vmem>>, vector<1x8x8x4xf32>
    %171 = vector.shape_cast %170 : vector<1x8x8x4xf32> to vector<8x8x4xf32>
    %172 = vector.shape_cast %171 : vector<8x8x4xf32> to vector<64x4xf32>
    %c3_184 = arith.constant 3 : index
    %c0_185 = arith.constant 0 : index
    %c0_186 = arith.constant 0 : index
    %173 = vector.load %arg2[%c3_184, %c0_185, %c0_186] : memref<9x4x128xf32, #tpu.memory_space<vmem>>, vector<1x4x128xf32>
    %174 = vector.shape_cast %173 : vector<1x4x128xf32> to vector<4x128xf32>
    %cst_187 = arith.constant dense<0.000000e+00> : vector<64x128xf32>
    %175 = tpu.matmul %172, %174, %cst_187 {dimension_numbers = #tpu.dot_dimension_numbers<[1], [0], [0], [1], [0, 0, 1, 1], [], []>} : vector<64x4xf32>, vector<4x128xf32>, vector<64x128xf32> -> vector<64x128xf32>
    %176 = arith.addf %169, %175 : vector<64x128xf32>
    %c1_188 = arith.constant 1 : index
    %c1_189 = arith.constant 1 : index
    %c0_190 = arith.constant 0 : index
    %c0_191 = arith.constant 0 : index
    %177 = vector.load %arg1[%c1_188, %c1_189, %c0_190, %c0_191] : memref<4x9x9x4xf32, #tpu.memory_space<vmem>>, vector<1x8x8x4xf32>
    %178 = vector.shape_cast %177 : vector<1x8x8x4xf32> to vector<8x8x4xf32>
    %179 = vector.shape_cast %178 : vector<8x8x4xf32> to vector<64x4xf32>
    %c4_192 = arith.constant 4 : index
    %c0_193 = arith.constant 0 : index
    %c0_194 = arith.constant 0 : index
    %180 = vector.load %arg2[%c4_192, %c0_193, %c0_194] : memref<9x4x128xf32, #tpu.memory_space<vmem>>, vector<1x4x128xf32>
    %181 = vector.shape_cast %180 : vector<1x4x128xf32> to vector<4x128xf32>
    %cst_195 = arith.constant dense<0.000000e+00> : vector<64x128xf32>
    %182 = tpu.matmul %179, %181, %cst_195 {dimension_numbers = #tpu.dot_dimension_numbers<[1], [0], [0], [1], [0, 0, 1, 1], [], []>} : vector<64x4xf32>, vector<4x128xf32>, vector<64x128xf32> -> vector<64x128xf32>
    %183 = arith.addf %176, %182 : vector<64x128xf32>
    %c0_196 = arith.constant 0 : index
    %c1_197 = arith.constant 1 : index
    %c1_198 = arith.constant 1 : index
    %c0_199 = arith.constant 0 : index
    %184 = vector.load %arg1[%c0_196, %c1_197, %c1_198, %c0_199] : memref<4x9x9x4xf32, #tpu.memory_space<vmem>>, vector<1x8x8x4xf32>
    %185 = vector.shape_cast %184 : vector<1x8x8x4xf32> to vector<8x8x4xf32>
    %186 = vector.shape_cast %185 : vector<8x8x4xf32> to vector<64x4xf32>
    %c5_200 = arith.constant 5 : index
    %c0_201 = arith.constant 0 : index
    %c0_202 = arith.constant 0 : index
    %187 = vector.load %arg2[%c5_200, %c0_201, %c0_202] : memref<9x4x128xf32, #tpu.memory_space<vmem>>, vector<1x4x128xf32>
    %188 = vector.shape_cast %187 : vector<1x4x128xf32> to vector<4x128xf32>
    %cst_203 = arith.constant dense<0.000000e+00> : vector<64x128xf32>
    %189 = tpu.matmul %186, %188, %cst_203 {dimension_numbers = #tpu.dot_dimension_numbers<[1], [0], [0], [1], [0, 0, 1, 1], [], []>} : vector<64x4xf32>, vector<4x128xf32>, vector<64x128xf32> -> vector<64x128xf32>
    %190 = arith.addf %183, %189 : vector<64x128xf32>
    %c2_204 = arith.constant 2 : index
    %c1_205 = arith.constant 1 : index
    %c0_206 = arith.constant 0 : index
    %c0_207 = arith.constant 0 : index
    %191 = vector.load %arg1[%c2_204, %c1_205, %c0_206, %c0_207] : memref<4x9x9x4xf32, #tpu.memory_space<vmem>>, vector<1x8x8x4xf32>
    %192 = vector.shape_cast %191 : vector<1x8x8x4xf32> to vector<8x8x4xf32>
    %193 = vector.shape_cast %192 : vector<8x8x4xf32> to vector<64x4xf32>
    %c6_208 = arith.constant 6 : index
    %c0_209 = arith.constant 0 : index
    %c0_210 = arith.constant 0 : index
    %194 = vector.load %arg2[%c6_208, %c0_209, %c0_210] : memref<9x4x128xf32, #tpu.memory_space<vmem>>, vector<1x4x128xf32>
    %195 = vector.shape_cast %194 : vector<1x4x128xf32> to vector<4x128xf32>
    %cst_211 = arith.constant dense<0.000000e+00> : vector<64x128xf32>
    %196 = tpu.matmul %193, %195, %cst_211 {dimension_numbers = #tpu.dot_dimension_numbers<[1], [0], [0], [1], [0, 0, 1, 1], [], []>} : vector<64x4xf32>, vector<4x128xf32>, vector<64x128xf32> -> vector<64x128xf32>
    %197 = arith.addf %190, %196 : vector<64x128xf32>
    %c3_212 = arith.constant 3 : index
    %c1_213 = arith.constant 1 : index
    %c0_214 = arith.constant 0 : index
    %c0_215 = arith.constant 0 : index
    %198 = vector.load %arg1[%c3_212, %c1_213, %c0_214, %c0_215] : memref<4x9x9x4xf32, #tpu.memory_space<vmem>>, vector<1x8x8x4xf32>
    %199 = vector.shape_cast %198 : vector<1x8x8x4xf32> to vector<8x8x4xf32>
    %200 = vector.shape_cast %199 : vector<8x8x4xf32> to vector<64x4xf32>
    %c7_216 = arith.constant 7 : index
    %c0_217 = arith.constant 0 : index
    %c0_218 = arith.constant 0 : index
    %201 = vector.load %arg2[%c7_216, %c0_217, %c0_218] : memref<9x4x128xf32, #tpu.memory_space<vmem>>, vector<1x4x128xf32>
    %202 = vector.shape_cast %201 : vector<1x4x128xf32> to vector<4x128xf32>
    %cst_219 = arith.constant dense<0.000000e+00> : vector<64x128xf32>
    %203 = tpu.matmul %200, %202, %cst_219 {dimension_numbers = #tpu.dot_dimension_numbers<[1], [0], [0], [1], [0, 0, 1, 1], [], []>} : vector<64x4xf32>, vector<4x128xf32>, vector<64x128xf32> -> vector<64x128xf32>
    %204 = arith.addf %197, %203 : vector<64x128xf32>
    %c2_220 = arith.constant 2 : index
    %c1_221 = arith.constant 1 : index
    %c1_222 = arith.constant 1 : index
    %c0_223 = arith.constant 0 : index
    %205 = vector.load %arg1[%c2_220, %c1_221, %c1_222, %c0_223] : memref<4x9x9x4xf32, #tpu.memory_space<vmem>>, vector<1x8x8x4xf32>
    %206 = vector.shape_cast %205 : vector<1x8x8x4xf32> to vector<8x8x4xf32>
    %207 = vector.shape_cast %206 : vector<8x8x4xf32> to vector<64x4xf32>
    %c8_224 = arith.constant 8 : index
    %c0_225 = arith.constant 0 : index
    %c0_226 = arith.constant 0 : index
    %208 = vector.load %arg2[%c8_224, %c0_225, %c0_226] : memref<9x4x128xf32, #tpu.memory_space<vmem>>, vector<1x4x128xf32>
    %209 = vector.shape_cast %208 : vector<1x4x128xf32> to vector<4x128xf32>
    %cst_227 = arith.constant dense<0.000000e+00> : vector<64x128xf32>
    %210 = tpu.matmul %207, %209, %cst_227 {dimension_numbers = #tpu.dot_dimension_numbers<[1], [0], [0], [1], [0, 0, 1, 1], [], []>} : vector<64x4xf32>, vector<4x128xf32>, vector<64x128xf32> -> vector<64x128xf32>
    %211 = arith.addf %204, %210 : vector<64x128xf32>
    %c0_228 = arith.constant 0 : index
    %c0_229 = arith.constant 0 : index
    %212 = vector.load %arg3[%c0_228, %c0_229] : memref<1x128xf32, #tpu.memory_space<vmem>>, vector<1x128xf32>
    %213 = vector.broadcast %212 : vector<1x128xf32> to vector<64x128xf32>
    %214 = arith.addf %211, %213 : vector<64x128xf32>
    %cst_230 = arith.constant 0.000000e+00 : f32
    %215 = vector.broadcast %cst_230 : f32 to vector<64x128xf32>
    %216 = arith.maximumf %214, %215 : vector<64x128xf32>
    %217 = vector.shape_cast %216 : vector<64x128xf32> to vector<8x8x128xf32>
    %c1_231 = arith.constant 1 : index
    %c1_232 = arith.constant 1 : index
    %c0_233 = arith.constant 0 : index
    %c0_234 = arith.constant 0 : index
    %218 = vector.load %arg9[%c1_231, %c1_232, %c0_233, %c0_234] : memref<4x9x9x128xf32, #tpu.memory_space<vmem>>, vector<1x8x8x128xf32>
    %219 = vector.shape_cast %218 : vector<1x8x8x128xf32> to vector<8x8x128xf32>
    %220 = vector.shape_cast %217 : vector<8x8x128xf32> to vector<1x8x8x128xf32>
    tpu.vector_store %arg9[%c1_231, %c1_232, %c0_233, %c0_234], %220 {strides = array<i32>} : memref<4x9x9x128xf32, #tpu.memory_space<vmem>>, vector<1x8x8x128xf32>,
    %cst_235 = arith.constant 0.000000e+00 : f32
    %221 = vector.broadcast %cst_235 : f32 to vector<64x128xf32>
    %c3_236 = arith.constant 3 : index
    %c0_237 = arith.constant 0 : index
    %c0_238 = arith.constant 0 : index
    %c0_239 = arith.constant 0 : index
    %222 = vector.load %arg1[%c3_236, %c0_237, %c0_238, %c0_239] : memref<4x9x9x4xf32, #tpu.memory_space<vmem>>, vector<1x8x8x4xf32>
    %223 = vector.shape_cast %222 : vector<1x8x8x4xf32> to vector<8x8x4xf32>
    %224 = vector.shape_cast %223 : vector<8x8x4xf32> to vector<64x4xf32>
    %c0_240 = arith.constant 0 : index
    %c0_241 = arith.constant 0 : index
    %c0_242 = arith.constant 0 : index
    %225 = vector.load %arg2[%c0_240, %c0_241, %c0_242] : memref<9x4x128xf32, #tpu.memory_space<vmem>>, vector<1x4x128xf32>
    %226 = vector.shape_cast %225 : vector<1x4x128xf32> to vector<4x128xf32>
    %cst_243 = arith.constant dense<0.000000e+00> : vector<64x128xf32>
    %227 = tpu.matmul %224, %226, %cst_243 {dimension_numbers = #tpu.dot_dimension_numbers<[1], [0], [0], [1], [0, 0, 1, 1], [], []>} : vector<64x4xf32>, vector<4x128xf32>, vector<64x128xf32> -> vector<64x128xf32>
    %228 = arith.addf %221, %227 : vector<64x128xf32>
    %c2_244 = arith.constant 2 : index
    %c0_245 = arith.constant 0 : index
    %c1_246 = arith.constant 1 : index
    %c0_247 = arith.constant 0 : index
    %229 = vector.load %arg1[%c2_244, %c0_245, %c1_246, %c0_247] : memref<4x9x9x4xf32, #tpu.memory_space<vmem>>, vector<1x8x8x4xf32>
    %230 = vector.shape_cast %229 : vector<1x8x8x4xf32> to vector<8x8x4xf32>
    %231 = vector.shape_cast %230 : vector<8x8x4xf32> to vector<64x4xf32>
    %c1_248 = arith.constant 1 : index
    %c0_249 = arith.constant 0 : index
    %c0_250 = arith.constant 0 : index
    %232 = vector.load %arg2[%c1_248, %c0_249, %c0_250] : memref<9x4x128xf32, #tpu.memory_space<vmem>>, vector<1x4x128xf32>
    %233 = vector.shape_cast %232 : vector<1x4x128xf32> to vector<4x128xf32>
    %cst_251 = arith.constant dense<0.000000e+00> : vector<64x128xf32>
    %234 = tpu.matmul %231, %233, %cst_251 {dimension_numbers = #tpu.dot_dimension_numbers<[1], [0], [0], [1], [0, 0, 1, 1], [], []>} : vector<64x4xf32>, vector<4x128xf32>, vector<64x128xf32> -> vector<64x128xf32>
    %235 = arith.addf %228, %234 : vector<64x128xf32>
    %c3_252 = arith.constant 3 : index
    %c0_253 = arith.constant 0 : index
    %c1_254 = arith.constant 1 : index
    %c0_255 = arith.constant 0 : index
    %236 = vector.load %arg1[%c3_252, %c0_253, %c1_254, %c0_255] : memref<4x9x9x4xf32, #tpu.memory_space<vmem>>, vector<1x8x8x4xf32>
    %237 = vector.shape_cast %236 : vector<1x8x8x4xf32> to vector<8x8x4xf32>
    %238 = vector.shape_cast %237 : vector<8x8x4xf32> to vector<64x4xf32>
    %c2_256 = arith.constant 2 : index
    %c0_257 = arith.constant 0 : index
    %c0_258 = arith.constant 0 : index
    %239 = vector.load %arg2[%c2_256, %c0_257, %c0_258] : memref<9x4x128xf32, #tpu.memory_space<vmem>>, vector<1x4x128xf32>
    %240 = vector.shape_cast %239 : vector<1x4x128xf32> to vector<4x128xf32>
    %cst_259 = arith.constant dense<0.000000e+00> : vector<64x128xf32>
    %241 = tpu.matmul %238, %240, %cst_259 {dimension_numbers = #tpu.dot_dimension_numbers<[1], [0], [0], [1], [0, 0, 1, 1], [], []>} : vector<64x4xf32>, vector<4x128xf32>, vector<64x128xf32> -> vector<64x128xf32>
    %242 = arith.addf %235, %241 : vector<64x128xf32>
    %c1_260 = arith.constant 1 : index
    %c1_261 = arith.constant 1 : index
    %c0_262 = arith.constant 0 : index
    %c0_263 = arith.constant 0 : index
    %243 = vector.load %arg1[%c1_260, %c1_261, %c0_262, %c0_263] : memref<4x9x9x4xf32, #tpu.memory_space<vmem>>, vector<1x8x8x4xf32>
    %244 = vector.shape_cast %243 : vector<1x8x8x4xf32> to vector<8x8x4xf32>
    %245 = vector.shape_cast %244 : vector<8x8x4xf32> to vector<64x4xf32>
    %c3_264 = arith.constant 3 : index
    %c0_265 = arith.constant 0 : index
    %c0_266 = arith.constant 0 : index
    %246 = vector.load %arg2[%c3_264, %c0_265, %c0_266] : memref<9x4x128xf32, #tpu.memory_space<vmem>>, vector<1x4x128xf32>
    %247 = vector.shape_cast %246 : vector<1x4x128xf32> to vector<4x128xf32>
    %cst_267 = arith.constant dense<0.000000e+00> : vector<64x128xf32>
    %248 = tpu.matmul %245, %247, %cst_267 {dimension_numbers = #tpu.dot_dimension_numbers<[1], [0], [0], [1], [0, 0, 1, 1], [], []>} : vector<64x4xf32>, vector<4x128xf32>, vector<64x128xf32> -> vector<64x128xf32>
    %249 = arith.addf %242, %248 : vector<64x128xf32>
    %c0_268 = arith.constant 0 : index
    %c1_269 = arith.constant 1 : index
    %c1_270 = arith.constant 1 : index
    %c0_271 = arith.constant 0 : index
    %250 = vector.load %arg1[%c0_268, %c1_269, %c1_270, %c0_271] : memref<4x9x9x4xf32, #tpu.memory_space<vmem>>, vector<1x8x8x4xf32>
    %251 = vector.shape_cast %250 : vector<1x8x8x4xf32> to vector<8x8x4xf32>
    %252 = vector.shape_cast %251 : vector<8x8x4xf32> to vector<64x4xf32>
    %c4_272 = arith.constant 4 : index
    %c0_273 = arith.constant 0 : index
    %c0_274 = arith.constant 0 : index
    %253 = vector.load %arg2[%c4_272, %c0_273, %c0_274] : memref<9x4x128xf32, #tpu.memory_space<vmem>>, vector<1x4x128xf32>
    %254 = vector.shape_cast %253 : vector<1x4x128xf32> to vector<4x128xf32>
    %cst_275 = arith.constant dense<0.000000e+00> : vector<64x128xf32>
    %255 = tpu.matmul %252, %254, %cst_275 {dimension_numbers = #tpu.dot_dimension_numbers<[1], [0], [0], [1], [0, 0, 1, 1], [], []>} : vector<64x4xf32>, vector<4x128xf32>, vector<64x128xf32> -> vector<64x128xf32>
    %256 = arith.addf %249, %255 : vector<64x128xf32>
    %c1_276 = arith.constant 1 : index
    %c1_277 = arith.constant 1 : index
    %c1_278 = arith.constant 1 : index
    %c0_279 = arith.constant 0 : index
    %257 = vector.load %arg1[%c1_276, %c1_277, %c1_278, %c0_279] : memref<4x9x9x4xf32, #tpu.memory_space<vmem>>, vector<1x8x8x4xf32>
    %258 = vector.shape_cast %257 : vector<1x8x8x4xf32> to vector<8x8x4xf32>
    %259 = vector.shape_cast %258 : vector<8x8x4xf32> to vector<64x4xf32>
    %c5_280 = arith.constant 5 : index
    %c0_281 = arith.constant 0 : index
    %c0_282 = arith.constant 0 : index
    %260 = vector.load %arg2[%c5_280, %c0_281, %c0_282] : memref<9x4x128xf32, #tpu.memory_space<vmem>>, vector<1x4x128xf32>
    %261 = vector.shape_cast %260 : vector<1x4x128xf32> to vector<4x128xf32>
    %cst_283 = arith.constant dense<0.000000e+00> : vector<64x128xf32>
    %262 = tpu.matmul %259, %261, %cst_283 {dimension_numbers = #tpu.dot_dimension_numbers<[1], [0], [0], [1], [0, 0, 1, 1], [], []>} : vector<64x4xf32>, vector<4x128xf32>, vector<64x128xf32> -> vector<64x128xf32>
    %263 = arith.addf %256, %262 : vector<64x128xf32>
    %c3_284 = arith.constant 3 : index
    %c1_285 = arith.constant 1 : index
    %c0_286 = arith.constant 0 : index
    %c0_287 = arith.constant 0 : index
    %264 = vector.load %arg1[%c3_284, %c1_285, %c0_286, %c0_287] : memref<4x9x9x4xf32, #tpu.memory_space<vmem>>, vector<1x8x8x4xf32>
    %265 = vector.shape_cast %264 : vector<1x8x8x4xf32> to vector<8x8x4xf32>
    %266 = vector.shape_cast %265 : vector<8x8x4xf32> to vector<64x4xf32>
    %c6_288 = arith.constant 6 : index
    %c0_289 = arith.constant 0 : index
    %c0_290 = arith.constant 0 : index
    %267 = vector.load %arg2[%c6_288, %c0_289, %c0_290] : memref<9x4x128xf32, #tpu.memory_space<vmem>>, vector<1x4x128xf32>
    %268 = vector.shape_cast %267 : vector<1x4x128xf32> to vector<4x128xf32>
    %cst_291 = arith.constant dense<0.000000e+00> : vector<64x128xf32>
    %269 = tpu.matmul %266, %268, %cst_291 {dimension_numbers = #tpu.dot_dimension_numbers<[1], [0], [0], [1], [0, 0, 1, 1], [], []>} : vector<64x4xf32>, vector<4x128xf32>, vector<64x128xf32> -> vector<64x128xf32>
    %270 = arith.addf %263, %269 : vector<64x128xf32>
    %c2_292 = arith.constant 2 : index
    %c1_293 = arith.constant 1 : index
    %c1_294 = arith.constant 1 : index
    %c0_295 = arith.constant 0 : index
    %271 = vector.load %arg1[%c2_292, %c1_293, %c1_294, %c0_295] : memref<4x9x9x4xf32, #tpu.memory_space<vmem>>, vector<1x8x8x4xf32>
    %272 = vector.shape_cast %271 : vector<1x8x8x4xf32> to vector<8x8x4xf32>
    %273 = vector.shape_cast %272 : vector<8x8x4xf32> to vector<64x4xf32>
    %c7_296 = arith.constant 7 : index
    %c0_297 = arith.constant 0 : index
    %c0_298 = arith.constant 0 : index
    %274 = vector.load %arg2[%c7_296, %c0_297, %c0_298] : memref<9x4x128xf32, #tpu.memory_space<vmem>>, vector<1x4x128xf32>
    %275 = vector.shape_cast %274 : vector<1x4x128xf32> to vector<4x128xf32>
    %cst_299 = arith.constant dense<0.000000e+00> : vector<64x128xf32>
    %276 = tpu.matmul %273, %275, %cst_299 {dimension_numbers = #tpu.dot_dimension_numbers<[1], [0], [0], [1], [0, 0, 1, 1], [], []>} : vector<64x4xf32>, vector<4x128xf32>, vector<64x128xf32> -> vector<64x128xf32>
    %277 = arith.addf %270, %276 : vector<64x128xf32>
    %c3_300 = arith.constant 3 : index
    %c1_301 = arith.constant 1 : index
    %c1_302 = arith.constant 1 : index
    %c0_303 = arith.constant 0 : index
    %278 = vector.load %arg1[%c3_300, %c1_301, %c1_302, %c0_303] : memref<4x9x9x4xf32, #tpu.memory_space<vmem>>, vector<1x8x8x4xf32>
    %279 = vector.shape_cast %278 : vector<1x8x8x4xf32> to vector<8x8x4xf32>
    %280 = vector.shape_cast %279 : vector<8x8x4xf32> to vector<64x4xf32>
    %c8_304 = arith.constant 8 : index
    %c0_305 = arith.constant 0 : index
    %c0_306 = arith.constant 0 : index
    %281 = vector.load %arg2[%c8_304, %c0_305, %c0_306] : memref<9x4x128xf32, #tpu.memory_space<vmem>>, vector<1x4x128xf32>
    %282 = vector.shape_cast %281 : vector<1x4x128xf32> to vector<4x128xf32>
    %cst_307 = arith.constant dense<0.000000e+00> : vector<64x128xf32>
    %283 = tpu.matmul %280, %282, %cst_307 {dimension_numbers = #tpu.dot_dimension_numbers<[1], [0], [0], [1], [0, 0, 1, 1], [], []>} : vector<64x4xf32>, vector<4x128xf32>, vector<64x128xf32> -> vector<64x128xf32>
    %284 = arith.addf %277, %283 : vector<64x128xf32>
    %c0_308 = arith.constant 0 : index
    %c0_309 = arith.constant 0 : index
    %285 = vector.load %arg3[%c0_308, %c0_309] : memref<1x128xf32, #tpu.memory_space<vmem>>, vector<1x128xf32>
    %286 = vector.broadcast %285 : vector<1x128xf32> to vector<64x128xf32>
    %287 = arith.addf %284, %286 : vector<64x128xf32>
    %cst_310 = arith.constant 0.000000e+00 : f32
    %288 = vector.broadcast %cst_310 : f32 to vector<64x128xf32>
    %289 = arith.maximumf %287, %288 : vector<64x128xf32>
    %290 = vector.shape_cast %289 : vector<64x128xf32> to vector<8x8x128xf32>
    %c0_311 = arith.constant 0 : index
    %c1_312 = arith.constant 1 : index
    %c1_313 = arith.constant 1 : index
    %c0_314 = arith.constant 0 : index
    %291 = vector.load %arg9[%c0_311, %c1_312, %c1_313, %c0_314] : memref<4x9x9x128xf32, #tpu.memory_space<vmem>>, vector<1x8x8x128xf32>
    %292 = vector.shape_cast %291 : vector<1x8x8x128xf32> to vector<8x8x128xf32>
    %293 = vector.shape_cast %290 : vector<8x8x128xf32> to vector<1x8x8x128xf32>
    tpu.vector_store %arg9[%c0_311, %c1_312, %c1_313, %c0_314], %293 {strides = array<i32>} : memref<4x9x9x128xf32, #tpu.memory_space<vmem>>, vector<1x8x8x128xf32>,
    %cst_315 = arith.constant 0.000000e+00 : f32
    %294 = vector.broadcast %cst_315 : f32 to vector<64x128xf32>
    %c0_316 = arith.constant 0 : index
    %c0_317 = arith.constant 0 : index
    %c0_318 = arith.constant 0 : index
    %c0_319 = arith.constant 0 : index
    %295 = vector.load %arg9[%c0_316, %c0_317, %c0_318, %c0_319] : memref<4x9x9x128xf32, #tpu.memory_space<vmem>>, vector<1x8x8x128xf32>
    %296 = vector.shape_cast %295 : vector<1x8x8x128xf32> to vector<8x8x128xf32>
    %297 = vector.shape_cast %296 : vector<8x8x128xf32> to vector<64x128xf32>
    %c0_320 = arith.constant 0 : index
    %c0_321 = arith.constant 0 : index
    %c0_322 = arith.constant 0 : index
    %298 = vector.load %arg4[%c0_320, %c0_321, %c0_322] : memref<9x128x128xf32, #tpu.memory_space<vmem>>, vector<1x128x128xf32>
    %299 = vector.shape_cast %298 : vector<1x128x128xf32> to vector<128x128xf32>
    %cst_323 = arith.constant dense<0.000000e+00> : vector<64x128xf32>
    %300 = tpu.matmul %297, %299, %cst_323 {dimension_numbers = #tpu.dot_dimension_numbers<[1], [0], [0], [1], [0, 0, 1, 1], [], []>} : vector<64x128xf32>, vector<128x128xf32>, vector<64x128xf32> -> vector<64x128xf32>
    %301 = arith.addf %294, %300 : vector<64x128xf32>
    %c1_324 = arith.constant 1 : index
    %c0_325 = arith.constant 0 : index
    %c0_326 = arith.constant 0 : index
    %c0_327 = arith.constant 0 : index
    %302 = vector.load %arg9[%c1_324, %c0_325, %c0_326, %c0_327] : memref<4x9x9x128xf32, #tpu.memory_space<vmem>>, vector<1x8x8x128xf32>
    %303 = vector.shape_cast %302 : vector<1x8x8x128xf32> to vector<8x8x128xf32>
    %304 = vector.shape_cast %303 : vector<8x8x128xf32> to vector<64x128xf32>
    %c1_328 = arith.constant 1 : index
    %c0_329 = arith.constant 0 : index
    %c0_330 = arith.constant 0 : index
    %305 = vector.load %arg4[%c1_328, %c0_329, %c0_330] : memref<9x128x128xf32, #tpu.memory_space<vmem>>, vector<1x128x128xf32>
    %306 = vector.shape_cast %305 : vector<1x128x128xf32> to vector<128x128xf32>
    %cst_331 = arith.constant dense<0.000000e+00> : vector<64x128xf32>
    %307 = tpu.matmul %304, %306, %cst_331 {dimension_numbers = #tpu.dot_dimension_numbers<[1], [0], [0], [1], [0, 0, 1, 1], [], []>} : vector<64x128xf32>, vector<128x128xf32>, vector<64x128xf32> -> vector<64x128xf32>
    %308 = arith.addf %301, %307 : vector<64x128xf32>
    %c0_332 = arith.constant 0 : index
    %c0_333 = arith.constant 0 : index
    %c1_334 = arith.constant 1 : index
    %c0_335 = arith.constant 0 : index
    %309 = vector.load %arg9[%c0_332, %c0_333, %c1_334, %c0_335] : memref<4x9x9x128xf32, #tpu.memory_space<vmem>>, vector<1x8x8x128xf32>
    %310 = vector.shape_cast %309 : vector<1x8x8x128xf32> to vector<8x8x128xf32>
    %311 = vector.shape_cast %310 : vector<8x8x128xf32> to vector<64x128xf32>
    %c2_336 = arith.constant 2 : index
    %c0_337 = arith.constant 0 : index
    %c0_338 = arith.constant 0 : index
    %312 = vector.load %arg4[%c2_336, %c0_337, %c0_338] : memref<9x128x128xf32, #tpu.memory_space<vmem>>, vector<1x128x128xf32>
    %313 = vector.shape_cast %312 : vector<1x128x128xf32> to vector<128x128xf32>
    %cst_339 = arith.constant dense<0.000000e+00> : vector<64x128xf32>
    %314 = tpu.matmul %311, %313, %cst_339 {dimension_numbers = #tpu.dot_dimension_numbers<[1], [0], [0], [1], [0, 0, 1, 1], [], []>} : vector<64x128xf32>, vector<128x128xf32>, vector<64x128xf32> -> vector<64x128xf32>
    %315 = arith.addf %308, %314 : vector<64x128xf32>
    %c2_340 = arith.constant 2 : index
    %c0_341 = arith.constant 0 : index
    %c0_342 = arith.constant 0 : index
    %c0_343 = arith.constant 0 : index
    %316 = vector.load %arg9[%c2_340, %c0_341, %c0_342, %c0_343] : memref<4x9x9x128xf32, #tpu.memory_space<vmem>>, vector<1x8x8x128xf32>
    %317 = vector.shape_cast %316 : vector<1x8x8x128xf32> to vector<8x8x128xf32>
    %318 = vector.shape_cast %317 : vector<8x8x128xf32> to vector<64x128xf32>
    %c3_344 = arith.constant 3 : index
    %c0_345 = arith.constant 0 : index
    %c0_346 = arith.constant 0 : index
    %319 = vector.load %arg4[%c3_344, %c0_345, %c0_346] : memref<9x128x128xf32, #tpu.memory_space<vmem>>, vector<1x128x128xf32>
    %320 = vector.shape_cast %319 : vector<1x128x128xf32> to vector<128x128xf32>
    %cst_347 = arith.constant dense<0.000000e+00> : vector<64x128xf32>
    %321 = tpu.matmul %318, %320, %cst_347 {dimension_numbers = #tpu.dot_dimension_numbers<[1], [0], [0], [1], [0, 0, 1, 1], [], []>} : vector<64x128xf32>, vector<128x128xf32>, vector<64x128xf32> -> vector<64x128xf32>
    %322 = arith.addf %315, %321 : vector<64x128xf32>
    %c3_348 = arith.constant 3 : index
    %c0_349 = arith.constant 0 : index
    %c0_350 = arith.constant 0 : index
    %c0_351 = arith.constant 0 : index
    %323 = vector.load %arg9[%c3_348, %c0_349, %c0_350, %c0_351] : memref<4x9x9x128xf32, #tpu.memory_space<vmem>>, vector<1x8x8x128xf32>
    %324 = vector.shape_cast %323 : vector<1x8x8x128xf32> to vector<8x8x128xf32>
    %325 = vector.shape_cast %324 : vector<8x8x128xf32> to vector<64x128xf32>
    %c4_352 = arith.constant 4 : index
    %c0_353 = arith.constant 0 : index
    %c0_354 = arith.constant 0 : index
    %326 = vector.load %arg4[%c4_352, %c0_353, %c0_354] : memref<9x128x128xf32, #tpu.memory_space<vmem>>, vector<1x128x128xf32>
    %327 = vector.shape_cast %326 : vector<1x128x128xf32> to vector<128x128xf32>
    %cst_355 = arith.constant dense<0.000000e+00> : vector<64x128xf32>
    %328 = tpu.matmul %325, %327, %cst_355 {dimension_numbers = #tpu.dot_dimension_numbers<[1], [0], [0], [1], [0, 0, 1, 1], [], []>} : vector<64x128xf32>, vector<128x128xf32>, vector<64x128xf32> -> vector<64x128xf32>
    %329 = arith.addf %322, %328 : vector<64x128xf32>
    %c2_356 = arith.constant 2 : index
    %c0_357 = arith.constant 0 : index
    %c1_358 = arith.constant 1 : index
    %c0_359 = arith.constant 0 : index
    %330 = vector.load %arg9[%c2_356, %c0_357, %c1_358, %c0_359] : memref<4x9x9x128xf32, #tpu.memory_space<vmem>>, vector<1x8x8x128xf32>
    %331 = vector.shape_cast %330 : vector<1x8x8x128xf32> to vector<8x8x128xf32>
    %332 = vector.shape_cast %331 : vector<8x8x128xf32> to vector<64x128xf32>
    %c5_360 = arith.constant 5 : index
    %c0_361 = arith.constant 0 : index
    %c0_362 = arith.constant 0 : index
    %333 = vector.load %arg4[%c5_360, %c0_361, %c0_362] : memref<9x128x128xf32, #tpu.memory_space<vmem>>, vector<1x128x128xf32>
    %334 = vector.shape_cast %333 : vector<1x128x128xf32> to vector<128x128xf32>
    %cst_363 = arith.constant dense<0.000000e+00> : vector<64x128xf32>
    %335 = tpu.matmul %332, %334, %cst_363 {dimension_numbers = #tpu.dot_dimension_numbers<[1], [0], [0], [1], [0, 0, 1, 1], [], []>} : vector<64x128xf32>, vector<128x128xf32>, vector<64x128xf32> -> vector<64x128xf32>
    %336 = arith.addf %329, %335 : vector<64x128xf32>
    %c0_364 = arith.constant 0 : index
    %c1_365 = arith.constant 1 : index
    %c0_366 = arith.constant 0 : index
    %c0_367 = arith.constant 0 : index
    %337 = vector.load %arg9[%c0_364, %c1_365, %c0_366, %c0_367] : memref<4x9x9x128xf32, #tpu.memory_space<vmem>>, vector<1x8x8x128xf32>
    %338 = vector.shape_cast %337 : vector<1x8x8x128xf32> to vector<8x8x128xf32>
    %339 = vector.shape_cast %338 : vector<8x8x128xf32> to vector<64x128xf32>
    %c6_368 = arith.constant 6 : index
    %c0_369 = arith.constant 0 : index
    %c0_370 = arith.constant 0 : index
    %340 = vector.load %arg4[%c6_368, %c0_369, %c0_370] : memref<9x128x128xf32, #tpu.memory_space<vmem>>, vector<1x128x128xf32>
    %341 = vector.shape_cast %340 : vector<1x128x128xf32> to vector<128x128xf32>
    %cst_371 = arith.constant dense<0.000000e+00> : vector<64x128xf32>
    %342 = tpu.matmul %339, %341, %cst_371 {dimension_numbers = #tpu.dot_dimension_numbers<[1], [0], [0], [1], [0, 0, 1, 1], [], []>} : vector<64x128xf32>, vector<128x128xf32>, vector<64x128xf32> -> vector<64x128xf32>
    %343 = arith.addf %336, %342 : vector<64x128xf32>
    %c1_372 = arith.constant 1 : index
    %c1_373 = arith.constant 1 : index
    %c0_374 = arith.constant 0 : index
    %c0_375 = arith.constant 0 : index
    %344 = vector.load %arg9[%c1_372, %c1_373, %c0_374, %c0_375] : memref<4x9x9x128xf32, #tpu.memory_space<vmem>>, vector<1x8x8x128xf32>
    %345 = vector.shape_cast %344 : vector<1x8x8x128xf32> to vector<8x8x128xf32>
    %346 = vector.shape_cast %345 : vector<8x8x128xf32> to vector<64x128xf32>
    %c7_376 = arith.constant 7 : index
    %c0_377 = arith.constant 0 : index
    %c0_378 = arith.constant 0 : index
    %347 = vector.load %arg4[%c7_376, %c0_377, %c0_378] : memref<9x128x128xf32, #tpu.memory_space<vmem>>, vector<1x128x128xf32>
    %348 = vector.shape_cast %347 : vector<1x128x128xf32> to vector<128x128xf32>
    %cst_379 = arith.constant dense<0.000000e+00> : vector<64x128xf32>
    %349 = tpu.matmul %346, %348, %cst_379 {dimension_numbers = #tpu.dot_dimension_numbers<[1], [0], [0], [1], [0, 0, 1, 1], [], []>} : vector<64x128xf32>, vector<128x128xf32>, vector<64x128xf32> -> vector<64x128xf32>
    %350 = arith.addf %343, %349 : vector<64x128xf32>
    %c0_380 = arith.constant 0 : index
    %c1_381 = arith.constant 1 : index
    %c1_382 = arith.constant 1 : index
    %c0_383 = arith.constant 0 : index
    %351 = vector.load %arg9[%c0_380, %c1_381, %c1_382, %c0_383] : memref<4x9x9x128xf32, #tpu.memory_space<vmem>>, vector<1x8x8x128xf32>
    %352 = vector.shape_cast %351 : vector<1x8x8x128xf32> to vector<8x8x128xf32>
    %353 = vector.shape_cast %352 : vector<8x8x128xf32> to vector<64x128xf32>
    %c8_384 = arith.constant 8 : index
    %c0_385 = arith.constant 0 : index
    %c0_386 = arith.constant 0 : index
    %354 = vector.load %arg4[%c8_384, %c0_385, %c0_386] : memref<9x128x128xf32, #tpu.memory_space<vmem>>, vector<1x128x128xf32>
    %355 = vector.shape_cast %354 : vector<1x128x128xf32> to vector<128x128xf32>
    %cst_387 = arith.constant dense<0.000000e+00> : vector<64x128xf32>
    %356 = tpu.matmul %353, %355, %cst_387 {dimension_numbers = #tpu.dot_dimension_numbers<[1], [0], [0], [1], [0, 0, 1, 1], [], []>} : vector<64x128xf32>, vector<128x128xf32>, vector<64x128xf32> -> vector<64x128xf32>
    %357 = arith.addf %350, %356 : vector<64x128xf32>
    %c0_388 = arith.constant 0 : index
    %c0_389 = arith.constant 0 : index
    %358 = vector.load %arg5[%c0_388, %c0_389] : memref<1x128xf32, #tpu.memory_space<vmem>>, vector<1x128xf32>
    %359 = vector.broadcast %358 : vector<1x128xf32> to vector<64x128xf32>
    %360 = arith.addf %357, %359 : vector<64x128xf32>
    %cst_390 = arith.constant 0.000000e+00 : f32
    %361 = vector.broadcast %cst_390 : f32 to vector<64x128xf32>
    %362 = arith.maximumf %360, %361 : vector<64x128xf32>
    %cst_391 = arith.constant dense<0.000000e+00> : vector<128xf32>
    %363 = vector.multi_reduction <add>, %362, %cst_391 [0] : vector<64x128xf32> to vector<128xf32>
    %364 = vector.shape_cast %363 : vector<128xf32> to vector<1x128xf32>
    %cst_392 = arith.constant 6.400000e+01 : f32
    %365 = vector.broadcast %cst_392 : f32 to vector<1x128xf32>
    %366 = arith.divf %364, %365 : vector<1x128xf32>
    %c0_393 = arith.constant 0 : index
    %c0_394 = arith.constant 0 : index
    %367 = vector.load %arg6[%c0_393, %c0_394] : memref<1x128xf32, #tpu.memory_space<vmem>>, vector<1x128xf32>
    %368 = arith.mulf %366, %367 : vector<1x128xf32>
    %cst_395 = arith.constant dense<0.000000e+00> : vector<1xf32>
    %369 = vector.multi_reduction <add>, %368, %cst_395 [1] : vector<1x128xf32> to vector<1xf32>
    %370 = vector.shape_cast %369 : vector<1xf32> to vector<1x1xf32>
    %c0_396 = arith.constant 0 : index
    %c0_397 = arith.constant 0 : index
    %371 = vector.load %arg7[%c0_396, %c0_397] : memref<1x1xf32, #tpu.memory_space<vmem>>, vector<1x1xf32>
    %372 = arith.addf %370, %371 : vector<1x1xf32>
    %373 = vector.shape_cast %372 : vector<1x1xf32> to vector<1x1x1xf32>
    %c0_398 = arith.constant 0 : index
    %c0_399 = arith.constant 0 : index
    %c0_400 = arith.constant 0 : index
    %374 = vector.load %arg8[%c0_398, %c0_399, %c0_400] : memref<1x1x1xf32, #tpu.memory_space<vmem>>, vector<1x1x1xf32>
    tpu.vector_store %arg8[%c0_398, %c0_399, %c0_400], %373 {strides = array<i32>} : memref<1x1x1xf32, #tpu.memory_space<vmem>>, vector<1x1x1xf32>,
    return
  }
  func.func @transform_0(%arg0: i32) -> (i32, i32, i32, i32) {
    %c0_i32 = arith.constant 0 : i32
    %c0_i32_0 = arith.constant 0 : i32
    %c0_i32_1 = arith.constant 0 : i32
    %c0_i32_2 = arith.constant 0 : i32
    return %arg0, %c0_i32, %c0_i32_0, %c0_i32_1 : i32, i32, i32, i32
  }
  func.func @transform_1(%arg0: i32) -> (i32, i32, i32) {
    %c0_i32 = arith.constant 0 : i32
    %c0_i32_0 = arith.constant 0 : i32
    %c0_i32_1 = arith.constant 0 : i32
    %c0_i32_2 = arith.constant 0 : i32
    return %c0_i32, %c0_i32_0, %c0_i32_1 : i32, i32, i32
  }
  func.func @transform_2(%arg0: i32) -> (i32, i32) {
    %c0_i32 = arith.constant 0 : i32
    %c0_i32_0 = arith.constant 0 : i32
    %c0_i32_1 = arith.constant 0 : i32
    return %c0_i32, %c0_i32_0 : i32, i32
  }
  func.func @transform_3(%arg0: i32) -> (i32, i32, i32) {
    %c0_i32 = arith.constant 0 : i32
    %c0_i32_0 = arith.constant 0 : i32
    %c0_i32_1 = arith.constant 0 : i32
    %c0_i32_2 = arith.constant 0 : i32
    return %c0_i32, %c0_i32_0, %c0_i32_1 : i32, i32, i32
  }
  func.func @transform_4(%arg0: i32) -> (i32, i32) {
    %c0_i32 = arith.constant 0 : i32
    %c0_i32_0 = arith.constant 0 : i32
    %c0_i32_1 = arith.constant 0 : i32
    return %c0_i32, %c0_i32_0 : i32, i32
  }
  func.func @transform_5(%arg0: i32) -> (i32, i32) {
    %c0_i32 = arith.constant 0 : i32
    %c0_i32_0 = arith.constant 0 : i32
    %c0_i32_1 = arith.constant 0 : i32
    return %c0_i32, %c0_i32_0 : i32, i32
  }
  func.func @transform_6(%arg0: i32) -> (i32, i32) {
    %c0_i32 = arith.constant 0 : i32
    %c0_i32_0 = arith.constant 0 : i32
    %c0_i32_1 = arith.constant 0 : i32
    return %c0_i32, %c0_i32_0 : i32, i32
  }
  func.func @transform_7(%arg0: i32) -> (i32, i32, i32) {
    %c0_i32 = arith.constant 0 : i32
    %c0_i32_0 = arith.constant 0 : i32
    %c0_i32_1 = arith.constant 0 : i32
    return %arg0, %c0_i32, %c0_i32_0 : i32, i32, i32
  }
}

</mosaic_0001>

<bundles_post_ra>
// kernel: convnet_model_forward.1
= control target key start
LH: loop header
LB: loop body
LE: loop exit
PB: predicated region body
PF: predicated region fallthrough
CT: control target
= control target key end

     0   :  { %s9993_s26 = smov 0   ;;  %s11592_s0 = inlined_call_operand.vmem [shape: f32[8,9,9,4], index: 0, kind: input, shape index: {}]   ;;  %s11593_s1 = inlined_call_operand.vmem [shape: f32[9,4,128], index: 1, kind: input, shape index: {}]   ;;  %s11594_s2 = inlined_call_operand.vmem [shape: f32[1,128], index: 2, kind: input, shape index: {}]   ;;  %s11595_s3 = inlined_call_operand.vmem [shape: f32[9,128,128], index: 3, kind: input, shape index: {}]   ;;  %s11596_s4 = inlined_call_operand.vmem [shape: f32[1,128], index: 4, kind: input, shape index: {}]   ;;  %s11597_s5 = inlined_call_operand.vmem [shape: f32[1,128], index: 5, kind: input, shape index: {}]   ;;  %s11598_s6 = inlined_call_operand.<no memory space> [shape: f32[1,1], index: 6, kind: input, shape index: {}]   ;;  %s11599_s7 = inlined_call_operand.vmem [shape: f32[2,1,1], index: 7, kind: output, shape index: {}]  }
   0x1   :  { %v12_v0 = vstv %s11598_s6 }
   0x2   :  { %13 = vst [vmem:[#allocation3] sm:$0x1] %v12_v0 }
   0x3 LB: > { %s9999_s27 = sadd.s32 4294967295, %s9947_s26   ;;  %p7124_p0 = scmp.ge.s32.totalorder %s9947_s26, 1  ;;  %s9947_s26 = sphi %s9993_s26, %s19_s26  }
   0x4   : > { %p241_p1 = scmp.lt.s32.totalorder %s9947_s26, 3 }
   0x6   : > { %p242_p2 = pnand %p7124_p0, %p241_p1 }
   0x8   : > { %245 = sbr.rel (%p242_p2) target bundleno = 1000 (0x3e8), region = 48 }
   0xf   : > { %v7135_v1 = vld [vmem:[%s11593_s1 + $0x4] sm:$0xf]  ;;  %vm399_vm0 = vcmask 1043456   ;;  %v362_v2 = vld [vmem:[%s11593_s1] sm:$0xf]  ;;  %s7125_s8 = sshll.u32 %s9999_s27, 2 }
  0x10   : > { %8422 = vmatprep.subr.msk.mxu1 %vm399_vm0, %v7135_v1  ;;  %8436 = vmatprep.subr.msk.mxu0 %vm399_vm0, %v362_v2  ;;  %p273_p3 = scmp.lt.s32.totalorder %s7125_s8, 7  ;;  %v7281_v3 = vld [vmem:[%s11593_s1 + $0x4] sm:$0xf]  ;;  %v7154_v4 = vld [vmem:[%s11593_s1 + $0x8] sm:$0xf]  ;;  %vm374_vm1 = vcmask 31744  }
  0x11   : > { %8423 = vmatpush3.msk.msra.mxu1 %vm399_vm0, %v7135_v1  ;;  %8437 = vmatpush3.msk.msra.mxu0 %vm399_vm0, %v362_v2  ;;  %v1734_v11 = vld [vmem:[%s11593_s1] sm:$0xf]  ;;  %v7172_v12 = vld [vmem:[%s11593_s1 + $0xc] sm:$0xf]  ;;  %v7308_v26 = vld [vmem:[%s11593_s1 + $0x8] sm:$0xf] }
  0x12   : > { %s11613_s8 = smov (!%p273_p3, %s7125_s8), 7  ;;  %8548 = vmatprep.subr.msk.mxu1 %vm399_vm0, %v7281_v3  ;;  %8450 = vmatprep.subr.msk.mxu0 %vm399_vm0, %v7154_v4  ;;  %v7190_v27 = vld [vmem:[%s11593_s1 + $0x10] sm:$0xf]  ;;  %v7326_v36 = vld [vmem:[%s11593_s1 + $0xc] sm:$0xf]  ;;  %vm7065_vm2 = vcmask 1040384  }
  0x13   : > { %s9930_s13 = smul.u32 144, %s11613_s8  ;;  %v7208_v37 = vld [vmem:[%s11593_s1 + $0x14] sm:$0xf]  ;;  %v7344_v49 = vld [vmem:[%s11593_s1 + $0x10] sm:$0xf]  ;;  %p279_p4 = scmp.lt.s32.totalorder %s9999_s27, 1 }
  0x14   : > { %v7226_v50 = vld [vmem:[%s11593_s1 + $0x18] sm:$0xf]  ;;  %v7362_v0 = vld [vmem:[%s11593_s1 + $0x14] sm:$0xf]  ;;  %v7244_v1 = vld [vmem:[%s11593_s1 + $0x1c] sm:$0xf] }
  0x15   : > { %s10025_s16 = scalar_lea.vmem %s11592_s0, %s9930_s13  ;;  %s11615_s27 = smov (!%p279_p4, %s9999_s27), 1  ;;  %vm7071_vm3 = vcmask 0  }
  0x16   : > { %v10028_v5 = vld [vmem:[%s10025_s16 + $0x90] sm:$0xff]  ;;  %v354_v6 = vld [vmem:[%s10025_s16] sm:$0xff]  ;;  %s281_s8 = scalar_lea.vmem %s11599_s7, %s11615_s27 }
  0x17   : > { %v10032_v7 = vld [vmem:[%s10025_s16 + $0xa0] sm:$0xff]  ;;  %8424 = vmatprep.mubr.msk.f32.mxu1 %vm374_vm1, %v10028_v5  ;;  %8438 = vmatprep.mubr.msk.f32.mxu0 %vm374_vm1, %v354_v6  ;;  %v10038_v8 = vld [vmem:[%s10025_s16 + $0x10] sm:$0xff] }
  0x18   : > { %v10041_v9 = vld [vmem:[%s10025_s16 + $0xb0] sm:$0xff]  ;;  %v10044_v10 = vld [vmem:[%s10025_s16 + $0x20] sm:$0xff]  ;;  %8425 = vmatmul.mubr.msk.f32.vlgmr.msra.gmra.mrb[0].mxu1 %vm374_vm1, %v10032_v7  ;;  %8439 = vmatmul.mubr.msk.f32.vlgmr.msra.gmra.mrb[0].mxu0 %vm374_vm1, %v10038_v8 }
  0x19   : > { %8549 = vmatpush3.msk.msra.mxu1 %vm399_vm0, %v7281_v3  ;;  %8451 = vmatpush3.msk.msra.mxu0 %vm399_vm0, %v7154_v4  ;;  %v10059_v13 = vld [vmem:[%s10025_s16 + $0xc0] sm:$0xff]  ;;  %v10062_v14 = vld [vmem:[%s10025_s16 + $0x30] sm:$0xff] }
  0x1a   : > { %8427 = vmatprep.mubr.msk.f32.mxu1 %vm374_vm1, %v10041_v9  ;;  %8441 = vmatprep.mubr.msk.f32.mxu0 %vm374_vm1, %v10044_v10  ;;  %v10069_v15 = vld [vmem:[%s10025_s16 + $0xd0] sm:$0xff]  ;;  %v10072_v16 = vld [vmem:[%s10025_s16 + $0x40] sm:$0xff] }
  0x1b   : > { %8562 = vmatprep.subr.msk.mxu1 %vm399_vm0, %v1734_v11  ;;  %8464 = vmatprep.subr.msk.mxu0 %vm399_vm0, %v7172_v12  ;;  %v10085_v17 = vld [vmem:[%s10025_s16 + $0xe0] sm:$0xff]  ;;  %v10088_v18 = vld [vmem:[%s10025_s16 + $0x50] sm:$0xff] }
  0x1c   : > { %8428 = vmatmul.mubr.msk.f32.gmra.mrb[2].mxu1 %vm374_vm1, %v10059_v13  ;;  %8442 = vmatmul.mubr.msk.f32.gmra.mrb[2].mxu0 %vm374_vm1, %v10062_v14  ;;  %v10091_v19 = vld [vmem:[%s10025_s16 + $0xf0] sm:$0xff]  ;;  %v10094_v20 = vld [vmem:[%s10025_s16 + $0x60] sm:$0xff] }
  0x1d   : > { %8430 = vmatprep.mubr.msk.f32.mxu1 %vm374_vm1, %v10069_v15  ;;  %8444 = vmatprep.mubr.msk.f32.mxu0 %vm374_vm1, %v10072_v16  ;;  %v10105_v21 = vld [vmem:[%s10025_s16 + $0x100] sm:$0xff]  ;;  %v10108_v22 = vld [vmem:[%s10025_s16 + $0x70] sm:$0xff] }
  0x1e   : > { %v640_v23 = vld [vmem:[%s10025_s16 + $0x1] sm:$0xff]  ;;  %v10118_v24 = vld [vmem:[%s10025_s16 + $0x11] sm:$0xff] }
  0x1f   : > { %v10121_v25 = vld [vmem:[%s10025_s16 + $0x21] sm:$0xff]  ;;  %v10136_v28 = vld [vmem:[%s10025_s16 + $0x31] sm:$0xff] }
  0x20   : > { %8431 = vmatmul.mubr.msk.f32.gmra.mrb[4].mxu1 %vm374_vm1, %v10085_v17  ;;  %8445 = vmatmul.mubr.msk.f32.gmra.mrb[4].mxu0 %vm374_vm1, %v10088_v18  ;;  %v10143_v29 = vld [vmem:[%s10025_s16 + $0x41] sm:$0xff]  ;;  %v10156_v30 = vld [vmem:[%s10025_s16 + $0x51] sm:$0xff] }
  0x21   : > { %8433 = vmatprep.mubr.msk.f32.mxu1 %vm374_vm1, %v10091_v19  ;;  %8447 = vmatprep.mubr.msk.f32.mxu0 %vm374_vm1, %v10094_v20  ;;  %v10159_v31 = vld [vmem:[%s10025_s16 + $0x61] sm:$0xff]  ;;  %v10170_v32 = vld [vmem:[%s10025_s16 + $0x71] sm:$0xff] }
  0x22   : > { %v10173_v33 = vld [vmem:[%s10025_s16 + $0x120] sm:$0xff]  ;;  %v10184_v34 = vld [vmem:[%s10025_s16 + $0x130] sm:$0xff] }
  0x23   : > { %v10187_v35 = vld [vmem:[%s10025_s16 + $0x140] sm:$0xff]  ;;  %v10202_v38 = vld [vmem:[%s10025_s16 + $0x150] sm:$0xff] }
  0x24   : > { %8434 = vmatmul.mubr.msk.f32.gmra.mrb[6].mxu1 %vm374_vm1, %v10105_v21  ;;  %8448 = vmatmul.mubr.msk.f32.gmra.mrb[6].mxu0 %vm374_vm1, %v10108_v22  ;;  %v10209_v39 = vld [vmem:[%s10025_s16 + $0x160] sm:$0xff]  ;;  %v10222_v40 = vld [vmem:[%s10025_s16 + $0x170] sm:$0xff] }
  0x25   : > { %8452 = vmatprep.mubr.msk.f32.mxu0 %vm374_vm1, %v640_v23  ;;  %8550 = vmatprep.mubr.msk.f32.mxu1 %vm374_vm1, %v640_v23  ;;  %v10225_v41 = vld [vmem:[%s10025_s16 + $0x180] sm:$0xff]  ;;  %v10236_v42 = vld [vmem:[%s10025_s16 + $0x190] sm:$0xff] }
  0x26   : > { %v10239_v43 = vld [vmem:[%s10025_s16 + $0x1b0] sm:$0xff]  ;;  %v10250_v45 = vld [vmem:[%s10025_s16 + $0x1c0] sm:$0xff] }
  0x27   : > { %v7300_v44 = vld [vmem:[%s10025_s16 + $0x91] sm:$0xff]  ;;  %v10253_v46 = vld [vmem:[%s10025_s16 + $0xa1] sm:$0xff] }
  0x28   : > { %8453 = vmatmul.mubr.msk.f32.vlgmr.msra.gmra.mrb[0].mxu0 %vm374_vm1, %v10118_v24  ;;  %8551 = vmatmul.mubr.msk.f32.vlgmr.msra.gmra.mrb[8].mxu1 %vm374_vm1, %v10118_v24  ;;  %v10256_v47 = vld [vmem:[%s10025_s16 + $0x1d0] sm:$0xff]  ;;  %v10274_v51 = vld [vmem:[%s10025_s16 + $0x1e0] sm:$0xff] }
  0x29   : > { %8563 = vmatpush3.msk.msra.mxu1 %vm399_vm0, %v1734_v11  ;;  %8465 = vmatpush3.msk.msra.mxu0 %vm399_vm0, %v7172_v12  ;;  %v10259_v48 = vld [vmem:[%s10025_s16 + $0xb1] sm:$0xff]  ;;  %v10277_v52 = vld [vmem:[%s10025_s16 + $0xc1] sm:$0xff] }
  0x2a   : > { %8455 = vmatprep.mubr.msk.f32.mxu0 %vm374_vm1, %v10121_v25  ;;  %8553 = vmatprep.mubr.msk.f32.mxu1 %vm374_vm1, %v10121_v25  ;;  %v10284_v53 = vld [vmem:[%s10025_s16 + $0x1f0] sm:$0xff]  ;;  %v10300_v55 = vld [vmem:[%s10025_s16 + $0x200] sm:$0xff]  ;;  %v7380_v11 = vld [vmem:[%s11593_s1 + $0x18] sm:$0xf] }
  0x2b   : > { %8576 = vmatprep.subr.msk.mxu1 %vm399_vm0, %v7308_v26  ;;  %8478 = vmatprep.subr.msk.mxu0 %vm399_vm0, %v7190_v27  ;;  %v10287_v54 = vld [vmem:[%s10025_s16 + $0xd1] sm:$0xff]  ;;  %v10303_v56 = vld [vmem:[%s10025_s16 + $0xe1] sm:$0xff] }
  0x2c   : > { %8456 = vmatmul.mubr.msk.f32.gmra.mrb[2].mxu0 %vm374_vm1, %v10136_v28  ;;  %8554 = vmatmul.mubr.msk.f32.gmra.mrb[10].mxu1 %vm374_vm1, %v10136_v28  ;;  %v10306_v57 = vld [vmem:[%s10025_s16 + $0x210] sm:$0xff]  ;;  %v10320_v59 = vld [vmem:[%s10025_s16 + $0x220] sm:$0xff] }
  0x2d   : > { %8458 = vmatprep.mubr.msk.f32.mxu0 %vm374_vm1, %v10143_v29  ;;  %8556 = vmatprep.mubr.msk.f32.mxu1 %vm374_vm1, %v10143_v29  ;;  %v10309_v58 = vld [vmem:[%s10025_s16 + $0xf1] sm:$0xff]  ;;  %v10323_v60 = vld [vmem:[%s10025_s16 + $0x101] sm:$0xff] }
  0x2e   : > { %v10326_v61 = vld [vmem:[%s10025_s16 + $0x121] sm:$0xff]  ;;  %v10337_v62 = vld [vmem:[%s10025_s16 + $0x131] sm:$0xff] }
  0x2f   : > { %v10340_v63 = vld [vmem:[%s10025_s16 + $0x141] sm:$0xff]  ;;  %v10355_v2 = vld [vmem:[%s10025_s16 + $0x151] sm:$0xff] }
  0x30   : > { %8459 = vmatmul.mubr.msk.f32.gmra.mrb[4].mxu0 %vm374_vm1, %v10156_v30  ;;  %8557 = vmatmul.mubr.msk.f32.gmra.mrb[12].mxu1 %vm374_vm1, %v10156_v30  ;;  %v10362_v3 = vld [vmem:[%s10025_s16 + $0x161] sm:$0xff]  ;;  %v10375_v4 = vld [vmem:[%s10025_s16 + $0x171] sm:$0xff] }
  0x31   : > { %8461 = vmatprep.mubr.msk.f32.mxu0 %vm374_vm1, %v10159_v31  ;;  %8559 = vmatprep.mubr.msk.f32.mxu1 %vm374_vm1, %v10159_v31  ;;  %v10389_v6 = vld [vmem:[%s10025_s16 + $0x191] sm:$0xff]  ;;  %v7262_v12 = vld [vmem:[%s11593_s1 + $0x20] sm:$0xf] }
  0x32   : > { %v10434_v23 = vld [vmem:[%s10025_s16 + $0x80] sm:$0xff] }
  0x34   : > { %8462 = vmatmul.mubr.msk.f32.gmra.mrb[6].mxu0 %vm374_vm1, %v10170_v32  ;;  %8560 = vmatmul.mubr.msk.f32.gmra.mrb[14].mxu1 %vm374_vm1, %v10170_v32 }
  0x35   : > { %8466 = vmatprep.mubr.msk.f32.mxu0 %vm374_vm1, %v10173_v33  ;;  %8564 = vmatprep.mubr.msk.f32.mxu1 %vm374_vm1, %v10028_v5  ;;  %v10378_v5 = vld [vmem:[%s10025_s16 + $0x181] sm:$0xff] }
  0x38   : > { %8467 = vmatmul.mubr.msk.f32.vlgmr.msra.gmra.mrb[0].mxu0 %vm374_vm1, %v10184_v34  ;;  %8565 = vmatmul.mubr.msk.f32.vlgmr.msra.gmra.mrb[8].mxu1 %vm374_vm1, %v10032_v7 }
  0x39   : > { %8577 = vmatpush3.msk.msra.mxu1 %vm399_vm0, %v7308_v26  ;;  %8479 = vmatpush3.msk.msra.mxu0 %vm399_vm0, %v7190_v27  ;;  %v10437_v26 = vld [vmem:[%s10025_s16 + $0x1b1] sm:$0xff]  ;;  %v10448_v27 = vld [vmem:[%s10025_s16 + $0x1c1] sm:$0xff] }
  0x3a   : > { %8469 = vmatprep.mubr.msk.f32.mxu0 %vm374_vm1, %v10187_v35  ;;  %8567 = vmatprep.mubr.msk.f32.mxu1 %vm374_vm1, %v10041_v9 }
  0x3b   : > { %8590 = vmatprep.subr.msk.mxu1 %vm399_vm0, %v7326_v36  ;;  %8492 = vmatprep.subr.msk.mxu0 %vm399_vm0, %v7208_v37 }
  0x3c   : > { %8470 = vmatmul.mubr.msk.f32.gmra.mrb[2].mxu0 %vm374_vm1, %v10202_v38  ;;  %8568 = vmatmul.mubr.msk.f32.gmra.mrb[10].mxu1 %vm374_vm1, %v10059_v13 }
  0x3d   : > { %8472 = vmatprep.mubr.msk.f32.mxu0 %vm374_vm1, %v10209_v39  ;;  %8570 = vmatprep.mubr.msk.f32.mxu1 %vm374_vm1, %v10069_v15 }
  0x40   : > { %8473 = vmatmul.mubr.msk.f32.gmra.mrb[4].mxu0 %vm374_vm1, %v10222_v40  ;;  %8571 = vmatmul.mubr.msk.f32.gmra.mrb[12].mxu1 %vm374_vm1, %v10085_v17 }
  0x41   : > { %8475 = vmatprep.mubr.msk.f32.mxu0 %vm374_vm1, %v10225_v41  ;;  %8573 = vmatprep.mubr.msk.f32.mxu1 %vm374_vm1, %v10091_v19 }
  0x44   : > { %8476 = vmatmul.mubr.msk.f32.gmra.mrb[6].mxu0 %vm374_vm1, %v10236_v42  ;;  %8574 = vmatmul.mubr.msk.f32.gmra.mrb[14].mxu1 %vm374_vm1, %v10105_v21 }
  0x45   : > { %8480 = vmatprep.mubr.msk.f32.mxu0 %vm374_vm1, %v10239_v43  ;;  %8578 = vmatprep.mubr.msk.f32.mxu1 %vm374_vm1, %v7300_v44  ;;  %v7443_v44 = vld [vmem:[%s11593_s1 + $0x4] sm:$0xf] }
  0x48   : > { %8481 = vmatmul.mubr.msk.f32.vlgmr.msra.gmra.mrb[0].mxu0 %vm374_vm1, %v10250_v45  ;;  %8579 = vmatmul.mubr.msk.f32.vlgmr.msra.gmra.mrb[8].mxu1 %vm374_vm1, %v10253_v46 }
  0x49   : > { %8591 = vmatpush3.msk.msra.mxu1 %vm399_vm0, %v7326_v36  ;;  %8493 = vmatpush3.msk.msra.mxu0 %vm399_vm0, %v7208_v37  ;;  %v10451_v36 = vld [vmem:[%s10025_s16 + $0x1d1] sm:$0xff]  ;;  %v7398_v37 = vld [vmem:[%s11593_s1 + $0x1c] sm:$0xf] }
  0x4a   : > { %8483 = vmatprep.mubr.msk.f32.mxu0 %vm374_vm1, %v10256_v47  ;;  %8581 = vmatprep.mubr.msk.f32.mxu1 %vm374_vm1, %v10259_v48 }
  0x4b   : > { %8604 = vmatprep.subr.msk.mxu1 %vm399_vm0, %v7344_v49  ;;  %8506 = vmatprep.subr.msk.mxu0 %vm399_vm0, %v7226_v50 }
  0x4c   : > { %8484 = vmatmul.mubr.msk.f32.gmra.mrb[2].mxu0 %vm374_vm1, %v10274_v51  ;;  %8582 = vmatmul.mubr.msk.f32.gmra.mrb[10].mxu1 %vm374_vm1, %v10277_v52 }
  0x4d   : > { %8486 = vmatprep.mubr.msk.f32.mxu0 %vm374_vm1, %v10284_v53  ;;  %8584 = vmatprep.mubr.msk.f32.mxu1 %vm374_vm1, %v10287_v54 }
  0x50   : > { %8487 = vmatmul.mubr.msk.f32.gmra.mrb[4].mxu0 %vm374_vm1, %v10300_v55  ;;  %8585 = vmatmul.mubr.msk.f32.gmra.mrb[12].mxu1 %vm374_vm1, %v10303_v56 }
  0x51   : > { %8489 = vmatprep.mubr.msk.f32.mxu0 %vm374_vm1, %v10306_v57  ;;  %8587 = vmatprep.mubr.msk.f32.mxu1 %vm374_vm1, %v10309_v58 }
  0x54   : > { %8490 = vmatmul.mubr.msk.f32.gmra.mrb[6].mxu0 %vm374_vm1, %v10320_v59  ;;  %8588 = vmatmul.mubr.msk.f32.gmra.mrb[14].mxu1 %vm374_vm1, %v10323_v60 }
  0x55   : > { %8494 = vmatprep.mubr.msk.f32.mxu0 %vm374_vm1, %v10326_v61  ;;  %8592 = vmatprep.mubr.msk.f32.mxu1 %vm374_vm1, %v10239_v43 }
  0x58   : > { %8495 = vmatmul.mubr.msk.f32.vlgmr.msra.gmra.mrb[0].mxu0 %vm374_vm1, %v10337_v62  ;;  %8593 = vmatmul.mubr.msk.f32.vlgmr.msra.gmra.mrb[8].mxu1 %vm374_vm1, %v10250_v45 }
  0x59   : > { %8605 = vmatpush3.msk.msra.mxu1 %vm399_vm0, %v7344_v49  ;;  %8507 = vmatpush3.msk.msra.mxu0 %vm399_vm0, %v7226_v50  ;;  %v10466_v49 = vld [vmem:[%s10025_s16 + $0x1e1] sm:$0xff]  ;;  %v10473_v50 = vld [vmem:[%s10025_s16 + $0x1f1] sm:$0xff] }
  0x5a   : > { %8497 = vmatprep.mubr.msk.f32.mxu0 %vm374_vm1, %v10340_v63  ;;  %8595 = vmatprep.mubr.msk.f32.mxu1 %vm374_vm1, %v10256_v47 }
  0x5b   : > { %8618 = vmatprep.subr.msk.mxu1 %vm399_vm0, %v7362_v0  ;;  %8520 = vmatprep.subr.msk.mxu0 %vm399_vm0, %v7244_v1 }
  0x5c   : > { %8498 = vmatmul.mubr.msk.f32.gmra.mrb[2].mxu0 %vm374_vm1, %v10355_v2  ;;  %8596 = vmatmul.mubr.msk.f32.gmra.mrb[10].mxu1 %vm374_vm1, %v10274_v51 }
  0x5d   : > { %8500 = vmatprep.mubr.msk.f32.mxu0 %vm374_vm1, %v10362_v3  ;;  %8598 = vmatprep.mubr.msk.f32.mxu1 %vm374_vm1, %v10284_v53 }
  0x60   : > { %8501 = vmatmul.mubr.msk.f32.gmra.mrb[4].mxu0 %vm374_vm1, %v10375_v4  ;;  %8599 = vmatmul.mubr.msk.f32.gmra.mrb[12].mxu1 %vm374_vm1, %v10300_v55 }
  0x61   : > { %8503 = vmatprep.mubr.msk.f32.mxu0 %vm374_vm1, %v10378_v5  ;;  %8601 = vmatprep.mubr.msk.f32.mxu1 %vm374_vm1, %v10306_v57 }
  0x64   : > { %8504 = vmatmul.mubr.msk.f32.gmra.mrb[6].mxu0 %vm374_vm1, %v10389_v6  ;;  %8602 = vmatmul.mubr.msk.f32.gmra.mrb[14].mxu1 %vm374_vm1, %v10320_v59 }
  0x65   : > { %8508 = vmatprep.mubr.msk.f32.mxu0 %vm374_vm1, %v10038_v8  ;;  %8606 = vmatprep.mubr.msk.f32.mxu1 %vm374_vm1, %v10326_v61 }
  0x68   : > { %8509 = vmatmul.mubr.msk.f32.vlgmr.msra.gmra.mrb[0].mxu0 %vm374_vm1, %v10044_v10  ;;  %8607 = vmatmul.mubr.msk.f32.vlgmr.msra.gmra.mrb[8].mxu1 %vm374_vm1, %v10337_v62 }
  0x69   : > { %8619 = vmatpush3.msk.msra.mxu1 %vm399_vm0, %v7362_v0  ;;  %8521 = vmatpush3.msk.msra.mxu0 %vm399_vm0, %v7244_v1  ;;  %v10486_v0 = vld [vmem:[%s10025_s16 + $0x201] sm:$0xff]  ;;  %v10489_v1 = vld [vmem:[%s10025_s16 + $0x211] sm:$0xff] }
  0x6a   : > { %8511 = vmatprep.mubr.msk.f32.mxu0 %vm374_vm1, %v10062_v14  ;;  %8609 = vmatprep.mubr.msk.f32.mxu1 %vm374_vm1, %v10340_v63  ;;  %11606 = vst [vmem:[#allocation4_spill] sm:$0xff] %v10489_v1 }
  0x6b   : > { %8632 = vmatprep.subr.msk.mxu1 %vm399_vm0, %v7380_v11  ;;  %8534 = vmatprep.subr.msk.mxu0 %vm399_vm0, %v7262_v12 }
  0x6c   : > { %8512 = vmatmul.mubr.msk.f32.gmra.mrb[2].mxu0 %vm374_vm1, %v10072_v16  ;;  %8610 = vmatmul.mubr.msk.f32.gmra.mrb[10].mxu1 %vm374_vm1, %v10355_v2 }
  0x6d   : > { %8514 = vmatprep.mubr.msk.f32.mxu0 %vm374_vm1, %v10088_v18  ;;  %8612 = vmatprep.mubr.msk.f32.mxu1 %vm374_vm1, %v10362_v3 }
  0x70   : > { %8515 = vmatmul.mubr.msk.f32.gmra.mrb[4].mxu0 %vm374_vm1, %v10094_v20  ;;  %8613 = vmatmul.mubr.msk.f32.gmra.mrb[12].mxu1 %vm374_vm1, %v10375_v4 }
  0x71   : > { %8517 = vmatprep.mubr.msk.f32.mxu0 %vm374_vm1, %v10108_v22  ;;  %8615 = vmatprep.mubr.msk.f32.mxu1 %vm374_vm1, %v10378_v5 }
  0x74   : > { %8518 = vmatmul.mubr.msk.f32.gmra.mrb[6].mxu0 %vm374_vm1, %v10434_v23  ;;  %8616 = vmatmul.mubr.msk.f32.gmra.mrb[14].mxu1 %vm374_vm1, %v10389_v6 }
  0x75   : > { %8522 = vmatprep.mubr.msk.f32.mxu0 %vm374_vm1, %v10032_v7  ;;  %8620 = vmatprep.mubr.msk.f32.mxu1 %vm374_vm1, %v10437_v26 }
  0x78   : > { %8523 = vmatmul.mubr.msk.f32.vlgmr.msra.gmra.mrb[0].mxu0 %vm374_vm1, %v10041_v9  ;;  %8621 = vmatmul.mubr.msk.f32.vlgmr.msra.gmra.mrb[8].mxu1 %vm374_vm1, %v10448_v27 }
  0x79   : > { %8633 = vmatpush3.msk.msra.mxu1 %vm399_vm0, %v7380_v11  ;;  %8535 = vmatpush3.msk.msra.mxu0 %vm399_vm0, %v7262_v12  ;;  %v10500_v11 = vld [vmem:[%s10025_s16 + $0x110] sm:$0xff]  ;;  %v10503_v12 = vld [vmem:[%s10025_s16 + $0x221] sm:$0xff] }
  0x7a   : > { %8525 = vmatprep.mubr.msk.f32.mxu0 %vm374_vm1, %v10059_v13  ;;  %8623 = vmatprep.mubr.msk.f32.mxu1 %vm374_vm1, %v10451_v36  ;;  %11607 = vst [vmem:[#allocation5_spill] sm:$0xff] %v10500_v11  ;;  %11608 = vst [vmem:[#allocation6_spill] sm:$0xff] %v10503_v12 }
  0x7b   : > { %8646 = vmatprep.subr.msk.mxu1 %vm399_vm0, %v7398_v37  ;;  %8674 = vmatprep.subr.msk.mxu0 %vm399_vm0, %v7443_v44 }
  0x7c   : > { %8526 = vmatmul.mubr.msk.f32.gmra.mrb[2].mxu0 %vm374_vm1, %v10069_v15  ;;  %8624 = vmatmul.mubr.msk.f32.gmra.mrb[10].mxu1 %vm374_vm1, %v10466_v49 }
  0x7d   : > { %8528 = vmatprep.mubr.msk.f32.mxu0 %vm374_vm1, %v10085_v17  ;;  %8626 = vmatprep.mubr.msk.f32.mxu1 %vm374_vm1, %v10473_v50 }
  0x80   : > { %8529 = vmatmul.mubr.msk.f32.gmra.mrb[4].mxu0 %vm374_vm1, %v10091_v19  ;;  %8627 = vmatmul.mubr.msk.f32.gmra.mrb[12].mxu1 %vm374_vm1, %v10486_v0 }
  0x81   : > { %8531 = vmatprep.mubr.msk.f32.mxu0 %vm374_vm1, %v10105_v21  ;;  %8629 = vmatprep.mubr.msk.f32.mxu1 %vm374_vm1, %v10489_v1  ;;  %v7416_v1 = vld [vmem:[%s11593_s1 + $0x20] sm:$0xf] }
  0x84   : > { %8532 = vmatmul.mubr.msk.f32.gmra.mrb[6].mxu0 %vm374_vm1, %v10500_v11  ;;  %8630 = vmatmul.mubr.msk.f32.gmra.mrb[14].mxu1 %vm374_vm1, %v10503_v12  ;;  %v3091_v12 = vld [vmem:[%s11593_s1] sm:$0xf] }
  0x85   : > { %8536 = vmatprep.mubr.msk.f32.mxu0 %vm374_vm1, %v10118_v24  ;;  %8634 = vmatprep.mubr.msk.f32.mxu1 %vm374_vm1, %v10032_v7 }
  0x88   : > { %8537 = vmatmul.mubr.msk.f32.vlgmr.msra.gmra.mrb[0].mxu0 %vm374_vm1, %v10121_v25  ;;  %8635 = vmatmul.mubr.msk.f32.vlgmr.msra.gmra.mrb[8].mxu1 %vm374_vm1, %v10041_v9 }
  0x89   : > { %8647 = vmatpush3.msk.msra.mxu1 %vm399_vm0, %v7398_v37  ;;  %8675 = vmatpush3.msk.msra.mxu0 %vm399_vm0, %v7443_v44  ;;  %v10548_v37 = vld [vmem:[%s10025_s16 + $0x81] sm:$0xff] }
  0x8a   : > { %8539 = vmatprep.mubr.msk.f32.mxu0 %vm374_vm1, %v10136_v28  ;;  %8637 = vmatprep.mubr.msk.f32.mxu1 %vm374_vm1, %v10059_v13  ;;  %v7605_v44 = vld [vmem:[%s11593_s1 + $0x4] sm:$0xf] }
  0x8b   : > { %8660 = vmatprep.subr.msk.mxu1 %vm399_vm0, %v7416_v1  ;;  %8688 = vmatprep.subr.msk.mxu0 %vm399_vm0, %v3091_v12 }
  0x8c   : > { %8540 = vmatmul.mubr.msk.f32.gmra.mrb[2].mxu0 %vm374_vm1, %v10143_v29  ;;  %8638 = vmatmul.mubr.msk.f32.gmra.mrb[10].mxu1 %vm374_vm1, %v10069_v15 }
  0x8d   : > { %8542 = vmatprep.mubr.msk.f32.mxu0 %vm374_vm1, %v10156_v30  ;;  %8640 = vmatprep.mubr.msk.f32.mxu1 %vm374_vm1, %v10085_v17 }
  0x90   : > { %8543 = vmatmul.mubr.msk.f32.gmra.mrb[4].mxu0 %vm374_vm1, %v10159_v31  ;;  %8641 = vmatmul.mubr.msk.f32.gmra.mrb[12].mxu1 %vm374_vm1, %v10091_v19 }
  0x91   : > { %8545 = vmatprep.mubr.msk.f32.mxu0 %vm374_vm1, %v10170_v32  ;;  %8643 = vmatprep.mubr.msk.f32.mxu1 %vm374_vm1, %v10105_v21 }
  0x94   : > { %8546 = vmatmul.mubr.msk.f32.gmra.mrb[6].mxu0 %vm374_vm1, %v10548_v37  ;;  %8644 = vmatmul.mubr.msk.f32.gmra.mrb[14].mxu1 %vm374_vm1, %v10500_v11  ;;  %v7470_v11 = vld [vmem:[%s11593_s1 + $0x8] sm:$0xf] }
  0x95   : > { %8648 = vmatprep.mubr.msk.f32.mxu1 %vm374_vm1, %v10118_v24  ;;  %8676 = vmatprep.mubr.msk.f32.mxu0 %vm374_vm1, %v10239_v43 }
  0x98   : > { %8649 = vmatmul.mubr.msk.f32.vlgmr.msra.gmra.mrb[8].mxu1 %vm374_vm1, %v10121_v25  ;;  %8677 = vmatmul.mubr.msk.f32.vlgmr.msra.gmra.mrb[8].mxu0 %vm374_vm1, %v10250_v45 }
  0x99   : > { %8661 = vmatpush3.msk.msra.mxu1 %vm399_vm0, %v7416_v1  ;;  %8689 = vmatpush3.msk.msra.mxu0 %vm399_vm0, %v3091_v12  ;;  %v4450_v1 = vld [vmem:[%s11593_s1] sm:$0xf]  ;;  %v7488_v12 = vld [vmem:[%s11593_s1 + $0xc] sm:$0xf] }
  0x9a   : > { %8651 = vmatprep.mubr.msk.f32.mxu1 %vm374_vm1, %v10136_v28  ;;  %8679 = vmatprep.mubr.msk.f32.mxu0 %vm374_vm1, %v10256_v47 }
  0x9b   : > { %8800 = vmatprep.subr.msk.mxu1 %vm399_vm0, %v7605_v44  ;;  %8702 = vmatprep.subr.msk.mxu0 %vm399_vm0, %v7470_v11 }
  0x9c   : > { %8652 = vmatmul.mubr.msk.f32.gmra.mrb[10].mxu1 %vm374_vm1, %v10143_v29  ;;  %8680 = vmatmul.mubr.msk.f32.gmra.mrb[10].mxu0 %vm374_vm1, %v10274_v51 }
  0x9d   : > { %8654 = vmatprep.mubr.msk.f32.mxu1 %vm374_vm1, %v10156_v30  ;;  %8682 = vmatprep.mubr.msk.f32.mxu0 %vm374_vm1, %v10284_v53 }
  0xa0   : > { %8655 = vmatmul.mubr.msk.f32.gmra.mrb[12].mxu1 %vm374_vm1, %v10159_v31  ;;  %8683 = vmatmul.mubr.msk.f32.gmra.mrb[12].mxu0 %vm374_vm1, %v10300_v55 }
  0xa1   : > { %8657 = vmatprep.mubr.msk.f32.mxu1 %vm374_vm1, %v10170_v32  ;;  %8685 = vmatprep.mubr.msk.f32.mxu0 %vm374_vm1, %v10306_v57 }
  0xa4   : > { %8658 = vmatmul.mubr.msk.f32.gmra.mrb[14].mxu1 %vm374_vm1, %v10548_v37  ;;  %8686 = vmatmul.mubr.msk.f32.gmra.mrb[14].mxu0 %vm374_vm1, %v10320_v59 }
  0xa5   : > { %8662 = vmatprep.mubr.msk.f32.mxu1 %vm374_vm1, %v10253_v46  ;;  %8690 = vmatprep.mubr.msk.f32.mxu0 %vm374_vm1, %v10173_v33  ;;  %v10635_v33 = vld [vmem:[%s10025_s16 + $0x111] sm:$0xff] }
  0xa8   : > { %8663 = vmatmul.mubr.msk.f32.vlgmr.msra.gmra.mrb[8].mxu1 %vm374_vm1, %v10259_v48  ;;  %8691 = vmatmul.mubr.msk.f32.vlgmr.msra.gmra.mrb[8].mxu0 %vm374_vm1, %v10184_v34 }
  0xa9   : > { %8801 = vmatpush3.msk.msra.mxu1 %vm399_vm0, %v7605_v44  ;;  %8703 = vmatpush3.msk.msra.mxu0 %vm399_vm0, %v7470_v11  ;;  %v7632_v11 = vld [vmem:[%s11593_s1 + $0x8] sm:$0xf]  ;;  %v7506_v44 = vld [vmem:[%s11593_s1 + $0x10] sm:$0xf] }
  0xaa   : > { %8665 = vmatprep.mubr.msk.f32.mxu1 %vm374_vm1, %v10277_v52  ;;  %8693 = vmatprep.mubr.msk.f32.mxu0 %vm374_vm1, %v10187_v35 }
  0xab   : > { %8814 = vmatprep.subr.msk.mxu1 %vm399_vm0, %v4450_v1  ;;  %8716 = vmatprep.subr.msk.mxu0 %vm399_vm0, %v7488_v12 }
  0xac   : > { %8666 = vmatmul.mubr.msk.f32.gmra.mrb[10].mxu1 %vm374_vm1, %v10287_v54  ;;  %8694 = vmatmul.mubr.msk.f32.gmra.mrb[10].mxu0 %vm374_vm1, %v10202_v38 }
  0xad   : > { %8668 = vmatprep.mubr.msk.f32.mxu1 %vm374_vm1, %v10303_v56  ;;  %8696 = vmatprep.mubr.msk.f32.mxu0 %vm374_vm1, %v10209_v39 }
  0xb0   : > { %8669 = vmatmul.mubr.msk.f32.gmra.mrb[12].mxu1 %vm374_vm1, %v10309_v58  ;;  %8697 = vmatmul.mubr.msk.f32.gmra.mrb[12].mxu0 %vm374_vm1, %v10222_v40 }
  0xb1   : > { %8671 = vmatprep.mubr.msk.f32.mxu1 %vm374_vm1, %v10323_v60  ;;  %8699 = vmatprep.mubr.msk.f32.mxu0 %vm374_vm1, %v10225_v41 }
  0xb4   : > { %8672 = vmatmul.mubr.msk.f32.gmra.mrb[14].mxu1 %vm374_vm1, %v10635_v33  ;;  %8700 = vmatmul.mubr.msk.f32.gmra.mrb[14].mxu0 %vm374_vm1, %v10236_v42 }
  0xb5   : > { %8704 = vmatprep.mubr.msk.f32.mxu0 %vm374_vm1, %v10326_v61  ;;  %8802 = vmatprep.mubr.msk.f32.mxu1 %vm374_vm1, %v10326_v61  ;;  %v9949_v61 = vmov 0.0  }
  0xb6   : > { %334 = vst [vmem:[#allocation2 + $0x1a0] sm:$0xff] %v9949_v61  ;;  %282 = vst [vmem:[#allocation2] sm:$0xff] %v9949_v61 }
  0xb7   : > { %283 = vst [vmem:[#allocation2 + $0x8] sm:$0x1] %v9949_v61  ;;  %284 = vst [vmem:[#allocation2 + $0x10] sm:$0xff] %v9949_v61 }
  0xb8   : > { %8705 = vmatmul.mubr.msk.f32.vlgmr.msra.gmra.mrb[8].mxu0 %vm374_vm1, %v10337_v62  ;;  %8803 = vmatmul.mubr.msk.f32.vlgmr.msra.gmra.mrb[16].mxu1 %vm374_vm1, %v10337_v62  ;;  %286 = vst [vmem:[#allocation2 + $0x20] sm:$0xff] %v9949_v61  ;;  %288 = vst [vmem:[#allocation2 + $0x30] sm:$0xff] %v9949_v61 }
  0xb9   : > { %8815 = vmatpush3.msk.msra.mxu1 %vm399_vm0, %v4450_v1  ;;  %8717 = vmatpush3.msk.msra.mxu0 %vm399_vm0, %v7488_v12  ;;  %290 = vst [vmem:[#allocation2 + $0x40] sm:$0xff] %v9949_v61  ;;  %292 = vst [vmem:[#allocation2 + $0x50] sm:$0xff] %v9949_v61 }
  0xba   : > { %8707 = vmatprep.mubr.msk.f32.mxu0 %vm374_vm1, %v10340_v63  ;;  %8805 = vmatprep.mubr.msk.f32.mxu1 %vm374_vm1, %v10340_v63  ;;  %294 = vst [vmem:[#allocation2 + $0x60] sm:$0xff] %v9949_v61  ;;  %296 = vst [vmem:[#allocation2 + $0x70] sm:$0xff] %v9949_v61 }
  0xbb   : > { %8828 = vmatprep.subr.msk.mxu1 %vm399_vm0, %v7632_v11  ;;  %8730 = vmatprep.subr.msk.mxu0 %vm399_vm0, %v7506_v44  ;;  %298 = vst [vmem:[#allocation2 + $0x80] sm:$0xff] %v9949_v61  ;;  %318 = vst [vmem:[#allocation2 + $0x120] sm:$0xff] %v9949_v61 }
  0xbc   : > { %8708 = vmatmul.mubr.msk.f32.gmra.mrb[10].mxu0 %vm374_vm1, %v10355_v2  ;;  %8806 = vmatmul.mubr.msk.f32.gmra.mrb[18].mxu1 %vm374_vm1, %v10355_v2  ;;  %320 = vst [vmem:[#allocation2 + $0x130] sm:$0xff] %v9949_v61  ;;  %322 = vst [vmem:[#allocation2 + $0x140] sm:$0xff] %v9949_v61 }
  0xbd   : > { %8710 = vmatprep.mubr.msk.f32.mxu0 %vm374_vm1, %v10362_v3  ;;  %8808 = vmatprep.mubr.msk.f32.mxu1 %vm374_vm1, %v10362_v3  ;;  %324 = vst [vmem:[#allocation2 + $0x150] sm:$0xff] %v9949_v61  ;;  %326 = vst [vmem:[#allocation2 + $0x160] sm:$0xff] %v9949_v61 }
  0xbe   : > { %328 = vst [vmem:[#allocation2 + $0x170] sm:$0xff] %v9949_v61  ;;  %330 = vst [vmem:[#allocation2 + $0x180] sm:$0xff] %v9949_v61 }
  0xbf   : > { %332 = vst [vmem:[#allocation2 + $0x190] sm:$0xff] %v9949_v61 }
  0xc0   : > { %8711 = vmatmul.mubr.msk.f32.gmra.mrb[12].mxu0 %vm374_vm1, %v10375_v4  ;;  %8809 = vmatmul.mubr.msk.f32.gmra.mrb[20].mxu1 %vm374_vm1, %v10375_v4 }
  0xc1   : > { %8713 = vmatprep.mubr.msk.f32.mxu0 %vm374_vm1, %v10378_v5  ;;  %8811 = vmatprep.mubr.msk.f32.mxu1 %vm374_vm1, %v10378_v5 }
  0xc4   : > { %8714 = vmatmul.mubr.msk.f32.gmra.mrb[14].mxu0 %vm374_vm1, %v10389_v6  ;;  %8812 = vmatmul.mubr.msk.f32.gmra.mrb[22].mxu1 %vm374_vm1, %v10389_v6 }
  0xc5   : > { %8718 = vmatprep.mubr.msk.f32.mxu0 %vm374_vm1, %v10038_v8  ;;  %8816 = vmatprep.mubr.msk.f32.mxu1 %vm374_vm1, %v10239_v43  ;;  %v7650_v8 = vld [vmem:[%s11593_s1 + $0xc] sm:$0xf]  ;;  %v7524_v43 = vld [vmem:[%s11593_s1 + $0x14] sm:$0xf] }
  0xc8   : > { %8719 = vmatmul.mubr.msk.f32.vlgmr.msra.gmra.mrb[8].mxu0 %vm374_vm1, %v10044_v10  ;;  %8817 = vmatmul.mubr.msk.f32.vlgmr.msra.gmra.mrb[16].mxu1 %vm374_vm1, %v10250_v45  ;;  %v7668_v10 = vld [vmem:[%s11593_s1 + $0x10] sm:$0xf] }
  0xc9   : > { %8829 = vmatpush3.msk.msra.mxu1 %vm399_vm0, %v7632_v11  ;;  %8731 = vmatpush3.msk.msra.mxu0 %vm399_vm0, %v7506_v44  ;;  %v7755_v44 = vld [vmem:[%s11595_s3 + $0xa0] sm:$0xff] }
  0xca   : > { %8721 = vmatprep.mubr.msk.f32.mxu0 %vm374_vm1, %v10062_v14  ;;  %8819 = vmatprep.mubr.msk.f32.mxu1 %vm374_vm1, %v10256_v47  ;;  %v7542_v14 = vld [vmem:[%s11593_s1 + $0x18] sm:$0xf] }
  0xcb   : > { %8842 = vmatprep.subr.msk.mxu1 %vm399_vm0, %v7650_v8  ;;  %8744 = vmatprep.subr.msk.mxu0 %vm399_vm0, %v7524_v43 }
  0xcc   : > { %8722 = vmatmul.mubr.msk.f32.gmra.mrb[10].mxu0 %vm374_vm1, %v10072_v16  ;;  %8820 = vmatmul.mubr.msk.f32.gmra.mrb[18].mxu1 %vm374_vm1, %v10274_v51  ;;  %v11609_v16 = vld [vmem:[#allocation4_spill] sm:$0xff] }
  0xcd   : > { %8724 = vmatprep.mubr.msk.f32.mxu0 %vm374_vm1, %v10088_v18  ;;  %8822 = vmatprep.mubr.msk.f32.mxu1 %vm374_vm1, %v10284_v53  ;;  %v11610_v18 = vld [vmem:[#allocation5_spill] sm:$0xff] }
  0xd0   : > { %8725 = vmatmul.mubr.msk.f32.gmra.mrb[12].mxu0 %vm374_vm1, %v10094_v20  ;;  %8823 = vmatmul.mubr.msk.f32.gmra.mrb[20].mxu1 %vm374_vm1, %v10300_v55  ;;  %v11611_v20 = vld [vmem:[#allocation6_spill] sm:$0xff] }
  0xd1   : > { %8727 = vmatprep.mubr.msk.f32.mxu0 %vm374_vm1, %v10108_v22  ;;  %8825 = vmatprep.mubr.msk.f32.mxu1 %vm374_vm1, %v10306_v57  ;;  %v7686_v22 = vld [vmem:[%s11593_s1 + $0x14] sm:$0xf] }
  0xd4   : > { %8728 = vmatmul.mubr.msk.f32.gmra.mrb[14].mxu0 %vm374_vm1, %v10434_v23  ;;  %8826 = vmatmul.mubr.msk.f32.gmra.mrb[22].mxu1 %vm374_vm1, %v10320_v59  ;;  %v7560_v23 = vld [vmem:[%s11593_s1 + $0x1c] sm:$0xf] }
  0xd5   : > { %8732 = vmatprep.mubr.msk.f32.mxu0 %vm374_vm1, %v10032_v7  ;;  %8830 = vmatprep.mubr.msk.f32.mxu1 %vm374_vm1, %v10437_v26 }
  0xd8   : > { %8733 = vmatmul.mubr.msk.f32.vlgmr.msra.gmra.mrb[8].mxu0 %vm374_vm1, %v10041_v9  ;;  %8831 = vmatmul.mubr.msk.f32.vlgmr.msra.gmra.mrb[16].mxu1 %vm374_vm1, %v10448_v27 }
  0xd9   : > { %8843 = vmatpush3.msk.msra.mxu1 %vm399_vm0, %v7650_v8  ;;  %8745 = vmatpush3.msk.msra.mxu0 %vm399_vm0, %v7524_v43  ;;  %v7756_v8 = vld [vmem:[%s11595_s3 + $0xa8] sm:$0xff]  ;;  %v7757_v43 = vld [vmem:[%s11595_s3 + $0xb0] sm:$0xff] }
  0xda   : > { %8735 = vmatprep.mubr.msk.f32.mxu0 %vm374_vm1, %v10059_v13  ;;  %8833 = vmatprep.mubr.msk.f32.mxu1 %vm374_vm1, %v10451_v36 }
  0xdb   : > { %8856 = vmatprep.subr.msk.mxu1 %vm399_vm0, %v7668_v10  ;;  %8758 = vmatprep.subr.msk.mxu0 %vm399_vm0, %v7542_v14 }
  0xdc   : > { %8736 = vmatmul.mubr.msk.f32.gmra.mrb[10].mxu0 %vm374_vm1, %v10069_v15  ;;  %8834 = vmatmul.mubr.msk.f32.gmra.mrb[18].mxu1 %vm374_vm1, %v10466_v49 }
  0xdd   : > { %8738 = vmatprep.mubr.msk.f32.mxu0 %vm374_vm1, %v10085_v17  ;;  %8836 = vmatprep.mubr.msk.f32.mxu1 %vm374_vm1, %v10473_v50 }
  0xe0   : > { %8739 = vmatmul.mubr.msk.f32.gmra.mrb[12].mxu0 %vm374_vm1, %v10091_v19  ;;  %8837 = vmatmul.mubr.msk.f32.gmra.mrb[20].mxu1 %vm374_vm1, %v10486_v0 }
  0xe1   : > { %8741 = vmatprep.mubr.msk.f32.mxu0 %vm374_vm1, %v10105_v21  ;;  %8839 = vmatprep.mubr.msk.f32.mxu1 %vm374_vm1, %v11609_v16 }
  0xe4   : > { %8742 = vmatmul.mubr.msk.f32.gmra.mrb[14].mxu0 %vm374_vm1, %v11610_v18  ;;  %8840 = vmatmul.mubr.msk.f32.gmra.mrb[22].mxu1 %vm374_vm1, %v11611_v20 }
  0xe5   : > { %8746 = vmatprep.mubr.msk.f32.mxu0 %vm374_vm1, %v10118_v24  ;;  %8844 = vmatprep.mubr.msk.f32.mxu1 %vm374_vm1, %v10032_v7 }
  0xe8   : > { %8747 = vmatmul.mubr.msk.f32.vlgmr.msra.gmra.mrb[8].mxu0 %vm374_vm1, %v10121_v25  ;;  %8845 = vmatmul.mubr.msk.f32.vlgmr.msra.gmra.mrb[16].mxu1 %vm374_vm1, %v10041_v9 }
  0xe9   : > { %8857 = vmatpush3.msk.msra.mxu1 %vm399_vm0, %v7668_v10  ;;  %8759 = vmatpush3.msk.msra.mxu0 %vm399_vm0, %v7542_v14  ;;  %v7758_v10 = vld [vmem:[%s11595_s3 + $0xb8] sm:$0xff]  ;;  %v7760_v14 = vld [vmem:[%s11595_s3 + $0xc8] sm:$0xff] }
  0xea   : > { %8749 = vmatprep.mubr.msk.f32.mxu0 %vm374_vm1, %v10136_v28  ;;  %8847 = vmatprep.mubr.msk.f32.mxu1 %vm374_vm1, %v10059_v13 }
  0xeb   : > { %v10806_v7 = vpop.f32.mrb[0].mxu1  ;;  %8870 = vmatprep.subr.msk.mxu1 %vm399_vm0, %v7686_v22  ;;  %8772 = vmatprep.subr.msk.mxu0 %vm399_vm0, %v7560_v23 }
  0xec   : > { %v10810_v9 = vpop.f32.mrb[1].mxu1  ;;  %8750 = vmatmul.mubr.msk.f32.gmra.mrb[10].mxu0 %vm374_vm1, %v10143_v29  ;;  %8848 = vmatmul.mubr.msk.f32.gmra.mrb[18].mxu1 %vm374_vm1, %v10069_v15 }
  0xed   : > { %8752 = vmatprep.mubr.msk.f32.mxu0 %vm374_vm1, %v10156_v30  ;;  %8850 = vmatprep.mubr.msk.f32.mxu1 %vm374_vm1, %v10085_v17 }
  0xef   : > { %v10820_v13 = vpop.f32.mrb[2].mxu1 }
  0xf0   : > { %v10822_v26 = vpop.f32.mrb[3].mxu1  ;;  %8753 = vmatmul.mubr.msk.f32.gmra.mrb[12].mxu0 %vm374_vm1, %v10159_v31  ;;  %8851 = vmatmul.mubr.msk.f32.gmra.mrb[20].mxu1 %vm374_vm1, %v10091_v19 }
  0xf1   : > { %8755 = vmatprep.mubr.msk.f32.mxu0 %vm374_vm1, %v10170_v32  ;;  %8853 = vmatprep.mubr.msk.f32.mxu1 %vm374_vm1, %v10105_v21  ;;  %v7704_v21 = vld [vmem:[%s11593_s1 + $0x18] sm:$0xf] }
  0xf3   : > { %v10832_v15 = vpop.f32.mrb[4].mxu1 }
  0xf4   : > { %v10834_v1 = vpop.f32.mrb[5].mxu1  ;;  %8756 = vmatmul.mubr.msk.f32.gmra.mrb[14].mxu0 %vm374_vm1, %v10548_v37  ;;  %8854 = vmatmul.mubr.msk.f32.gmra.mrb[22].mxu1 %vm374_vm1, %v11610_v18 }
  0xf5   : > { %8760 = vmatprep.mubr.msk.f32.mxu0 %vm374_vm1, %v10184_v34  ;;  %8858 = vmatprep.mubr.msk.f32.mxu1 %vm374_vm1, %v10118_v24  ;;  %v7578_v34 = vld [vmem:[%s11593_s1 + $0x20] sm:$0xf] }
  0xf6   : > { %v7541_v24 = vld [vmem:[%s10025_s16 + $0x1a0] sm:$0xff] }
  0xf7   : > { %v10844_v17 = vpop.f32.mrb[6].mxu1 }
  0xf8   : > { %v10846_v19 = vpop.f32.mrb[7].mxu1  ;;  %8761 = vmatmul.mubr.msk.f32.vlgmr.msra.gmra.mrb[8].mxu0 %vm374_vm1, %v10187_v35  ;;  %8859 = vmatmul.mubr.msk.f32.vlgmr.msra.gmra.mrb[16].mxu1 %vm374_vm1, %v10121_v25  ;;  %v7799_v25 = vld [vmem:[%s11595_s3 + $0x200] sm:$0xff]  ;;  %v7801_v35 = vld [vmem:[%s11595_s3 + $0x210] sm:$0xff] }
  0xf9   : > { %8871 = vmatpush3.msk.msra.mxu1 %vm399_vm0, %v7686_v22  ;;  %8773 = vmatpush3.msk.msra.mxu0 %vm399_vm0, %v7560_v23  ;;  %v11083_v22 = vld [vmem:[%s11594_s2] ss:$0 sm:$0xff] }
  0xfa   : > { %8763 = vmatprep.mubr.msk.f32.mxu0 %vm374_vm1, %v10202_v38  ;;  %8861 = vmatprep.mubr.msk.f32.mxu1 %vm374_vm1, %v10136_v28  ;;  %v7800_v28 = vld [vmem:[%s11595_s3 + $0x208] sm:$0xff]  ;;  %v7802_v38 = vld [vmem:[%s11595_s3 + $0x218] sm:$0xff] }
  0xfb   : > { %8884 = vmatprep.subr.msk.mxu1 %vm399_vm0, %v7704_v21  ;;  %8786 = vmatprep.subr.msk.mxu0 %vm399_vm0, %v7578_v34 }
  0xfc   : > { %8764 = vmatmul.mubr.msk.f32.gmra.mrb[10].mxu0 %vm374_vm1, %v10209_v39  ;;  %8862 = vmatmul.mubr.msk.f32.gmra.mrb[18].mxu1 %vm374_vm1, %v10143_v29  ;;  %v9450_v29 = vpack.c.bf16 %v7800_v28, %v7799_v25  ;;  %v9454_v39 = vpack.c.bf16 %v7802_v38, %v7801_v35  ;;  %v7818_v25 = vld [vmem:[%s11595_s3 + $0x298] sm:$0xff]  ;;  %v7819_v35 = vld [vmem:[%s11595_s3 + $0x2a0] sm:$0xff] }
  0xfd   : > { %8766 = vmatprep.mubr.msk.f32.mxu0 %vm374_vm1, %v10222_v40  ;;  %8864 = vmatprep.mubr.msk.f32.mxu1 %vm374_vm1, %v10156_v30  ;;  %v7722_v30 = vld [vmem:[%s11593_s1 + $0x1c] sm:$0xf]  ;;  %v7803_v40 = vld [vmem:[%s11595_s3 + $0x220] sm:$0xff] }
 0x100   : > { %8767 = vmatmul.mubr.msk.f32.gmra.mrb[12].mxu0 %vm374_vm1, %v10225_v41  ;;  %8865 = vmatmul.mubr.msk.f32.gmra.mrb[20].mxu1 %vm374_vm1, %v10159_v31  ;;  %v7559_v31 = vld [vmem:[%s10025_s16 + $0x230] sm:$0xff]  ;;  %v7804_v41 = vld [vmem:[%s11595_s3 + $0x228] sm:$0xff] }
 0x101   : > { %8769 = vmatprep.mubr.msk.f32.mxu0 %vm374_vm1, %v10236_v42  ;;  %8867 = vmatprep.mubr.msk.f32.mxu1 %vm374_vm1, %v10170_v32  ;;  %v7740_v32 = vld [vmem:[%s11593_s1 + $0x20] sm:$0xf]  ;;  %v9458_v42 = vpack.c.bf16 %v7804_v41, %v7803_v40  ;;  %v7820_v40 = vld [vmem:[%s11595_s3 + $0x2a8] sm:$0xff] }
 0x104   : > { %8770 = vmatmul.mubr.msk.f32.gmra.mrb[14].mxu0 %vm374_vm1, %v7541_v24  ;;  %8868 = vmatmul.mubr.msk.f32.gmra.mrb[22].mxu1 %vm374_vm1, %v10548_v37  ;;  %v7814_v37 = vld [vmem:[%s11595_s3 + $0x278] sm:$0xff] }
 0x105   : > { %8774 = vmatprep.mubr.msk.f32.mxu0 %vm374_vm1, %v10250_v45  ;;  %8872 = vmatprep.mubr.msk.f32.mxu1 %vm374_vm1, %v10253_v46  ;;  %v7806_v46 = vld [vmem:[%s11595_s3 + $0x238] sm:$0xff] }
 0x108   : > { %8775 = vmatmul.mubr.msk.f32.vlgmr.msra.gmra.mrb[8].mxu0 %vm374_vm1, %v10256_v47  ;;  %8873 = vmatmul.mubr.msk.f32.vlgmr.msra.gmra.mrb[16].mxu1 %vm374_vm1, %v10259_v48 }
 0x109   : > { %8885 = vmatpush3.msk.msra.mxu1 %vm399_vm0, %v7704_v21  ;;  %8787 = vmatpush3.msk.msra.mxu0 %vm399_vm0, %v7578_v34 }
 0x10a   : > { %8777 = vmatprep.mubr.msk.f32.mxu0 %vm374_vm1, %v10274_v51  ;;  %8875 = vmatprep.mubr.msk.f32.mxu1 %vm374_vm1, %v10277_v52  ;;  %v7808_v52 = vld [vmem:[%s11595_s3 + $0x248] sm:$0xff] }
 0x10b   : > { %8898 = vmatprep.subr.msk.mxu1 %vm399_vm0, %v7722_v30  ;;  %9451 = vmatprep.subr.bf16.mxu0 %v9450_v29 }
 0x10c   : > { %8778 = vmatmul.mubr.msk.f32.gmra.mrb[10].mxu0 %vm374_vm1, %v10284_v53  ;;  %8876 = vmatmul.mubr.msk.f32.gmra.mrb[18].mxu1 %vm374_vm1, %v10287_v54  ;;  %v7752_v54 = vld [vmem:[%s11595_s3 + $0x88] sm:$0xff] }
 0x10d   : > { %8780 = vmatprep.mubr.msk.f32.mxu0 %vm374_vm1, %v10300_v55  ;;  %8878 = vmatprep.mubr.msk.f32.mxu1 %vm374_vm1, %v10303_v56  ;;  %v7809_v56 = vld [vmem:[%s11595_s3 + $0x250] sm:$0xff] }
 0x110   : > { %8781 = vmatmul.mubr.msk.f32.gmra.mrb[12].mxu0 %vm374_vm1, %v10306_v57  ;;  %8879 = vmatmul.mubr.msk.f32.gmra.mrb[20].mxu1 %vm374_vm1, %v10309_v58 }
 0x111   : > { %8783 = vmatprep.mubr.msk.f32.mxu0 %vm374_vm1, %v10320_v59  ;;  %8881 = vmatprep.mubr.msk.f32.mxu1 %vm374_vm1, %v10323_v60  ;;  %v7811_v60 = vld [vmem:[%s11595_s3 + $0x260] sm:$0xff] }
 0x114   : > { %8784 = vmatmul.mubr.msk.f32.gmra.mrb[14].mxu0 %vm374_vm1, %v7559_v31  ;;  %8882 = vmatmul.mubr.msk.f32.gmra.mrb[22].mxu1 %vm374_vm1, %v10635_v33  ;;  %v7753_v33 = vld [vmem:[%s11595_s3 + $0x90] sm:$0xff] }
 0x115   : > { %8788 = vmatprep.mubr.msk.f32.mxu0 %vm374_vm1, %v10337_v62  ;;  %8886 = vmatprep.mubr.msk.f32.mxu1 %vm374_vm1, %v10250_v45  ;;  %v7805_v45 = vld [vmem:[%s11595_s3 + $0x230] sm:$0xff] }
 0x116   : > { %v9462_v48 = vpack.c.bf16 %v7806_v46, %v7805_v45 }
 0x118   : > { %8789 = vmatmul.mubr.msk.f32.vlgmr.msra.gmra.mrb[8].mxu0 %vm374_vm1, %v10340_v63  ;;  %8887 = vmatmul.mubr.msk.f32.vlgmr.msra.gmra.mrb[16].mxu1 %vm374_vm1, %v10256_v47  ;;  %v7577_v47 = vld [vmem:[%s10025_s16 + $0x1a1] sm:$0xff] }
 0x119   : > { %8899 = vmatpush3.msk.msra.mxu1 %vm399_vm0, %v7722_v30  ;;  %8791 = vmatprep.mubr.msk.f32.mxu0 %vm374_vm1, %v10355_v2 }
 0x11a   : > { %8889 = vmatprep.mubr.msk.f32.mxu1 %vm374_vm1, %v10274_v51  ;;  %8912 = vmatprep.subr.msk.mxu1 %vm399_vm0, %v7740_v32  ;;  %v7807_v51 = vld [vmem:[%s11595_s3 + $0x240] sm:$0xff] }
 0x11b   : > { %9453 = vmatpush3.bf16.msra.mxu0 %v9450_v29 }
 0x11c   : > { %8792 = vmatmul.mubr.msk.f32.gmra.mrb[10].mxu0 %vm374_vm1, %v10362_v3  ;;  %8890 = vmatmul.mubr.msk.f32.gmra.mrb[18].mxu1 %vm374_vm1, %v10284_v53  ;;  %v7751_v53 = vld [vmem:[%s11595_s3 + $0x80] sm:$0xff] }
 0x11d   : > { %8794 = vmatprep.mubr.msk.f32.mxu0 %vm374_vm1, %v10375_v4  ;;  %8892 = vmatprep.mubr.msk.f32.mxu1 %vm374_vm1, %v10300_v55  ;;  %v9466_v55 = vpack.c.bf16 %v7808_v52, %v7807_v51  ;;  %v9322_v58 = vpack.c.bf16 %v7752_v54, %v7751_v53  ;;  %v9490_v52 = vpack.c.bf16 %v7820_v40, %v7819_v35  ;;  %v7821_v53 = vld [vmem:[%s11595_s3 + $0x2b0] sm:$0xff] }
 0x11e   : > { %9455 = vmatprep.subr.bf16.mxu0 %v9454_v39 }
 0x11f   : > { %9457 = vmatpush3.bf16.msra.mxu0 %v9454_v39 }
 0x120   : > { %8795 = vmatmul.mubr.msk.f32.gmra.mrb[12].mxu0 %vm374_vm1, %v10378_v5  ;;  %8893 = vmatmul.mubr.msk.f32.gmra.mrb[20].mxu1 %vm374_vm1, %v10306_v57  ;;  %v7810_v57 = vld [vmem:[%s11595_s3 + $0x258] sm:$0xff] }
 0x121   : > { %8797 = vmatprep.mubr.msk.f32.mxu0 %vm374_vm1, %v10389_v6  ;;  %8895 = vmatprep.mubr.msk.f32.mxu1 %vm374_vm1, %v10320_v59  ;;  %v9470_v59 = vpack.c.bf16 %v7810_v57, %v7809_v56  ;;  %v7764_v56 = vld [vmem:[%s11595_s3 + $0xe8] sm:$0xff] }
 0x122   : > { %9459 = vmatprep.subr.bf16.mxu0 %v9458_v42 }
 0x123   : > { %9461 = vmatpush3.bf16.msra.mxu0 %v9458_v42 }
 0x124   : > { %8798 = vmatmul.mubr.msk.f32.gmra.mrb[14].mxu0 %vm374_vm1, %v7577_v47  ;;  %8896 = vmatmul.mubr.msk.f32.gmra.mrb[22].mxu1 %vm374_vm1, %v7559_v31 }
 0x125   : > { %8900 = vmatprep.mubr.msk.f32.mxu1 %vm374_vm1, %v10337_v62  ;;  %9463 = vmatprep.subr.bf16.mxu0 %v9462_v48  ;;  %v7812_v62 = vld [vmem:[%s11595_s3 + $0x268] sm:$0xff] }
 0x127   : > { %9465 = vmatpush3.bf16.msra.mxu0 %v9462_v48 }
 0x128   : > { %8901 = vmatmul.mubr.msk.f32.vlgmr.msra.gmra.mrb[16].mxu1 %vm374_vm1, %v10340_v63  ;;  %9467 = vmatprep.subr.bf16.mxu0 %v9466_v55  ;;  %v9474_v63 = vpack.c.bf16 %v7812_v62, %v7811_v60 }
 0x129   : > { %8913 = vmatpush3.msk.msra.mxu1 %vm399_vm0, %v7740_v32  ;;  %8903 = vmatprep.mubr.msk.f32.mxu1 %vm374_vm1, %v10355_v2  ;;  %v7813_v2 = vld [vmem:[%s11595_s3 + $0x270] sm:$0xff] }
 0x12a   : > { %9323 = vmatprep.subr.bf16.mxu1 %v9322_v58  ;;  %v9478_v12 = vpack.c.bf16 %v7814_v37, %v7813_v2 }
 0x12b   : > { %9469 = vmatpush3.bf16.msra.mxu0 %v9466_v55  ;;  %v7822_v55 = vld [vmem:[%s11595_s3 + $0x2b8] sm:$0xff] }
 0x12c   : > { %8904 = vmatmul.mubr.msk.f32.gmra.mrb[18].mxu1 %vm374_vm1, %v10362_v3  ;;  %9471 = vmatprep.subr.bf16.mxu0 %v9470_v59  ;;  %v7815_v3 = vld [vmem:[%s11595_s3 + $0x280] sm:$0xff]  ;;  %v9494_v37 = vpack.c.bf16 %v7822_v55, %v7821_v53  ;;  %v7837_v53 = vld [vmem:[%s11595_s3 + $0x330] sm:$0xff] }
 0x12d   : > { %8906 = vmatprep.mubr.msk.f32.mxu1 %vm374_vm1, %v10375_v4  ;;  %v7816_v4 = vld [vmem:[%s11595_s3 + $0x288] sm:$0xff] }
 0x12f   : > { %9473 = vmatpush3.bf16.msra.mxu0 %v9470_v59 }
 0x130   : > { %8907 = vmatmul.mubr.msk.f32.gmra.mrb[20].mxu1 %vm374_vm1, %v10378_v5  ;;  %9475 = vmatprep.subr.bf16.mxu0 %v9474_v63  ;;  %v7754_v5 = vld [vmem:[%s11595_s3 + $0x98] sm:$0xff] }
 0x131   : > { %8909 = vmatprep.mubr.msk.f32.mxu1 %vm374_vm1, %v10389_v6  ;;  %v11042_v6 = vpack.c.bf16 %v7816_v4, %v7815_v3  ;;  %v9326_v11 = vpack.c.bf16 %v7754_v5, %v7753_v33  ;;  %v7766_v4 = vld [vmem:[%s11595_s3 + $0xf8] sm:$0xff] }
 0x133   : > { %9477 = vmatpush3.bf16.msra.mxu0 %v9474_v63 }
 0x134   : > { %8910 = vmatmul.mubr.msk.f32.gmra.mrb[22].mxu1 %vm374_vm1, %v7577_v47  ;;  %9479 = vmatprep.subr.bf16.mxu0 %v9478_v12 }
 0x135   : > { %8914 = vmatprep.mubr.msk.f32.mxu1 %vm374_vm1, %v10448_v27  ;;  %v9330_v27 = vpack.c.bf16 %v7756_v8, %v7755_v44  ;;  %v7825_v44 = vld [vmem:[%s11595_s3 + $0x2d0] sm:$0xff]  ;;  %v7826_v8 = vld [vmem:[%s11595_s3 + $0x2d8] sm:$0xff] }
 0x137   : > { %9481 = vmatpush3.bf16.msra.mxu0 %v9478_v12  ;;  %v7823_v12 = vld [vmem:[%s11595_s3 + $0x2c0] sm:$0xff] }
 0x138   : > { %8915 = vmatmul.mubr.msk.f32.vlgmr.msra.gmra.mrb[16].mxu1 %vm374_vm1, %v10451_v36  ;;  %9483 = vmatprep.subr.bf16.mxu0 %v11042_v6  ;;  %v9334_v36 = vpack.c.bf16 %v7758_v10, %v7757_v43  ;;  %v7827_v43 = vld [vmem:[%s11595_s3 + $0x2e0] sm:$0xff]  ;;  %v7828_v10 = vld [vmem:[%s11595_s3 + $0x2e8] sm:$0xff] }
 0x139   : > { %8917 = vmatprep.mubr.msk.f32.mxu1 %vm374_vm1, %v10466_v49  ;;  %9325 = vmatpush3.bf16.msra.mxu1 %v9322_v58  ;;  %v7759_v49 = vld [vmem:[%s11595_s3 + $0xc0] sm:$0xff] }
 0x13a   : > { %9327 = vmatprep.subr.bf16.mxu1 %v9326_v11 }
 0x13c   : > { %8918 = vmatmul.mubr.msk.f32.gmra.mrb[18].mxu1 %vm374_vm1, %v10473_v50  ;;  %v7739_v50 = vld [vmem:[%s10025_s16 + $0x231] sm:$0xff] }
 0x13d   : > { %8920 = vmatprep.mubr.msk.f32.mxu1 %vm374_vm1, %v10486_v0  ;;  %9329 = vmatpush3.bf16.msra.mxu1 %v9326_v11  ;;  %v9338_v0 = vpack.c.bf16 %v7760_v14, %v7759_v49  ;;  %v5807_v49 = vld [vmem:[%s11595_s3] sm:$0xff]  ;;  %v5808_v14 = vld [vmem:[%s11595_s3 + $0x8] sm:$0xff] }
 0x13e   : > { %9331 = vmatprep.subr.bf16.mxu1 %v9330_v27 }
 0x140   : > { %8921 = vmatmul.mubr.msk.f32.gmra.mrb[20].mxu1 %vm374_vm1, %v11609_v16 }
 0x141   : > { %8923 = vmatprep.mubr.msk.f32.mxu1 %vm374_vm1, %v11611_v20  ;;  %9333 = vmatpush3.bf16.msra.mxu1 %v9330_v27  ;;  %v9502_v27 = vpack.c.bf16 %v7826_v8, %v7825_v44 }
 0x142   : > { %9335 = vmatprep.subr.bf16.mxu1 %v9334_v36 }
 0x144   : > { %8924 = vmatmul.mubr.msk.f32.gmra.mrb[22].mxu1 %vm374_vm1, %v7739_v50  ;;  %v7829_v50 = vld [vmem:[%s11595_s3 + $0x2f0] sm:$0xff] }
 0x145   : > { %9337 = vmatpush3.bf16.msra.mxu1 %v9334_v36  ;;  %8958 = vmatprep.mubr.f32.mxu1 %v9949_v61  ;;  %v7817_v61 = vld [vmem:[%s11595_s3 + $0x290] sm:$0xff]  ;;  %v9506_v36 = vpack.c.bf16 %v7828_v10, %v7827_v43  ;;  %v5810_v10 = vld [vmem:[%s11595_s3 + $0x18] sm:$0xff] }
 0x146   : > { %9339 = vmatprep.subr.bf16.mxu1 %v9338_v0  ;;  %v9486_v32 = vpack.c.bf16 %v7818_v25, %v7817_v61  ;;  %v5809_v43 = vld [vmem:[%s11595_s3 + $0x10] sm:$0xff] }
 0x149   : > { %9341 = vmatpush3.bf16.msra.mxu1 %v9338_v0  ;;  %v7830_v0 = vld [vmem:[%s11595_s3 + $0x2f8] sm:$0xff] }
 0x15b   : > { %v8538_v18 = vpop.f32.mrb[0].mxu0 }
 0x15c   : > { %v9610_v16 = vadd.f32 %v8538_v18, %v10806_v7  ;;  %v1647_v20 = vpop.f32.mrb[1].mxu0  ;;  %v11168_v18 = vpack.c.bf16 %v5808_v14, %v5807_v49 }
 0x15d   : > { %v9611_v23 = vadd.f32 %v1647_v20, %v10810_v9 }
 0x15e   : > { %v1702_v21 = vadd.f32 %v9610_v16, %v11083_v22  ;;  %v9510_v16 = vpack.c.bf16 %v7830_v0, %v7829_v50  ;;  %v9358_v0 = vpack.c.bf16 %v5810_v10, %v5809_v43  ;;  %v7769_v43 = vld [vmem:[%s11595_s3 + $0x110] sm:$0xff]  ;;  %v7770_v10 = vld [vmem:[%s11595_s3 + $0x118] sm:$0xff] }
 0x15f   : > { %v1701_v34 = vadd.f32 %v9611_v23, %v11083_v22  ;;  %v8541_v24 = vpop.f32.mrb[2].mxu0  ;;  %v7831_v23 = vld [vmem:[%s11595_s3 + $0x300] sm:$0xff] }
 0x160   : > { %v1710_v28 = vmax.f32 %v1702_v21, 0.0  ;;  %v9612_v29 = vadd.f32 %v8541_v24, %v10820_v13  ;;  %v1657_v7 = vpop.f32.mrb[3].mxu0  ;;  %v7761_v13 = vld [vmem:[%s11595_s3 + $0xd0] sm:$0xff]  ;;  %v7832_v21 = vld [vmem:[%s11595_s3 + $0x308] sm:$0xff] }
 0x161   : > { %v1709_v30 = vmax.f32 %v1701_v34, 0.0  ;;  %v9613_v9 = vadd.f32 %v1657_v7, %v10822_v26  ;;  %v7762_v26 = vld [vmem:[%s11595_s3 + $0xd8] sm:$0xff] }
 0x162   : > { %v1704_v31 = vadd.f32 %v9612_v29, %v11083_v22  ;;  %v9342_v46 = vpack.c.bf16 %v7762_v26, %v7761_v13  ;;  %v7835_v26 = vld [vmem:[%s11595_s3 + $0x320] sm:$0xff] }
 0x163   : > { %v1703_v38 = vadd.f32 %v9613_v9, %v11083_v22  ;;  %v8544_v39 = vpop.f32.mrb[4].mxu0  ;;  %9134 = vmatprep.mubr.f32.mxu0 %v1709_v30  ;;  %v7833_v30 = vld [vmem:[%s11595_s3 + $0x310] sm:$0xff]  ;;  %v7834_v9 = vld [vmem:[%s11595_s3 + $0x318] sm:$0xff] }
 0x164   : > { %v1712_v41 = vmax.f32 %v1704_v31, 0.0  ;;  %v9614_v42 = vadd.f32 %v8544_v39, %v10832_v15  ;;  %v1667_v45 = vpop.f32.mrb[5].mxu0  ;;  %9135 = vmatmul.mubr.f32.vlgmr.msra.gmra.mrb[16].mxu0 %v1710_v28  ;;  %9343 = vmatprep.subr.bf16.mxu1 %v9342_v46  ;;  %v9514_v28 = vpack.c.bf16 %v7832_v21, %v7831_v23  ;;  %v9518_v39 = vpack.c.bf16 %v7834_v9, %v7833_v30  ;;  %v5811_v23 = vld [vmem:[%s11595_s3 + $0x20] sm:$0xff]  ;;  %v5812_v21 = vld [vmem:[%s11595_s3 + $0x28] sm:$0xff]  ;;  %v5813_v30 = vld [vmem:[%s11595_s3 + $0x30] sm:$0xff] }
 0x165   : > { %v1711_v47 = vmax.f32 %v1703_v38, 0.0  ;;  %v9615_v48 = vadd.f32 %v1667_v45, %v10834_v1  ;;  %9485 = vmatpush3.bf16.msra.mxu0 %v11042_v6  ;;  %9345 = vmatpush3.bf16.msra.mxu1 %v9342_v46  ;;  %v7763_v1 = vld [vmem:[%s11595_s3 + $0xe0] sm:$0xff] }
 0x166   : > { %v1706_v51 = vadd.f32 %v9614_v42, %v11083_v22  ;;  %9487 = vmatprep.subr.bf16.mxu0 %v9486_v32  ;;  %v9346_v60 = vpack.c.bf16 %v7764_v56, %v7763_v1 }
 0x167   : > { %v1705_v54 = vadd.f32 %v9615_v48, %v11083_v22  ;;  %v8547_v15 = vpop.f32.mrb[6].mxu0  ;;  %9137 = vmatprep.mubr.f32.mxu0 %v1711_v47 }
 0x168   : > { %v1714_v57 = vmax.f32 %v1706_v51, 0.0  ;;  %v9616_v58 = vadd.f32 %v8547_v15, %v10844_v17  ;;  %v1677_v59 = vpop.f32.mrb[7].mxu0  ;;  %9138 = vmatmul.mubr.f32.gmra.mrb[18].mxu0 %v1712_v41  ;;  %9347 = vmatprep.subr.bf16.mxu1 %v9346_v60  ;;  %v7824_v17 = vld [vmem:[%s11595_s3 + $0x2c8] sm:$0xff] }
 0x169   : > { %v1713_v62 = vmax.f32 %v1705_v54, 0.0  ;;  %v9617_v63 = vadd.f32 %v1677_v59, %v10846_v19  ;;  %9489 = vmatpush3.bf16.msra.mxu0 %v9486_v32  ;;  %9349 = vmatpush3.bf16.msra.mxu1 %v9346_v60  ;;  %v7765_v19 = vld [vmem:[%s11595_s3 + $0xf0] sm:$0xff]  ;;  %v9498_v11 = vpack.c.bf16 %v7824_v17, %v7823_v12  ;;  %v7836_v41 = vld [vmem:[%s11595_s3 + $0x328] sm:$0xff]  ;;  %v7838_v54 = vld [vmem:[%s11595_s3 + $0x338] sm:$0xff] }
 0x16a   : > { %v1708_v2 = vadd.f32 %v9616_v58, %v11083_v22  ;;  %9491 = vmatprep.subr.bf16.mxu0 %v9490_v52  ;;  %v9350_v5 = vpack.c.bf16 %v7766_v4, %v7765_v19  ;;  %v9522_v48 = vpack.c.bf16 %v7836_v41, %v7835_v26  ;;  %v7839_v59 = vld [vmem:[%s11595_s3 + $0x340] sm:$0xff]  ;;  %v7840_v60 = vld [vmem:[%s11595_s3 + $0x348] sm:$0xff]  ;;  %v7845_v19 = vld [vmem:[%s11595_s3 + $0x370] sm:$0xff] }
 0x16b   : > { %v1707_v3 = vadd.f32 %v9617_v63, %v11083_v22  ;;  %9140 = vmatprep.mubr.f32.mxu0 %v1713_v62  ;;  %v9530_v62 = vpack.c.bf16 %v7840_v60, %v7839_v59  ;;  %v7841_v63 = vld [vmem:[%s11595_s3 + $0x350] sm:$0xff]  ;;  %v7843_v12 = vld [vmem:[%s11595_s3 + $0x360] sm:$0xff]  ;;  %v7846_v4 = vld [vmem:[%s11595_s3 + $0x378] sm:$0xff] }
 0x16c   : > { %v1716_v33 = vmax.f32 %v1708_v2, 0.0  ;;  %9141 = vmatmul.mubr.f32.gmra.mrb[20].mxu0 %v1714_v57  ;;  %9351 = vmatprep.subr.bf16.mxu1 %v9350_v5  ;;  %v9526_v57 = vpack.c.bf16 %v7838_v54, %v7837_v53  ;;  %v7842_v2 = vld [vmem:[%s11595_s3 + $0x358] sm:$0xff]  ;;  %v5816_v26 = vld [vmem:[%s11595_s3 + $0x48] sm:$0xff]  ;;  %v5819_v53 = vld [vmem:[%s11595_s3 + $0x60] sm:$0xff] }
 0x16d   : > { %v1715_v6 = vmax.f32 %v1707_v3, 0.0  ;;  %9493 = vmatpush3.bf16.msra.mxu0 %v9490_v52  ;;  %9353 = vmatpush3.bf16.msra.mxu1 %v9350_v5  ;;  %v7844_v3 = vld [vmem:[%s11595_s3 + $0x368] sm:$0xff]  ;;  %v7847_v5 = vld [vmem:[%s11595_s3 + $0x380] sm:$0xff] }
 0x16e   : > { %9495 = vmatprep.subr.bf16.mxu0 %v9494_v37  ;;  %9355 = vmatprep.subr.bf16.mxu1 %v11168_v18  ;;  %v9538_v17 = vpack.c.bf16 %v7844_v3, %v7843_v12  ;;  %v5820_v54 = vld [vmem:[%s11595_s3 + $0x68] sm:$0xff] }
 0x16f   : > { %9143 = vmatprep.mubr.f32.mxu0 %v1715_v6  ;;  %v7848_v6 = vld [vmem:[%s11595_s3 + $0x388] sm:$0xff] }
 0x170   : > { %9144 = vmatmul.mubr.f32.gmra.mrb[22].mxu0 %v1716_v33  ;;  %v9542_v33 = vpack.c.bf16 %v7846_v4, %v7845_v19 }
 0x171   : > { %9497 = vmatpush3.bf16.msra.mxu0 %v9494_v37  ;;  %v9534_v37 = vpack.c.bf16 %v7842_v2, %v7841_v63 }
 0x172   : > { %9499 = vmatprep.subr.bf16.mxu0 %v9498_v11 }
 0x175   : > { %9501 = vmatpush3.bf16.msra.mxu0 %v9498_v11  ;;  %v11233_v11 = vpack.c.bf16 %v7848_v6, %v7847_v5 }
 0x176   : > { %9503 = vmatprep.subr.bf16.mxu0 %v9502_v27 }
 0x179   : > { %9505 = vmatpush3.bf16.msra.mxu0 %v9502_v27 }
 0x17a   : > { %9507 = vmatprep.subr.bf16.mxu0 %v9506_v36 }
 0x17b   : > { %v8664_v20 = vpop.f32.mrb[8].mxu1 }
 0x17c   : > { %v3059_v34 = vadd.f32 %v8664_v20, %v11083_v22  ;;  %v3004_v24 = vpop.f32.mrb[9].mxu1 }
 0x17d   : > { %v3058_v61 = vadd.f32 %v11083_v22, %v3004_v24  ;;  %9509 = vmatpush3.bf16.msra.mxu0 %v9506_v36 }
 0x17e   : > { %v3067_v25 = vmax.f32 %v3059_v34, 0.0  ;;  %9511 = vmatprep.subr.bf16.mxu0 %v9510_v16 }
 0x17f   : > { %v3066_v29 = vmax.f32 %v3058_v61, 0.0  ;;  %v8667_v7 = vpop.f32.mrb[10].mxu1 }
 0x180   : > { %3076 = vst [vmem:[#allocation2 + $0x131] sm:$0xff] %v3067_v25  ;;  %v3061_v31 = vadd.f32 %v8667_v7, %v11083_v22  ;;  %v3014_v32 = vpop.f32.mrb[11].mxu1 }
 0x181   : > { %3075 = vst [vmem:[#allocation2 + $0x121] sm:$0xff] %v3066_v29  ;;  %v3060_v35 = vadd.f32 %v11083_v22, %v3014_v32  ;;  %9513 = vmatpush3.bf16.msra.mxu0 %v9510_v16  ;;  %9178 = vmatprep.mubr.f32.mxu0 %v3066_v29 }
 0x182   : > { %v3069_v38 = vmax.f32 %v3061_v31, 0.0  ;;  %9515 = vmatprep.subr.bf16.mxu0 %v9514_v28 }
 0x183   : > { %v3068_v40 = vmax.f32 %v3060_v35, 0.0  ;;  %v8670_v13 = vpop.f32.mrb[12].mxu1 }
 0x184   : > { %3078 = vst [vmem:[#allocation2 + $0x151] sm:$0xff] %v3069_v38  ;;  %v3063_v42 = vadd.f32 %v8670_v13, %v11083_v22  ;;  %v3024_v45 = vpop.f32.mrb[13].mxu1  ;;  %9179 = vmatmul.mubr.f32.vlgmr.msra.gmra.mrb[16].mxu0 %v3067_v25  ;;  %v5815_v13 = vld [vmem:[%s11595_s3 + $0x40] sm:$0xff] }
 0x185   : > { %3077 = vst [vmem:[#allocation2 + $0x141] sm:$0xff] %v3068_v40  ;;  %v3062_v46 = vadd.f32 %v11083_v22, %v3024_v45  ;;  %9181 = vmatprep.mubr.f32.mxu0 %v3068_v40  ;;  %9517 = vmatpush3.bf16.msra.mxu0 %v9514_v28  ;;  %v9362_v28 = vpack.c.bf16 %v5812_v21, %v5811_v23 }
 0x186   : > { %v3071_v47 = vmax.f32 %v3063_v42, 0.0  ;;  %9519 = vmatprep.subr.bf16.mxu0 %v9518_v39  ;;  %v9390_v21 = vpack.c.bf16 %v7770_v10, %v7769_v43  ;;  %v7858_v43 = vld [vmem:[%s11595_s3 + $0x3d8] sm:$0xff]  ;;  %v6059_v10 = vld [vmem:[#allocation2 + $0x1] sm:$0xff] }
 0x187   : > { %v3070_v51 = vmax.f32 %v3062_v46, 0.0  ;;  %v8673_v52 = vpop.f32.mrb[14].mxu1  ;;  %v9370_v46 = vpack.c.bf16 %v5816_v26, %v5815_v13  ;;  %v7772_v13 = vld [vmem:[%s11595_s3 + $0x128] sm:$0xff] }
 0x188   : > { %3080 = vst [vmem:[#allocation2 + $0x171] sm:$0xff] %v3071_v47  ;;  %v3065_v15 = vadd.f32 %v8673_v52, %v11083_v22  ;;  %v3034_v55 = vpop.f32.mrb[15].mxu1  ;;  %9182 = vmatmul.mubr.f32.gmra.mrb[18].mxu0 %v3069_v38 }
 0x189   : > { %3079 = vst [vmem:[#allocation2 + $0x161] sm:$0xff] %v3070_v51  ;;  %v3064_v1 = vadd.f32 %v11083_v22, %v3034_v55  ;;  %9184 = vmatprep.mubr.f32.mxu0 %v3070_v51  ;;  %9521 = vmatpush3.bf16.msra.mxu0 %v9518_v39  ;;  %v9940_v51 = vld [vmem:[#allocation2 + $0x1a0] sm:$0xff]  ;;  %v5821_v55 = vld [vmem:[%s11595_s3 + $0x70] sm:$0xff] }
 0x18a   : > { %v3073_v56 = vmax.f32 %v3065_v15, 0.0  ;;  %9523 = vmatprep.subr.bf16.mxu0 %v9522_v48  ;;  %v9378_v15 = vpack.c.bf16 %v5820_v54, %v5819_v53  ;;  %v7773_v53 = vld [vmem:[%s11595_s3 + $0x130] sm:$0xff]  ;;  %v7774_v54 = vld [vmem:[%s11595_s3 + $0x138] sm:$0xff] }
 0x18b   : > { %v3072_v58 = vmax.f32 %v3064_v1, 0.0  ;;  %v5822_v1 = vld [vmem:[%s11595_s3 + $0x78] sm:$0xff] }
 0x18c   : > { %3082 = vst [vmem:[#allocation2 + $0x191] sm:$0xff] %v3073_v56  ;;  %9185 = vmatmul.mubr.f32.gmra.mrb[20].mxu0 %v3071_v47  ;;  %v5817_v47 = vld [vmem:[%s11595_s3 + $0x50] sm:$0xff] }
 0x18d   : > { %3081 = vst [vmem:[#allocation2 + $0x181] sm:$0xff] %v3072_v58  ;;  %9187 = vmatprep.mubr.f32.mxu0 %v3072_v58  ;;  %9525 = vmatpush3.bf16.msra.mxu0 %v9522_v48  ;;  %v5818_v48 = vld [vmem:[%s11595_s3 + $0x58] sm:$0xff]  ;;  %v7768_v58 = vld [vmem:[%s11595_s3 + $0x108] sm:$0xff] }
 0x18e   : > { %9527 = vmatprep.subr.bf16.mxu0 %v9526_v57  ;;  %v9374_v52 = vpack.c.bf16 %v5818_v48, %v5817_v47  ;;  %v7852_v48 = vld [vmem:[%s11595_s3 + $0x3a8] sm:$0xff] }
 0x190   : > { %9188 = vmatmul.mubr.f32.gmra.mrb[22].mxu0 %v3073_v56  ;;  %v9382_v56 = vpack.c.bf16 %v5822_v1, %v5821_v55  ;;  %v7854_v1 = vld [vmem:[%s11595_s3 + $0x3b8] sm:$0xff] }
 0x191   : > { %9529 = vmatpush3.bf16.msra.mxu0 %v9526_v57  ;;  %v7767_v57 = vld [vmem:[%s11595_s3 + $0x100] sm:$0xff] }
 0x192   : > { %9531 = vmatprep.subr.bf16.mxu0 %v9530_v62  ;;  %v9386_v60 = vpack.c.bf16 %v7768_v58, %v7767_v57  ;;  %v9398_v57 = vpack.c.bf16 %v7774_v54, %v7773_v53  ;;  %v7775_v58 = vld [vmem:[%s11595_s3 + $0x140] sm:$0xff]  ;;  %v7785_v54 = vld [vmem:[%s11595_s3 + $0x190] sm:$0xff] }
 0x195   : > { %9533 = vmatpush3.bf16.msra.mxu0 %v9530_v62 }
 0x196   : > { %9535 = vmatprep.subr.bf16.mxu0 %v9534_v37 }
 0x199   : > { %9537 = vmatpush3.bf16.msra.mxu0 %v9534_v37 }
 0x19a   : > { %9539 = vmatprep.subr.bf16.mxu0 %v9538_v17 }
 0x19d   : > { %9541 = vmatpush3.bf16.msra.mxu0 %v9538_v17 }
 0x19e   : > { %9543 = vmatprep.subr.bf16.mxu0 %v9542_v33 }
 0x1a1   : > { %9545 = vmatpush3.bf16.msra.mxu0 %v9542_v33 }
 0x1a2   : > { %9547 = vmatprep.subr.bf16.mxu0 %v11233_v11 }
 0x1eb   : > { %v8790_v44 = vpop.f32.mrb[8].mxu0 }
 0x1ec   : > { %v11237_v8 = vadd.f32 %v8790_v44, %v11083_v22  ;;  %v4363_v27 = vpop.f32.mrb[9].mxu0 }
 0x1ed   : > { %v11246_v36 = vadd.f32 %v11083_v22, %v4363_v27 }
 0x1ee   : > { %v4426_v49 = vmax.f32 %v11237_v8, 0.0  ;;  %v7869_v8 = vld [vmem:[%s11595_s3 + $0x430] sm:$0xff] }
 0x1ef   : > { %v4425_v14 = vmax.f32 %v11246_v36, 0.0  ;;  %v8793_v50 = vpop.f32.mrb[10].mxu0  ;;  %v7860_v36 = vld [vmem:[%s11595_s3 + $0x3e8] sm:$0xff] }
 0x1f0   : > { %v11251_v16 = vadd.f32 %v8793_v50, %v11083_v22  ;;  %v4373_v20 = vpop.f32.mrb[11].mxu0 }
 0x1f1   : > { %v11260_v34 = vadd.f32 %v11083_v22, %v4373_v20  ;;  %8959 = vmatmul.mubr.f32.vlgmr.msra.gmra.mrb[24].mxu1 %v4425_v14 }
 0x1f2   : > { %v4428_v24 = vmax.f32 %v11251_v16, 0.0  ;;  %9357 = vmatpush3.bf16.msra.mxu1 %v11168_v18  ;;  %8961 = vmatprep.mubr.f32.mxu1 %v4426_v49  ;;  %v5814_v18 = vld [vmem:[%s11595_s3 + $0x38] sm:$0xff]  ;;  %v7871_v16 = vld [vmem:[%s11595_s3 + $0x440] sm:$0xff] }
 0x1f3   : > { %v4427_v61 = vmax.f32 %v11260_v34, 0.0  ;;  %v8796_v25 = vpop.f32.mrb[12].mxu0  ;;  %9359 = vmatprep.subr.bf16.mxu1 %v9358_v0  ;;  %v9366_v38 = vpack.c.bf16 %v5814_v18, %v5813_v30 }
 0x1f4   : > { %v11270_v29 = vadd.f32 %v8796_v25, %v11083_v22  ;;  %v4383_v7 = vpop.f32.mrb[13].mxu0  ;;  %v7849_v25 = vld [vmem:[%s11595_s3 + $0x390] sm:$0xff] }
 0x1f5   : > { %v11279_v9 = vadd.f32 %v11083_v22, %v4383_v7  ;;  %8962 = vmatmul.mubr.f32.gmra.mrb[26].mxu1 %v4427_v61 }
 0x1f6   : > { %v4430_v31 = vmax.f32 %v11270_v29, 0.0  ;;  %9361 = vmatpush3.bf16.msra.mxu1 %v9358_v0  ;;  %8964 = vmatprep.mubr.f32.mxu1 %v4428_v24 }
 0x1f7   : > { %v4429_v32 = vmax.f32 %v11279_v9, 0.0  ;;  %v8799_v35 = vpop.f32.mrb[14].mxu0  ;;  %9363 = vmatprep.subr.bf16.mxu1 %v9362_v28 }
 0x1f8   : > { %v11288_v39 = vadd.f32 %v8799_v35, %v11083_v22  ;;  %v4393_v40 = vpop.f32.mrb[15].mxu0 }
 0x1f9   : > { %v11297_v41 = vadd.f32 %v11083_v22, %v4393_v40  ;;  %8965 = vmatmul.mubr.f32.gmra.mrb[28].mxu1 %v4429_v32  ;;  %v7771_v40 = vld [vmem:[%s11595_s3 + $0x120] sm:$0xff] }
 0x1fa   : > { %v4432_v42 = vmax.f32 %v11288_v39, 0.0  ;;  %9365 = vmatpush3.bf16.msra.mxu1 %v9362_v28  ;;  %8967 = vmatprep.mubr.f32.mxu1 %v4430_v31  ;;  %v7850_v28 = vld [vmem:[%s11595_s3 + $0x398] sm:$0xff]  ;;  %v7875_v39 = vld [vmem:[%s11595_s3 + $0x460] sm:$0xff] }
 0x1fb   : > { %v4431_v45 = vmax.f32 %v11297_v41, 0.0  ;;  %9367 = vmatprep.subr.bf16.mxu1 %v9366_v38  ;;  %v7874_v41 = vld [vmem:[%s11595_s3 + $0x458] sm:$0xff] }
 0x1fd   : > { %8968 = vmatmul.mubr.f32.gmra.mrb[30].mxu1 %v4431_v45 }
 0x1fe   : > { %9369 = vmatpush3.bf16.msra.mxu1 %v9366_v38  ;;  %9002 = vmatprep.mubr.f32.mxu1 %v9940_v51 }
 0x1ff   : > { %9371 = vmatprep.subr.bf16.mxu1 %v9370_v46 }
 0x202   : > { %9373 = vmatpush3.bf16.msra.mxu1 %v9370_v46  ;;  %v9550_v46 = vpack.c.bf16 %v7850_v28, %v7849_v25  ;;  %v7859_v28 = vld [vmem:[%s11595_s3 + $0x3e0] sm:$0xff] }
 0x203   : > { %9375 = vmatprep.subr.bf16.mxu1 %v9374_v52 }
 0x206   : > { %9377 = vmatpush3.bf16.msra.mxu1 %v9374_v52  ;;  %v9394_v52 = vpack.c.bf16 %v7772_v13, %v7771_v40  ;;  %v7862_v40 = vld [vmem:[%s11595_s3 + $0x3f8] sm:$0xff] }
 0x207   : > { %9379 = vmatprep.subr.bf16.mxu1 %v9378_v15 }
 0x20a   : > { %9381 = vmatpush3.bf16.msra.mxu1 %v9378_v15 }
 0x20b   : > { %v8916_v59 = vpop.f32.mrb[16].mxu1  ;;  %9383 = vmatprep.subr.bf16.mxu1 %v9382_v56 }
 0x20c   : > { %v5775_v62 = vadd.f32 %v8916_v59, %v11083_v22  ;;  %v5720_v63 = vpop.f32.mrb[17].mxu1  ;;  %v7776_v59 = vld [vmem:[%s11595_s3 + $0x148] sm:$0xff] }
 0x20d   : > { %v5774_v2 = vadd.f32 %v11083_v22, %v5720_v63  ;;  %v7855_v63 = vld [vmem:[%s11595_s3 + $0x3c0] sm:$0xff] }
 0x20e   : > { %v11333_v37 = vmax.f32 %v5775_v62, 0.0  ;;  %9385 = vmatpush3.bf16.msra.mxu1 %v9382_v56 }
 0x20f   : > { %v11335_v12 = vmax.f32 %v5774_v2, 0.0  ;;  %v8919_v3 = vpop.f32.mrb[18].mxu1  ;;  %9387 = vmatprep.subr.bf16.mxu1 %v9386_v60  ;;  %v7856_v2 = vld [vmem:[%s11595_s3 + $0x3c8] sm:$0xff] }
 0x210   : > { %5792 = vst [vmem:[#allocation2 + $0x21] sm:$0xff] %v11333_v37  ;;  %v5777_v17 = vadd.f32 %v8919_v3, %v11083_v22  ;;  %v5730_v19 = vpop.f32.mrb[19].mxu1  ;;  %v9402_v3 = vpack.c.bf16 %v7776_v59, %v7775_v58  ;;  %v7788_v58 = vld [vmem:[%s11595_s3 + $0x1a8] sm:$0xff] }
 0x211   : > { %5791 = vst [vmem:[#allocation2 + $0x11] sm:$0xff] %v11335_v12  ;;  %v5776_v4 = vadd.f32 %v11083_v22, %v5730_v19  ;;  %v7777_v19 = vld [vmem:[%s11595_s3 + $0x150] sm:$0xff] }
 0x212   : > { %v11341_v33 = vmax.f32 %v5777_v17, 0.0 }
 0x213   : > { %v11343_v5 = vmax.f32 %v5776_v4, 0.0  ;;  %v8922_v6 = vpop.f32.mrb[20].mxu1  ;;  %v7778_v4 = vld [vmem:[%s11595_s3 + $0x158] sm:$0xff] }
 0x214   : > { %5794 = vst [vmem:[#allocation2 + $0x41] sm:$0xff] %v11341_v33  ;;  %v5779_v44 = vadd.f32 %v8922_v6, %v11083_v22  ;;  %v5740_v27 = vpop.f32.mrb[21].mxu1  ;;  %v9562_v6 = vpack.c.bf16 %v7856_v2, %v7855_v63  ;;  %v7789_v2 = vld [vmem:[%s11595_s3 + $0x1b0] sm:$0xff] }
 0x215   : > { %5793 = vst [vmem:[#allocation2 + $0x31] sm:$0xff] %v11343_v5  ;;  %v5778_v50 = vadd.f32 %v11083_v22, %v5740_v27 }
 0x216   : > { %v11355_v0 = vmax.f32 %v5779_v44, 0.0  ;;  %v7857_v44 = vld [vmem:[%s11595_s3 + $0x3d0] sm:$0xff] }
 0x217   : > { %v11357_v20 = vmax.f32 %v5778_v50, 0.0  ;;  %v8925_v23 = vpop.f32.mrb[22].mxu1  ;;  %v5801_v38 = vld [vmem:[#allocation2 + $0x20] sm:$0xff]  ;;  %v9406_v50 = vpack.c.bf16 %v7778_v4, %v7777_v19  ;;  %v9566_v25 = vpack.c.bf16 %v7858_v43, %v7857_v44  ;;  %v7792_v19 = vld [vmem:[%s11595_s3 + $0x1c8] sm:$0xff] }
 0x218   : > { %5796 = vst [vmem:[#allocation2 + $0x61] sm:$0xff] %v11355_v0  ;;  %v11367_v7 = vadd.f32 %v8925_v23, %v11083_v22  ;;  %v5750_v30 = vpop.f32.mrb[23].mxu1  ;;  %v5800_v18 = vld [vmem:[#allocation2 + $0x10] sm:$0xff]  ;;  %v7779_v23 = vld [vmem:[%s11595_s3 + $0x160] sm:$0xff]  ;;  %v7796_v43 = vld [vmem:[%s11595_s3 + $0x1e8] sm:$0xff] }
 0x219   : > { %5795 = vst [vmem:[#allocation2 + $0x51] sm:$0xff] %v11357_v20  ;;  %v5780_v35 = vadd.f32 %v11083_v22, %v5750_v30  ;;  %9003 = vmatmul.mubr.f32.vlgmr.msra.gmra.mrb[24].mxu1 %v5800_v18  ;;  %9222 = vmatprep.mubr.f32.mxu0 %v5800_v18  ;;  %v7851_v22 = vld [vmem:[%s11595_s3 + $0x3a0] sm:$0xff]  ;;  %v7781_v30 = vld [vmem:[%s11595_s3 + $0x170] sm:$0xff]  ;;  %v7782_v18 = vld [vmem:[%s11595_s3 + $0x178] sm:$0xff] }
 0x21a   : > { %v5789_v26 = vmax.f32 %v11367_v7, 0.0  ;;  %9389 = vmatpush3.bf16.msra.mxu1 %v9386_v60  ;;  %9005 = vmatprep.mubr.f32.mxu1 %v5801_v38  ;;  %v9554_v55 = vpack.c.bf16 %v7852_v48, %v7851_v22  ;;  %v9414_v13 = vpack.c.bf16 %v7782_v18, %v7781_v30  ;;  %v7784_v22 = vld [vmem:[%s11595_s3 + $0x188] sm:$0xff]  ;;  %v6197_v44 = vld [vmem:[#allocation2 + $0x120] sm:$0xff]  ;;  %v6198_v30 = vld [vmem:[#allocation2 + $0x130] sm:$0xff] }
 0x21b   : > { %v11378_v47 = vmax.f32 %v5780_v35, 0.0  ;;  %9223 = vmatmul.mubr.f32.vlgmr.msra.gmra.mrb[16].mxu0 %v5801_v38  ;;  %9391 = vmatprep.subr.bf16.mxu1 %v9390_v21  ;;  %v5803_v15 = vld [vmem:[#allocation2 + $0x40] sm:$0xff]  ;;  %v9570_v35 = vpack.c.bf16 %v7860_v36, %v7859_v28  ;;  %v7861_v38 = vld [vmem:[%s11595_s3 + $0x3f0] sm:$0xff]  ;;  %v7878_v28 = vld [vmem:[%s11595_s3 + $0x478] sm:$0xff] }
 0x21c   : > { %5798 = vst [vmem:[#allocation2 + $0x81] sm:$0xff] %v5789_v26  ;;  %9549 = vmatpush3.bf16.msra.mxu0 %v11233_v11  ;;  %v5802_v51 = vld [vmem:[#allocation2 + $0x30] sm:$0xff]  ;;  %v9574_v48 = vpack.c.bf16 %v7862_v40, %v7861_v38  ;;  %v6199_v18 = vld [vmem:[#allocation2 + $0x140] sm:$0xff] }
 0x21d   : > { %5797 = vst [vmem:[#allocation2 + $0x71] sm:$0xff] %v11378_v47  ;;  %9006 = vmatmul.mubr.f32.gmra.mrb[26].mxu1 %v5802_v51  ;;  %9225 = vmatprep.mubr.f32.mxu0 %v5802_v51  ;;  %v7853_v11 = vld [vmem:[%s11595_s3 + $0x3b0] sm:$0xff]  ;;  %v7863_v51 = vld [vmem:[%s11595_s3 + $0x400] sm:$0xff] }
 0x21e   : > { %9393 = vmatpush3.bf16.msra.mxu1 %v9390_v21  ;;  %9551 = vmatprep.subr.bf16.mxu0 %v9550_v46  ;;  %v9558_v62 = vpack.c.bf16 %v7854_v1, %v7853_v11  ;;  %v7780_v21 = vld [vmem:[%s11595_s3 + $0x168] sm:$0xff]  ;;  %v7865_v11 = vld [vmem:[%s11595_s3 + $0x410] sm:$0xff]  ;;  %v7866_v1 = vld [vmem:[%s11595_s3 + $0x418] sm:$0xff] }
 0x21f   : > { %9008 = vmatprep.mubr.f32.mxu1 %v5803_v15  ;;  %9226 = vmatmul.mubr.f32.gmra.mrb[18].mxu0 %v5803_v15  ;;  %v5805_v60 = vld [vmem:[#allocation2 + $0x60] sm:$0xff]  ;;  %v7786_v15 = vld [vmem:[%s11595_s3 + $0x198] sm:$0xff]  ;;  %v9582_v59 = vpack.c.bf16 %v7866_v1, %v7865_v11  ;;  %v6202_v40 = vld [vmem:[#allocation2 + $0x170] sm:$0xff] }
 0x220   : > { %9553 = vmatpush3.bf16.msra.mxu0 %v9550_v46  ;;  %9395 = vmatprep.subr.bf16.mxu1 %v9394_v52  ;;  %v5804_v56 = vld [vmem:[#allocation2 + $0x50] sm:$0xff]  ;;  %v7783_v46 = vld [vmem:[%s11595_s3 + $0x180] sm:$0xff] }
 0x221   : > { %9009 = vmatmul.mubr.f32.gmra.mrb[28].mxu1 %v5804_v56  ;;  %9228 = vmatprep.mubr.f32.mxu0 %v5804_v56  ;;  %v9418_v53 = vpack.c.bf16 %v7784_v22, %v7783_v46  ;;  %v9422_v56 = vpack.c.bf16 %v7786_v15, %v7785_v54  ;;  %v6201_v38 = vld [vmem:[#allocation2 + $0x160] sm:$0xff]  ;;  %v6204_v46 = vld [vmem:[#allocation2 + $0x190] sm:$0xff] }
 0x222   : > { %9397 = vmatpush3.bf16.msra.mxu1 %v9394_v52  ;;  %9555 = vmatprep.subr.bf16.mxu0 %v9554_v55  ;;  %v7864_v52 = vld [vmem:[%s11595_s3 + $0x408] sm:$0xff] }
 0x223   : > { %9011 = vmatprep.mubr.f32.mxu1 %v5805_v60  ;;  %9229 = vmatmul.mubr.f32.gmra.mrb[20].mxu0 %v5805_v60  ;;  %v6618_v27 = vld [vmem:[#allocation2 + $0x80] sm:$0xff] }
 0x224   : > { %9557 = vmatpush3.bf16.msra.mxu0 %v9554_v55  ;;  %9399 = vmatprep.subr.bf16.mxu1 %v9398_v57  ;;  %v5806_v17 = vld [vmem:[#allocation2 + $0x70] sm:$0xff]  ;;  %v9578_v55 = vpack.c.bf16 %v7864_v52, %v7863_v51  ;;  %v7867_v60 = vld [vmem:[%s11595_s3 + $0x420] sm:$0xff] }
 0x225   : > { %9012 = vmatmul.mubr.f32.gmra.mrb[30].mxu1 %v5806_v17  ;;  %9231 = vmatprep.mubr.f32.mxu0 %v5806_v17 }
 0x226   : > { %9401 = vmatpush3.bf16.msra.mxu1 %v9398_v57  ;;  %9559 = vmatprep.subr.bf16.mxu0 %v9558_v62  ;;  %v7787_v57 = vld [vmem:[%s11595_s3 + $0x1a0] sm:$0xff] }
 0x227   : > { %9232 = vmatmul.mubr.f32.gmra.mrb[22].mxu0 %v6618_v27  ;;  %9403 = vmatprep.subr.bf16.mxu1 %v9402_v3  ;;  %v9426_v63 = vpack.c.bf16 %v7788_v58, %v7787_v57  ;;  %v7795_v27 = vld [vmem:[%s11595_s3 + $0x1e0] sm:$0xff] }
 0x228   : > { %9561 = vmatpush3.bf16.msra.mxu0 %v9558_v62  ;;  %9266 = vmatprep.mubr.f32.mxu0 %v4425_v14  ;;  %v9410_v14 = vpack.c.bf16 %v7780_v21, %v7779_v23  ;;  %v7868_v62 = vld [vmem:[%s11595_s3 + $0x428] sm:$0xff]  ;;  %v7798_v23 = vld [vmem:[%s11595_s3 + $0x1f8] sm:$0xff] }
 0x229   : > { %9563 = vmatprep.subr.bf16.mxu0 %v9562_v6  ;;  %9046 = vmatprep.mubr.f32.mxu1 %v6059_v10  ;;  %v9586_v17 = vpack.c.bf16 %v7868_v62, %v7867_v60 }
 0x22a   : > { %9405 = vmatpush3.bf16.msra.mxu1 %v9402_v3  ;;  %v7790_v3 = vld [vmem:[%s11595_s3 + $0x1b8] sm:$0xff] }
 0x22b   : > { %9407 = vmatprep.subr.bf16.mxu1 %v9406_v50  ;;  %v9430_v34 = vpack.c.bf16 %v7790_v3, %v7789_v2 }
 0x22c   : > { %9565 = vmatpush3.bf16.msra.mxu0 %v9562_v6  ;;  %v7794_v6 = vld [vmem:[%s11595_s3 + $0x1d8] sm:$0xff] }
 0x22d   : > { %9567 = vmatprep.subr.bf16.mxu0 %v9566_v25 }
 0x22e   : > { %9409 = vmatpush3.bf16.msra.mxu1 %v9406_v50  ;;  %v7797_v50 = vld [vmem:[%s11595_s3 + $0x1f0] sm:$0xff] }
 0x22f   : > { %9411 = vmatprep.subr.bf16.mxu1 %v9410_v14  ;;  %v9446_v36 = vpack.c.bf16 %v7798_v23, %v7797_v50 }
 0x230   : > { %9569 = vmatpush3.bf16.msra.mxu0 %v9566_v25  ;;  %v7877_v25 = vld [vmem:[%s11595_s3 + $0x470] sm:$0xff] }
 0x231   : > { %9571 = vmatprep.subr.bf16.mxu0 %v9570_v35 }
 0x232   : > { %9413 = vmatpush3.bf16.msra.mxu1 %v9410_v14  ;;  %v9606_v14 = vpack.c.bf16 %v7878_v28, %v7877_v25  ;;  %v7063_v28 = vld [vmem:[%s11597_s5] sm:$0x1] }
 0x233   : > { %9415 = vmatprep.subr.bf16.mxu1 %v9414_v13 }
 0x234   : > { %9573 = vmatpush3.bf16.msra.mxu0 %v9570_v35  ;;  %v6200_v35 = vld [vmem:[#allocation2 + $0x150] sm:$0xff] }
 0x235   : > { %9575 = vmatprep.subr.bf16.mxu0 %v9574_v48 }
 0x236   : > { %9417 = vmatpush3.bf16.msra.mxu1 %v9414_v13  ;;  %v6203_v13 = vld [vmem:[#allocation2 + $0x180] sm:$0xff] }
 0x237   : > { %9419 = vmatprep.subr.bf16.mxu1 %v9418_v53 }
 0x238   : > { %9577 = vmatpush3.bf16.msra.mxu0 %v9574_v48 }
 0x239   : > { %9047 = vmatmul.mubr.f32.vlgmr.msra.gmra.mrb[24].mxu1 %v11335_v12  ;;  %9579 = vmatprep.subr.bf16.mxu0 %v9578_v55 }
 0x23a   : > { %9049 = vmatprep.mubr.f32.mxu1 %v11333_v37  ;;  %9421 = vmatpush3.bf16.msra.mxu1 %v9418_v53 }
 0x23b   : > { %9267 = vmatmul.mubr.f32.vlgmr.msra.gmra.mrb[16].mxu0 %v4426_v49  ;;  %9423 = vmatprep.subr.bf16.mxu1 %v9422_v56  ;;  %v7870_v49 = vld [vmem:[%s11595_s3 + $0x438] sm:$0xff] }
 0x23c   : > { %9269 = vmatprep.mubr.f32.mxu0 %v4427_v61  ;;  %9581 = vmatpush3.bf16.msra.mxu0 %v9578_v55  ;;  %v7791_v61 = vld [vmem:[%s11595_s3 + $0x1c0] sm:$0xff]  ;;  %v9590_v4 = vpack.c.bf16 %v7870_v49, %v7869_v8 }
 0x23d   : > { %9050 = vmatmul.mubr.f32.gmra.mrb[26].mxu1 %v11343_v5  ;;  %9583 = vmatprep.subr.bf16.mxu0 %v9582_v59  ;;  %v9434_v9 = vpack.c.bf16 %v7792_v19, %v7791_v61 }
 0x23e   : > { %9052 = vmatprep.mubr.f32.mxu1 %v11341_v33  ;;  %9425 = vmatpush3.bf16.msra.mxu1 %v9422_v56 }
 0x23f   : > { %9270 = vmatmul.mubr.f32.gmra.mrb[18].mxu0 %v4428_v24  ;;  %9427 = vmatprep.subr.bf16.mxu1 %v9426_v63  ;;  %v7872_v24 = vld [vmem:[%s11595_s3 + $0x448] sm:$0xff] }
 0x240   : > { %9272 = vmatprep.mubr.f32.mxu0 %v4429_v32  ;;  %9585 = vmatpush3.bf16.msra.mxu0 %v9582_v59  ;;  %v7793_v32 = vld [vmem:[%s11595_s3 + $0x1d0] sm:$0xff]  ;;  %v9594_v29 = vpack.c.bf16 %v7872_v24, %v7871_v16 }
 0x241   : > { %9053 = vmatmul.mubr.f32.gmra.mrb[28].mxu1 %v11357_v20  ;;  %9587 = vmatprep.subr.bf16.mxu0 %v9586_v17 }
 0x242   : > { %9055 = vmatprep.mubr.f32.mxu1 %v11355_v0  ;;  %9429 = vmatpush3.bf16.msra.mxu1 %v9426_v63 }
 0x243   : > { %9273 = vmatmul.mubr.f32.gmra.mrb[20].mxu0 %v4430_v31  ;;  %9431 = vmatprep.subr.bf16.mxu1 %v9430_v34  ;;  %v7873_v31 = vld [vmem:[%s11595_s3 + $0x450] sm:$0xff] }
 0x244   : > { %9275 = vmatprep.mubr.f32.mxu0 %v4431_v45  ;;  %9589 = vmatpush3.bf16.msra.mxu0 %v9586_v17  ;;  %v9438_v45 = vpack.c.bf16 %v7794_v6, %v7793_v32  ;;  %v9598_v10 = vpack.c.bf16 %v7874_v41, %v7873_v31 }
 0x245   : > { %9056 = vmatmul.mubr.f32.gmra.mrb[30].mxu1 %v11378_v47  ;;  %9591 = vmatprep.subr.bf16.mxu0 %v9590_v4 }
 0x246   : > { %9433 = vmatpush3.bf16.msra.mxu1 %v9430_v34  ;;  %9090 = vmatprep.mubr.f32.mxu1 %v6197_v44 }
 0x247   : > { %9276 = vmatmul.mubr.f32.gmra.mrb[22].mxu0 %v4432_v42  ;;  %9435 = vmatprep.subr.bf16.mxu1 %v9434_v9  ;;  %v7876_v42 = vld [vmem:[%s11595_s3 + $0x468] sm:$0xff] }
 0x248   : > { %9593 = vmatpush3.bf16.msra.mxu0 %v9590_v4  ;;  %9310 = vmatprep.mubr.f32.mxu0 %v11335_v12  ;;  %v9442_v12 = vpack.c.bf16 %v7796_v43, %v7795_v27  ;;  %v9602_v21 = vpack.c.bf16 %v7876_v42, %v7875_v39 }
 0x249   : > { %9595 = vmatprep.subr.bf16.mxu0 %v9594_v29 }
 0x24a   : > { %9437 = vmatpush3.bf16.msra.mxu1 %v9434_v9 }
 0x24b   : > { %9439 = vmatprep.subr.bf16.mxu1 %v9438_v45 }
 0x24c   : > { %9597 = vmatpush3.bf16.msra.mxu0 %v9594_v29 }
 0x24d   : > { %9599 = vmatprep.subr.bf16.mxu0 %v9598_v10 }
 0x24e   : > { %9441 = vmatpush3.bf16.msra.mxu1 %v9438_v45 }
 0x24f   : > { %9443 = vmatprep.subr.bf16.mxu1 %v9442_v12 }
 0x250   : > { %9601 = vmatpush3.bf16.msra.mxu0 %v9598_v10 }
 0x251   : > { %9603 = vmatprep.subr.bf16.mxu0 %v9602_v21 }
 0x252   : > { %9445 = vmatpush3.bf16.msra.mxu1 %v9442_v12 }
 0x253   : > { %9447 = vmatprep.subr.bf16.mxu1 %v9446_v36 }
 0x254   : > { %9605 = vmatpush3.bf16.msra.mxu0 %v9602_v21 }
 0x255   : > { %9607 = vmatprep.subr.bf16.mxu0 %v9606_v14 }
 0x256   : > { %9449 = vmatpush3.bf16.msra.mxu1 %v9446_v36 }
 0x258   : > { %9609 = vmatpush3.bf16.msra.mxu0 %v9606_v14 }
 0x259   : > { %9091 = vmatmul.mubr.f32.vlgmr.msra.gmra.mrb[24].mxu1 %v6198_v30 }
 0x25a   : > { %9093 = vmatprep.mubr.f32.mxu1 %v6199_v18  ;;  %v7069_v18 = vld [vmem:[#allocation3] sm:$0x1] }
 0x25b   : > { %9311 = vmatmul.mubr.f32.vlgmr.msra.gmra.mrb[16].mxu0 %v11333_v37 }
 0x25c   : > { %9313 = vmatprep.mubr.f32.mxu0 %v11343_v5 }
 0x25d   : > { %9094 = vmatmul.mubr.f32.gmra.mrb[26].mxu1 %v6200_v35 }
 0x25e   : > { %9096 = vmatprep.mubr.f32.mxu1 %v6201_v38 }
 0x25f   : > { %9314 = vmatmul.mubr.f32.gmra.mrb[18].mxu0 %v11341_v33  ;;  %v7879_v33 = vld [vmem:[%s11596_s4] ss:$0 sm:$0xff] }
 0x260   : > { %9316 = vmatprep.mubr.f32.mxu0 %v11357_v20 }
 0x261   : > { %9097 = vmatmul.mubr.f32.gmra.mrb[28].mxu1 %v6202_v40 }
 0x262   : > { %9099 = vmatprep.mubr.f32.mxu1 %v6203_v13 }
 0x263   : > { %9317 = vmatmul.mubr.f32.gmra.mrb[20].mxu0 %v11355_v0 }
 0x264   : > { %9319 = vmatprep.mubr.f32.mxu0 %v11378_v47 }
 0x265   : > { %9100 = vmatmul.mubr.f32.gmra.mrb[30].mxu1 %v6204_v46 }
 0x267   : > { %9320 = vmatmul.mubr.f32.gmra.mrb[22].mxu0 %v5789_v26 }
 0x32c   : > { %v9092_v37 = vpop.f32.mrb[24].mxu1 }
 0x32d   : > { %v6288_v5 = vpop.f32.mrb[25].mxu1 }
 0x32e   : > { %v9312_v22 = vpop.f32.mrb[16].mxu0 }
 0x32f   : > { %v9618_v20 = vadd.f32 %v9312_v22, %v9092_v37  ;;  %v6978_v48 = vpop.f32.mrb[17].mxu0 }
 0x330   : > { %v9619_v51 = vadd.f32 %v6978_v48, %v6288_v5  ;;  %v9095_v52 = vpop.f32.mrb[26].mxu1 }
 0x331   : > { %v7033_v53 = vadd.f32 %v9618_v20, %v7879_v33  ;;  %v6298_v0 = vpop.f32.mrb[27].mxu1 }
 0x332   : > { %v7032_v54 = vadd.f32 %v9619_v51, %v7879_v33  ;;  %v9315_v47 = vpop.f32.mrb[18].mxu0 }
 0x333   : > { %v7041_v15 = vmax.f32 %v7033_v53, 0.0  ;;  %v9620_v55 = vadd.f32 %v9315_v47, %v9095_v52  ;;  %v6988_v11 = vpop.f32.mrb[19].mxu0 }
 0x334   : > { %v7040_v7 = vmax.f32 %v7032_v54, 0.0  ;;  %v9621_v26 = vadd.f32 %v6988_v11, %v6298_v0  ;;  %v9098_v1 = vpop.f32.mrb[28].mxu1 }
 0x335   : > { %v6308_v56 = vpop.f32.mrb[29].mxu1  ;;  %v7035_v58 = vadd.f32 %v9620_v55, %v7879_v33 }
 0x336   : > { %v7048_v57 = vadd.f32 %v7041_v15, %v7040_v7  ;;  %v7034_v59 = vadd.f32 %v9621_v26, %v7879_v33  ;;  %v9318_v60 = vpop.f32.mrb[20].mxu0 }
 0x337   : > { %v9622_v62 = vadd.f32 %v9318_v60, %v9098_v1  ;;  %v6998_v63 = vpop.f32.mrb[21].mxu0  ;;  %v7043_v49 = vmax.f32 %v7035_v58, 0.0 }
 0x338   : > { %v7042_v2 = vmax.f32 %v7034_v59, 0.0  ;;  %v9623_v3 = vadd.f32 %v6998_v63, %v6308_v56  ;;  %v9101_v17 = vpop.f32.mrb[30].mxu1 }
 0x339   : > { %v6318_v8 = vpop.f32.mrb[31].mxu1  ;;  %v7037_v61 = vadd.f32 %v9622_v62, %v7879_v33 }
 0x33a   : > { %v7049_v34 = vadd.f32 %v7048_v57, %v7042_v2  ;;  %v7036_v19 = vadd.f32 %v9623_v3, %v7879_v33  ;;  %v9321_v4 = vpop.f32.mrb[22].mxu0 }
 0x33b   : > { %v9624_v16 = vadd.f32 %v9321_v4, %v9101_v17  ;;  %v7008_v24 = vpop.f32.mrb[23].mxu0  ;;  %v7045_v44 = vmax.f32 %v7037_v61, 0.0 }
 0x33c   : > { %v7044_v9 = vmax.f32 %v7036_v19, 0.0  ;;  %v7050_v32 = vadd.f32 %v7049_v34, %v7043_v49  ;;  %v9625_v6 = vadd.f32 %v7008_v24, %v6318_v8 }
 0x33d   : > { %v7039_v31 = vadd.f32 %v9624_v16, %v7879_v33 }
 0x33e   : > { %v7051_v29 = vadd.f32 %v7050_v32, %v7044_v9  ;;  %v7038_v41 = vadd.f32 %v9625_v6, %v7879_v33 }
 0x33f   : > { %v7047_v43 = vmax.f32 %v7039_v31, 0.0 }
 0x340   : > { %v7046_v45 = vmax.f32 %v7038_v41, 0.0  ;;  %v7052_v27 = vadd.f32 %v7051_v29, %v7045_v44 }
 0x342   : > { %v7053_v10 = vadd.f32 %v7052_v27, %v7046_v45 }
 0x344   : > { %v7054_v39 = vadd.f32 %v7053_v10, %v7047_v43 }
 0x346   : > { %v7055_v42 = vrot.slane %v7054_v39, 4 }
 0x348   : > { %v7056_v12 = vadd.f32 %v7055_v42, %v7054_v39 }
 0x34a   : > { %v7057_v50 = vrot.slane %v7056_v12, 2 }
 0x34c   : > { %v7058_v23 = vadd.f32 %v7057_v50, %v7056_v12 }
 0x34e   : > { %v7059_v21 = vrot.slane %v7058_v23, 1 }
 0x350   : > { %v7060_v25 = vadd.f32 %v7059_v21, %v7058_v23 }
 0x352   : > { %v7062_v36 = vmul.f32 0.015625, %v7060_v25 }
 0x354   : > { %v7064_v14 = vmul.f32 %v7063_v28, %v7062_v36 }
 0x356   : > { %v7066_v30 = vsel %vm7065_vm2, %v7064_v14, 0.0 }
 0x357   : > { %7067 = vadd.xlane.f32.xlu0 %v7066_v30 }
 0x3e4   : > { %v7068_v35 = vpop.xlane.xlu0 %7067 }
 0x3e5   : > { %v7070_v38 = vadd.f32 %v7069_v18, %v7068_v35 }
 0x3e7   : > { %7072 = vst.msk [vmem:[%s281_s8] sm:$0x1] %vm7071_vm3, %v7070_v38 }
 0x3e8 PF: > { %s19_s26 = sadd.s32 1, %s9947_s26  }
 0x3e9   : > { %p16_p5 = scmp.ge.s32.totalorder %s19_s26, 4  }
 0x3eb   :  { %18 = sbr.rel (!%p16_p5) target bundleno = 3 (0x3), region = 106 }

</bundles_post_ra>
